<compile_context>
chip_gen: v6e
topology: v6e:2x2x1
jax: 0.10.0
libtpu: 0.0.40
codegen_flags: <defaults>
</compile_context>

<pallas_src>
import functools

import jax
import jax.numpy as jnp
from jax.experimental import pallas as pl
from jax.experimental.pallas import tpu as pltpu

_SQRT2 = 1.4142135623730951


def _gelu(x, approximate=False):
    if approximate:
        # tanh approximation routes to the EUP (free VLIW slot); use only when
        # a ~1e-3 deviation from torch's exact GELU is acceptable.
        return jax.nn.gelu(x, approximate=True)
    # Exact erf-based GELU (matches torch.nn.functional.gelu default).
    return 0.5 * x * (1.0 + jax.lax.erf(x / _SQRT2))


# ----------------------------------------------------------------------------
# Fused kernel:
#   x = gelu(x + ffn1(x)); for k: x = gelu(x + dwconv_k(x));
#   x = gelu(x + pw(x));   out = ffn2(x)
# ----------------------------------------------------------------------------
def _make_fused_kernel(k_conv, C_in, W, tile, mm_dtype, approx_gelu):
    n_dw = len(k_conv)
    pmax = max(k_conv) // 2

    def kernel(*refs):
        x_ref, colmask_ref, rowmask_ref = refs[0], refs[1], refs[2]
        f1w1, f1b1, f1w2, f1b2 = refs[3:7]
        dw_refs = refs[7:7 + 2 * n_dw]
        pw_w, pw_b = refs[7 + 2 * n_dw], refs[8 + 2 * n_dw]
        f2w1, f2b1, f2w2, f2b2 = refs[9 + 2 * n_dw:13 + 2 * n_dw]
        o_ref = refs[13 + 2 * n_dw]

        gelu = lambda v: _gelu(v, approx_gelu)

        def conv1x1(h, w_ref, b_ref):
            # (Cout, Cin) @ (Cin, TILE) on the MXU with f32 accumulation.
            # Operands cast to mm_dtype (bf16 by default); bias stays f32.
            return (jnp.dot(w_ref[...], h.astype(mm_dtype),
                            preferred_element_type=jnp.float32) + b_ref[...])

        x = x_ref[...]                           # (C_in, TILE) f32

        # ---- x = gelu(x + ffn1(x)) ----
        h = gelu(conv1x1(x, f1w1, f1b1))
        x = gelu(x + conv1x1(h, f1w2, f1b2))

        # ---- depthwise k x k convs: x = gelu(x + dwconv(x)) ----
        # Each tap is an XLU lane-roll + masked VPU FMA.  Row/column validity
        # masks replace zero padding and kill cross-image bleed inside a tile
        # as well as the circular wrap of the roll.
        # TODO(synk): at production pixel-tile sizes switch the tap loop to
        # lax.fori_loop(..., unroll=True) to bound vreg live ranges.
        for li, k in enumerate(k_conv):
            p = k // 2
            wk = dw_refs[2 * li][...]            # (C_in, k*k), row-major (dy,dx)
            bk = dw_refs[2 * li + 1][...]        # (C_in, 1)
            acc = jnp.broadcast_to(bk, (C_in, tile))   # bias as accumulator init
            for dx in range(-p, p + 1):
                if dx == 0:
                    x_dx = x
                else:
                    # Column mask hoisted: applied once per dx, reused by all dy.
                    x_dx = (pltpu.roll(x, shift=(-dx) % tile, axis=1)
                            * colmask_ref[pmax + dx:pmax + dx + 1, :])
                for dy in range(-p, p + 1):
                    t = (dy + p) * k + (dx + p)
                    if dy == 0:
                        sl = x_dx
                    else:
                        sl = (pltpu.roll(x_dx, shift=(-dy * W) % tile, axis=1)
                              * rowmask_ref[pmax + dy:pmax + dy + 1, :])
                    acc = acc + wk[:, t:t + 1] * sl
            x = gelu(x + acc)

        # ---- x = gelu(x + pw(x)) ----
        x = gelu(x + conv1x1(x, pw_w, pw_b))

        # ---- out = ffn2(x)   (no residual, no trailing GELU) ----
        h = gelu(conv1x1(x, f2w1, f2b1))
        o_ref[...] = conv1x1(h, f2w2, f2b2).astype(o_ref.dtype)

    return kernel


# ----------------------------------------------------------------------------
# Host-side helpers
# ----------------------------------------------------------------------------
def _tap_masks(H, W, pmax, images_per_tile):
    """(2*pmax+1, Nb*H*W) column / row validity masks for one pixel tile.

    colmask[pmax+dx, q] = 1 iff 0 <= col(q)+dx < W
    rowmask[pmax+dy, q] = 1 iff 0 <= row_in_image(q)+dy < H
    """
    d = jnp.arange(-pmax, pmax + 1, dtype=jnp.int32)[:, None]
    col = jnp.tile(jnp.arange(W, dtype=jnp.int32), H * images_per_tile)[None, :]
    row = jnp.tile(jnp.repeat(jnp.arange(H, dtype=jnp.int32), W),
                   images_per_tile)[None, :]
    colmask = ((col + d >= 0) & (col + d < W)).astype(jnp.float32)
    rowmask = ((row + d >= 0) & (row + d < H)).astype(jnp.float32)
    return colmask, rowmask


def _prep_weights(params, k_conv, C_in, mm_dtype):
    """PyTorch state_dict layouts -> kernel layouts (channels on sublanes).

    1x1 weights go to `mm_dtype` (bf16 by default) for the MXU; biases and
    depthwise taps stay f32 (VPU path).  The hidden channel count is padded
    to a multiple of 8 so intermediate tiles use full sublanes.
    """
    def pad8(c):
        return (-c) % 8

    def w1x1(name, pad_out=0, pad_in=0):   # (Cout, Cin, 1, 1) -> (Cout, Cin)
        w = params[name][:, :, 0, 0].astype(jnp.float32)
        w = jnp.pad(w, ((0, pad_out), (0, pad_in)))
        return w.astype(mm_dtype)

    def bias(name, pad=0):                 # (Cout,) -> (Cout, 1)
        b = params[name].astype(jnp.float32).reshape(-1, 1)
        return jnp.pad(b, ((0, pad), (0, 0)))

    cm1 = params['ffn1.0.weight'].shape[0]
    cm2 = params['ffn2.0.weight'].shape[0]

    ws = [w1x1('ffn1.0.weight', pad_out=pad8(cm1)), bias('ffn1.0.bias', pad8(cm1)),
          w1x1('ffn1.2.weight', pad_in=pad8(cm1)), bias('ffn1.2.bias')]
    for i, k in enumerate(k_conv):
        wk = params['conv_list.%d.weight' % i]        # depthwise (C_in, 1, k, k)
        ws += [wk.reshape(C_in, k * k).astype(jnp.float32),
               bias('conv_list.%d.bias' % i)]
    ws += [w1x1('pw.weight'), bias('pw.bias'),
           w1x1('ffn2.0.weight', pad_out=pad8(cm2)), bias('ffn2.0.bias', pad8(cm2)),
           w1x1('ffn2.2.weight', pad_in=pad8(cm2)), bias('ffn2.2.bias')]
    return ws


def _images_per_tile(N, HW, max_lanes):
    """Largest divisor Nb of N with Nb*HW <= max_lanes and Nb*HW % 128 == 0."""
    best = None
    for nb in range(1, N + 1):
        if N % nb == 0 and nb * HW <= max_lanes and (nb * HW) % 128 == 0:
            best = nb
    if best is None:
        # Fall back to whole-batch blocks (block == full array is always legal).
        # TODO(synk): spatial halo tiling for very large / misaligned H*W.
        best = N
    return best


def pcblock_forward(x_nchw, params, k_conv, *, use_bf16_matmul=True,
                    approximate_gelu=False, max_tile_lanes=8192):
    assert all(k % 2 == 1 for k in k_conv), "residual add needs odd kernels"
    N, C_in, H, W = x_nchw.shape
    HW = H * W
    C_out = params['ffn2.2.weight'].shape[0]
    pmax = max(k_conv) // 2
    mm_dtype = jnp.bfloat16 if use_bf16_matmul else jnp.float32

    nb = _images_per_tile(N, HW, max_tile_lanes)
    tile = nb * HW
    num_tiles = N // nb

    # Channels on sublanes, pixels of whole images on lanes: (C_in, N*HW).
    x2d = (x_nchw.astype(jnp.float32).reshape(N, C_in, HW)
           .transpose(1, 0, 2).reshape(C_in, N * HW))
    colmask, rowmask = _tap_masks(H, W, pmax, nb)
    weights = _prep_weights(params, k_conv, C_in, mm_dtype)

    kernel = _make_fused_kernel(k_conv, C_in, W, tile, mm_dtype,
                                approximate_gelu)
    in_specs = ([pl.BlockSpec((C_in, tile), lambda i: (0, i)),
                 pl.BlockSpec(colmask.shape, lambda i: (0, 0)),
                 pl.BlockSpec(rowmask.shape, lambda i: (0, 0))]
                + [pl.BlockSpec(w.shape, lambda i: (0, 0)) for w in weights])

    out2d = pl.pallas_call(
        kernel,
        out_shape=jax.ShapeDtypeStruct((C_out, N * HW), jnp.float32),
        grid=(num_tiles,),
        in_specs=in_specs,
        out_specs=pl.BlockSpec((C_out, tile), lambda i: (0, i)),
        compiler_params=pltpu.CompilerParams(
            dimension_semantics=("parallel",),
            vmem_limit_bytes=32 * 1024 * 1024),
    )(x2d, colmask, rowmask, *weights)

    return (out2d.reshape(C_out, N, HW).transpose(1, 0, 2)
            .reshape(N, C_out, H, W))


# ----------------------------------------------------------------------------
# Pure-JAX reference (PyTorch-layout weights) for the correctness check
# ----------------------------------------------------------------------------
def reference_forward(x, params, k_conv):
    def conv1x1(x, w, b):
        return (jnp.einsum('nchw,oc->nohw', x, w[:, :, 0, 0])
                + b[None, :, None, None])

    def dwconv(x, w, b, k):
        p = k // 2
        y = jax.lax.conv_general_dilated(
            x, w, window_strides=(1, 1), padding=((p, p), (p, p)),
            dimension_numbers=('NCHW', 'OIHW', 'NCHW'),
            feature_group_count=x.shape[1])
        return y + b[None, :, None, None]

    def ffn(x, pre):
        h = _gelu(conv1x1(x, params[pre + '.0.weight'], params[pre + '.0.bias']))
        return conv1x1(h, params[pre + '.2.weight'], params[pre + '.2.bias'])

    x = _gelu(x + ffn(x, 'ffn1'))
    for i, k in enumerate(k_conv):
        x = _gelu(x + dwconv(x, params['conv_list.%d.weight' % i],
                             params['conv_list.%d.bias' % i], k))
    x = _gelu(x + conv1x1(x, params['pw.weight'], params['pw.bias']))
    return ffn(x, 'ffn2')


# ----------------------------------------------------------------------------
if __name__ == "__main__":
    N, C_in, C_out, H, W = 2, 8, 16, 16, 16
    C_mid = int(1.5 * C_in)          # 12 (padded to 16 inside the wrapper)
    k_conv = (3, 7)

    keys = iter(jax.random.split(jax.random.PRNGKey(0), 32))

    def init(shape, scale=0.1):
        return scale * jax.random.normal(next(keys), shape, dtype=jnp.float32)

    # Parameters in native PyTorch Conv2d layouts (state_dict style).
    params = {
        'ffn1.0.weight': init((C_mid, C_in, 1, 1)),  'ffn1.0.bias': init((C_mid,)),
        'ffn1.2.weight': init((C_in, C_mid, 1, 1)),  'ffn1.2.bias': init((C_in,)),
        'pw.weight':     init((C_in, C_in, 1, 1)),   'pw.bias':     init((C_in,)),
        'ffn2.0.weight': init((C_mid, C_in, 1, 1)),  'ffn2.0.bias': init((C_mid,)),
        'ffn2.2.weight': init((C_out, C_mid, 1, 1)), 'ffn2.2.bias': init((C_out,)),
    }
    for i, k in enumerate(k_conv):
        params['conv_list.%d.weight' % i] = init((C_in, 1, k, k))
        params['conv_list.%d.bias' % i] = init((C_in,))

    x = jax.random.normal(next(keys), (N, C_in, H, W), dtype=jnp.float32)
    ref = reference_forward(x, params, k_conv)

    # f32 matmul operands: tight check against the PyTorch-equivalent reference.
    fwd_f32 = jax.jit(functools.partial(pcblock_forward, k_conv=k_conv,
                                        use_bf16_matmul=False))
    out_f32 = jax.block_until_ready(fwd_f32(x, params))
    assert out_f32.shape == (N, C_out, H, W), out_f32.shape
    err_f32 = float(jnp.max(jnp.abs(out_f32 - ref)))
    assert jnp.allclose(out_f32, ref, atol=5e-4, rtol=5e-4), err_f32

    # Default fast path: bf16 matmul operands (f32 accumulation) -> looser check.
    fwd_bf16 = jax.jit(functools.partial(pcblock_forward, k_conv=k_conv))
    out_bf16 = jax.block_until_ready(fwd_bf16(x, params))
    assert out_bf16.shape == (N, C_out, H, W), out_bf16.shape
    err_bf16 = float(jnp.max(jnp.abs(out_bf16 - ref)))
    assert jnp.allclose(out_bf16, ref, atol=2e-2, rtol=2e-2), err_bf16

    print("KERNEL_OK")
</pallas_src>

<mosaic_0001>
module attributes {stable_mosaic.version = 11 : i64} {
  func.func @kernel(%arg0: i32, %arg1: memref<8x512xf32, #tpu.memory_space<vmem>>, %arg2: memref<7x512xf32, #tpu.memory_space<vmem>>, %arg3: memref<7x512xf32, #tpu.memory_space<vmem>>, %arg4: memref<16x8xf32, #tpu.memory_space<vmem>>, %arg5: memref<16x1xf32, #tpu.memory_space<vmem>>, %arg6: memref<8x16xf32, #tpu.memory_space<vmem>>, %arg7: memref<8x1xf32, #tpu.memory_space<vmem>>, %arg8: memref<8x9xf32, #tpu.memory_space<vmem>>, %arg9: memref<8x1xf32, #tpu.memory_space<vmem>>, %arg10: memref<8x49xf32, #tpu.memory_space<vmem>>, %arg11: memref<8x1xf32, #tpu.memory_space<vmem>>, %arg12: memref<8x8xf32, #tpu.memory_space<vmem>>, %arg13: memref<8x1xf32, #tpu.memory_space<vmem>>, %arg14: memref<16x8xf32, #tpu.memory_space<vmem>>, %arg15: memref<16x1xf32, #tpu.memory_space<vmem>>, %arg16: memref<16x16xf32, #tpu.memory_space<vmem>>, %arg17: memref<16x1xf32, #tpu.memory_space<vmem>>, %arg18: memref<16x512xf32, #tpu.memory_space<vmem>>) attributes {dimension_semantics = [#tpu.dimension_semantics<parallel>], iteration_bounds = array<i64: 1>, scalar_prefetch = 0 : i64, scratch_operands = 0 : i64, tpu.core_type = #tpu.core_type<tc>, window_params = [{transform_indices = @transform_0, window_bounds = array<i64: 8, 512>}, {pipeline_mode = #tpu.pipeline_mode<synchronous>, transform_indices = @transform_1, window_bounds = array<i64: 7, 512>}, {pipeline_mode = #tpu.pipeline_mode<synchronous>, transform_indices = @transform_2, window_bounds = array<i64: 7, 512>}, {pipeline_mode = #tpu.pipeline_mode<synchronous>, transform_indices = @transform_3, window_bounds = array<i64: 16, 8>}, {pipeline_mode = #tpu.pipeline_mode<synchronous>, transform_indices = @transform_4, window_bounds = array<i64: 16, 1>}, {pipeline_mode = #tpu.pipeline_mode<synchronous>, transform_indices = @transform_5, window_bounds = array<i64: 8, 16>}, {pipeline_mode = #tpu.pipeline_mode<synchronous>, transform_indices = @transform_6, window_bounds = array<i64: 8, 1>}, {pipeline_mode = #tpu.pipeline_mode<synchronous>, transform_indices = @transform_7, window_bounds = array<i64: 8, 9>}, {pipeline_mode = #tpu.pipeline_mode<synchronous>, transform_indices = @transform_8, window_bounds = array<i64: 8, 1>}, {pipeline_mode = #tpu.pipeline_mode<synchronous>, transform_indices = @transform_9, window_bounds = array<i64: 8, 49>}, {pipeline_mode = #tpu.pipeline_mode<synchronous>, transform_indices = @transform_10, window_bounds = array<i64: 8, 1>}, {pipeline_mode = #tpu.pipeline_mode<synchronous>, transform_indices = @transform_11, window_bounds = array<i64: 8, 8>}, {pipeline_mode = #tpu.pipeline_mode<synchronous>, transform_indices = @transform_12, window_bounds = array<i64: 8, 1>}, {pipeline_mode = #tpu.pipeline_mode<synchronous>, transform_indices = @transform_13, window_bounds = array<i64: 16, 8>}, {pipeline_mode = #tpu.pipeline_mode<synchronous>, transform_indices = @transform_14, window_bounds = array<i64: 16, 1>}, {pipeline_mode = #tpu.pipeline_mode<synchronous>, transform_indices = @transform_15, window_bounds = array<i64: 16, 16>}, {pipeline_mode = #tpu.pipeline_mode<synchronous>, transform_indices = @transform_16, window_bounds = array<i64: 16, 1>}, {transform_indices = @transform_17, window_bounds = array<i64: 16, 512>}]} {
    %c0 = arith.constant 0 : index
    %c0_0 = arith.constant 0 : index
    %0 = vector.load %arg1[%c0, %c0_0] : memref<8x512xf32, #tpu.memory_space<vmem>>, vector<8x512xf32>
    %c0_1 = arith.constant 0 : index
    %c0_2 = arith.constant 0 : index
    %1 = vector.load %arg4[%c0_1, %c0_2] : memref<16x8xf32, #tpu.memory_space<vmem>>, vector<16x8xf32>
    %cst = arith.constant dense<0.000000e+00> : vector<16x512xf32>
    %2 = tpu.matmul %1, %0, %cst {dimension_numbers = #tpu.dot_dimension_numbers<[1], [0], [0], [1], [0, 0, 1, 1], [], []>} : vector<16x8xf32>, vector<8x512xf32>, vector<16x512xf32> -> vector<16x512xf32>
    %c0_3 = arith.constant 0 : index
    %c0_4 = arith.constant 0 : index
    %3 = vector.load %arg5[%c0_3, %c0_4] : memref<16x1xf32, #tpu.memory_space<vmem>>, vector<16x1xf32>
    %4 = vector.broadcast %3 : vector<16x1xf32> to vector<16x512xf32>
    %5 = arith.addf %2, %4 : vector<16x512xf32>
    %cst_5 = arith.constant 5.000000e-01 : f32
    %6 = vector.broadcast %cst_5 : f32 to vector<16x512xf32>
    %7 = arith.mulf %6, %5 : vector<16x512xf32>
    %cst_6 = arith.constant 1.41421354 : f32
    %8 = vector.broadcast %cst_6 : f32 to vector<16x512xf32>
    %9 = arith.divf %5, %8 : vector<16x512xf32>
    %10 = math.erf %9 : vector<16x512xf32>
    %cst_7 = arith.constant 1.000000e+00 : f32
    %11 = vector.broadcast %cst_7 : f32 to vector<16x512xf32>
    %12 = arith.addf %11, %10 : vector<16x512xf32>
    %13 = arith.mulf %7, %12 : vector<16x512xf32>
    %c0_8 = arith.constant 0 : index
    %c0_9 = arith.constant 0 : index
    %14 = vector.load %arg6[%c0_8, %c0_9] : memref<8x16xf32, #tpu.memory_space<vmem>>, vector<8x16xf32>
    %cst_10 = arith.constant dense<0.000000e+00> : vector<8x512xf32>
    %15 = tpu.matmul %14, %13, %cst_10 {dimension_numbers = #tpu.dot_dimension_numbers<[1], [0], [0], [1], [0, 0, 1, 1], [], []>} : vector<8x16xf32>, vector<16x512xf32>, vector<8x512xf32> -> vector<8x512xf32>
    %c0_11 = arith.constant 0 : index
    %c0_12 = arith.constant 0 : index
    %16 = vector.load %arg7[%c0_11, %c0_12] : memref<8x1xf32, #tpu.memory_space<vmem>>, vector<8x1xf32>
    %17 = vector.broadcast %16 : vector<8x1xf32> to vector<8x512xf32>
    %18 = arith.addf %15, %17 : vector<8x512xf32>
    %19 = arith.addf %0, %18 : vector<8x512xf32>
    %cst_13 = arith.constant 5.000000e-01 : f32
    %20 = vector.broadcast %cst_13 : f32 to vector<8x512xf32>
    %21 = arith.mulf %20, %19 : vector<8x512xf32>
    %cst_14 = arith.constant 1.41421354 : f32
    %22 = vector.broadcast %cst_14 : f32 to vector<8x512xf32>
    %23 = arith.divf %19, %22 : vector<8x512xf32>
    %24 = math.erf %23 : vector<8x512xf32>
    %cst_15 = arith.constant 1.000000e+00 : f32
    %25 = vector.broadcast %cst_15 : f32 to vector<8x512xf32>
    %26 = arith.addf %25, %24 : vector<8x512xf32>
    %27 = arith.mulf %21, %26 : vector<8x512xf32>
    %c0_16 = arith.constant 0 : index
    %c0_17 = arith.constant 0 : index
    %28 = vector.load %arg8[%c0_16, %c0_17] : memref<8x9xf32, #tpu.memory_space<vmem>>, vector<8x9xf32>
    %c0_18 = arith.constant 0 : index
    %c0_19 = arith.constant 0 : index
    %29 = vector.load %arg9[%c0_18, %c0_19] : memref<8x1xf32, #tpu.memory_space<vmem>>, vector<8x1xf32>
    %30 = vector.shape_cast %29 : vector<8x1xf32> to vector<8x1xf32>
    %31 = vector.broadcast %30 : vector<8x1xf32> to vector<8x512xf32>
    %c1_i32 = arith.constant 1 : i32
    %32 = tpu.dynamic_rotate %27 by %c1_i32 dim 1 : vector<8x512xf32>, i32 -> vector<8x512xf32>
    %c2 = arith.constant 2 : index
    %c0_20 = arith.constant 0 : index
    %33 = vector.load %arg2[%c2, %c0_20] : memref<7x512xf32, #tpu.memory_space<vmem>>, vector<1x512xf32>
    %34 = vector.broadcast %33 : vector<1x512xf32> to vector<8x512xf32>
    %35 = arith.mulf %32, %34 : vector<8x512xf32>
    %c16_i32 = arith.constant 16 : i32
    %36 = tpu.dynamic_rotate %35 by %c16_i32 dim 1 : vector<8x512xf32>, i32 -> vector<8x512xf32>
    %c2_21 = arith.constant 2 : index
    %c0_22 = arith.constant 0 : index
    %37 = vector.load %arg3[%c2_21, %c0_22] : memref<7x512xf32, #tpu.memory_space<vmem>>, vector<1x512xf32>
    %38 = vector.broadcast %37 : vector<1x512xf32> to vector<8x512xf32>
    %39 = arith.mulf %36, %38 : vector<8x512xf32>
    %40 = vector.extract_strided_slice %28 {offsets = [0, 0], sizes = [8, 1], strides = [1, 1]} : vector<8x9xf32> to vector<8x1xf32>
    %41 = vector.broadcast %40 : vector<8x1xf32> to vector<8x512xf32>
    %42 = arith.mulf %41, %39 : vector<8x512xf32>
    %43 = arith.addf %31, %42 : vector<8x512xf32>
    %44 = vector.extract_strided_slice %28 {offsets = [0, 3], sizes = [8, 1], strides = [1, 1]} : vector<8x9xf32> to vector<8x1xf32>
    %45 = vector.broadcast %44 : vector<8x1xf32> to vector<8x512xf32>
    %46 = arith.mulf %45, %35 : vector<8x512xf32>
    %47 = arith.addf %43, %46 : vector<8x512xf32>
    %c496_i32 = arith.constant 496 : i32
    %48 = tpu.dynamic_rotate %35 by %c496_i32 dim 1 : vector<8x512xf32>, i32 -> vector<8x512xf32>
    %c4 = arith.constant 4 : index
    %c0_23 = arith.constant 0 : index
    %49 = vector.load %arg3[%c4, %c0_23] : memref<7x512xf32, #tpu.memory_space<vmem>>, vector<1x512xf32>
    %50 = vector.broadcast %49 : vector<1x512xf32> to vector<8x512xf32>
    %51 = arith.mulf %48, %50 : vector<8x512xf32>
    %52 = vector.extract_strided_slice %28 {offsets = [0, 6], sizes = [8, 1], strides = [1, 1]} : vector<8x9xf32> to vector<8x1xf32>
    %53 = vector.broadcast %52 : vector<8x1xf32> to vector<8x512xf32>
    %54 = arith.mulf %53, %51 : vector<8x512xf32>
    %55 = arith.addf %47, %54 : vector<8x512xf32>
    %c16_i32_24 = arith.constant 16 : i32
    %56 = tpu.dynamic_rotate %27 by %c16_i32_24 dim 1 : vector<8x512xf32>, i32 -> vector<8x512xf32>
    %c2_25 = arith.constant 2 : index
    %c0_26 = arith.constant 0 : index
    %57 = vector.load %arg3[%c2_25, %c0_26] : memref<7x512xf32, #tpu.memory_space<vmem>>, vector<1x512xf32>
    %58 = vector.broadcast %57 : vector<1x512xf32> to vector<8x512xf32>
    %59 = arith.mulf %56, %58 : vector<8x512xf32>
    %60 = vector.extract_strided_slice %28 {offsets = [0, 1], sizes = [8, 1], strides = [1, 1]} : vector<8x9xf32> to vector<8x1xf32>
    %61 = vector.broadcast %60 : vector<8x1xf32> to vector<8x512xf32>
    %62 = arith.mulf %61, %59 : vector<8x512xf32>
    %63 = arith.addf %55, %62 : vector<8x512xf32>
    %64 = vector.extract_strided_slice %28 {offsets = [0, 4], sizes = [8, 1], strides = [1, 1]} : vector<8x9xf32> to vector<8x1xf32>
    %65 = vector.broadcast %64 : vector<8x1xf32> to vector<8x512xf32>
    %66 = arith.mulf %65, %27 : vector<8x512xf32>
    %67 = arith.addf %63, %66 : vector<8x512xf32>
    %c496_i32_27 = arith.constant 496 : i32
    %68 = tpu.dynamic_rotate %27 by %c496_i32_27 dim 1 : vector<8x512xf32>, i32 -> vector<8x512xf32>
    %c4_28 = arith.constant 4 : index
    %c0_29 = arith.constant 0 : index
    %69 = vector.load %arg3[%c4_28, %c0_29] : memref<7x512xf32, #tpu.memory_space<vmem>>, vector<1x512xf32>
    %70 = vector.broadcast %69 : vector<1x512xf32> to vector<8x512xf32>
    %71 = arith.mulf %68, %70 : vector<8x512xf32>
    %72 = vector.extract_strided_slice %28 {offsets = [0, 7], sizes = [8, 1], strides = [1, 1]} : vector<8x9xf32> to vector<8x1xf32>
    %73 = vector.broadcast %72 : vector<8x1xf32> to vector<8x512xf32>
    %74 = arith.mulf %73, %71 : vector<8x512xf32>
    %75 = arith.addf %67, %74 : vector<8x512xf32>
    %c511_i32 = arith.constant 511 : i32
    %76 = tpu.dynamic_rotate %27 by %c511_i32 dim 1 : vector<8x512xf32>, i32 -> vector<8x512xf32>
    %c4_30 = arith.constant 4 : index
    %c0_31 = arith.constant 0 : index
    %77 = vector.load %arg2[%c4_30, %c0_31] : memref<7x512xf32, #tpu.memory_space<vmem>>, vector<1x512xf32>
    %78 = vector.broadcast %77 : vector<1x512xf32> to vector<8x512xf32>
    %79 = arith.mulf %76, %78 : vector<8x512xf32>
    %c16_i32_32 = arith.constant 16 : i32
    %80 = tpu.dynamic_rotate %79 by %c16_i32_32 dim 1 : vector<8x512xf32>, i32 -> vector<8x512xf32>
    %c2_33 = arith.constant 2 : index
    %c0_34 = arith.constant 0 : index
    %81 = vector.load %arg3[%c2_33, %c0_34] : memref<7x512xf32, #tpu.memory_space<vmem>>, vector<1x512xf32>
    %82 = vector.broadcast %81 : vector<1x512xf32> to vector<8x512xf32>
    %83 = arith.mulf %80, %82 : vector<8x512xf32>
    %84 = vector.extract_strided_slice %28 {offsets = [0, 2], sizes = [8, 1], strides = [1, 1]} : vector<8x9xf32> to vector<8x1xf32>
    %85 = vector.broadcast %84 : vector<8x1xf32> to vector<8x512xf32>
    %86 = arith.mulf %85, %83 : vector<8x512xf32>
    %87 = arith.addf %75, %86 : vector<8x512xf32>
    %88 = vector.extract_strided_slice %28 {offsets = [0, 5], sizes = [8, 1], strides = [1, 1]} : vector<8x9xf32> to vector<8x1xf32>
    %89 = vector.broadcast %88 : vector<8x1xf32> to vector<8x512xf32>
    %90 = arith.mulf %89, %79 : vector<8x512xf32>
    %91 = arith.addf %87, %90 : vector<8x512xf32>
    %c496_i32_35 = arith.constant 496 : i32
    %92 = tpu.dynamic_rotate %79 by %c496_i32_35 dim 1 : vector<8x512xf32>, i32 -> vector<8x512xf32>
    %c4_36 = arith.constant 4 : index
    %c0_37 = arith.constant 0 : index
    %93 = vector.load %arg3[%c4_36, %c0_37] : memref<7x512xf32, #tpu.memory_space<vmem>>, vector<1x512xf32>
    %94 = vector.broadcast %93 : vector<1x512xf32> to vector<8x512xf32>
    %95 = arith.mulf %92, %94 : vector<8x512xf32>
    %96 = vector.extract_strided_slice %28 {offsets = [0, 8], sizes = [8, 1], strides = [1, 1]} : vector<8x9xf32> to vector<8x1xf32>
    %97 = vector.broadcast %96 : vector<8x1xf32> to vector<8x512xf32>
    %98 = arith.mulf %97, %95 : vector<8x512xf32>
    %99 = arith.addf %91, %98 : vector<8x512xf32>
    %100 = arith.addf %27, %99 : vector<8x512xf32>
    %cst_38 = arith.constant 5.000000e-01 : f32
    %101 = vector.broadcast %cst_38 : f32 to vector<8x512xf32>
    %102 = arith.mulf %101, %100 : vector<8x512xf32>
    %cst_39 = arith.constant 1.41421354 : f32
    %103 = vector.broadcast %cst_39 : f32 to vector<8x512xf32>
    %104 = arith.divf %100, %103 : vector<8x512xf32>
    %105 = math.erf %104 : vector<8x512xf32>
    %cst_40 = arith.constant 1.000000e+00 : f32
    %106 = vector.broadcast %cst_40 : f32 to vector<8x512xf32>
    %107 = arith.addf %106, %105 : vector<8x512xf32>
    %108 = arith.mulf %102, %107 : vector<8x512xf32>
    %c0_41 = arith.constant 0 : index
    %c0_42 = arith.constant 0 : index
    %109 = vector.load %arg10[%c0_41, %c0_42] : memref<8x49xf32, #tpu.memory_space<vmem>>, vector<8x49xf32>
    %c0_43 = arith.constant 0 : index
    %c0_44 = arith.constant 0 : index
    %110 = vector.load %arg11[%c0_43, %c0_44] : memref<8x1xf32, #tpu.memory_space<vmem>>, vector<8x1xf32>
    %111 = vector.shape_cast %110 : vector<8x1xf32> to vector<8x1xf32>
    %112 = vector.broadcast %111 : vector<8x1xf32> to vector<8x512xf32>
    %c3_i32 = arith.constant 3 : i32
    %113 = tpu.dynamic_rotate %108 by %c3_i32 dim 1 : vector<8x512xf32>, i32 -> vector<8x512xf32>
    %c0_45 = arith.constant 0 : index
    %c0_46 = arith.constant 0 : index
    %114 = vector.load %arg2[%c0_45, %c0_46] : memref<7x512xf32, #tpu.memory_space<vmem>>, vector<1x512xf32>
    %115 = vector.broadcast %114 : vector<1x512xf32> to vector<8x512xf32>
    %116 = arith.mulf %113, %115 : vector<8x512xf32>
    %c48_i32 = arith.constant 48 : i32
    %117 = tpu.dynamic_rotate %116 by %c48_i32 dim 1 : vector<8x512xf32>, i32 -> vector<8x512xf32>
    %c0_47 = arith.constant 0 : index
    %c0_48 = arith.constant 0 : index
    %118 = vector.load %arg3[%c0_47, %c0_48] : memref<7x512xf32, #tpu.memory_space<vmem>>, vector<1x512xf32>
    %119 = vector.broadcast %118 : vector<1x512xf32> to vector<8x512xf32>
    %120 = arith.mulf %117, %119 : vector<8x512xf32>
    %121 = vector.extract_strided_slice %109 {offsets = [0, 0], sizes = [8, 1], strides = [1, 1]} : vector<8x49xf32> to vector<8x1xf32>
    %122 = vector.broadcast %121 : vector<8x1xf32> to vector<8x512xf32>
    %123 = arith.mulf %122, %120 : vector<8x512xf32>
    %124 = arith.addf %112, %123 : vector<8x512xf32>
    %c32_i32 = arith.constant 32 : i32
    %125 = tpu.dynamic_rotate %116 by %c32_i32 dim 1 : vector<8x512xf32>, i32 -> vector<8x512xf32>
    %c1 = arith.constant 1 : index
    %c0_49 = arith.constant 0 : index
    %126 = vector.load %arg3[%c1, %c0_49] : memref<7x512xf32, #tpu.memory_space<vmem>>, vector<1x512xf32>
    %127 = vector.broadcast %126 : vector<1x512xf32> to vector<8x512xf32>
    %128 = arith.mulf %125, %127 : vector<8x512xf32>
    %129 = vector.extract_strided_slice %109 {offsets = [0, 7], sizes = [8, 1], strides = [1, 1]} : vector<8x49xf32> to vector<8x1xf32>
    %130 = vector.broadcast %129 : vector<8x1xf32> to vector<8x512xf32>
    %131 = arith.mulf %130, %128 : vector<8x512xf32>
    %132 = arith.addf %124, %131 : vector<8x512xf32>
    %c16_i32_50 = arith.constant 16 : i32
    %133 = tpu.dynamic_rotate %116 by %c16_i32_50 dim 1 : vector<8x512xf32>, i32 -> vector<8x512xf32>
    %c2_51 = arith.constant 2 : index
    %c0_52 = arith.constant 0 : index
    %134 = vector.load %arg3[%c2_51, %c0_52] : memref<7x512xf32, #tpu.memory_space<vmem>>, vector<1x512xf32>
    %135 = vector.broadcast %134 : vector<1x512xf32> to vector<8x512xf32>
    %136 = arith.mulf %133, %135 : vector<8x512xf32>
    %137 = vector.extract_strided_slice %109 {offsets = [0, 14], sizes = [8, 1], strides = [1, 1]} : vector<8x49xf32> to vector<8x1xf32>
    %138 = vector.broadcast %137 : vector<8x1xf32> to vector<8x512xf32>
    %139 = arith.mulf %138, %136 : vector<8x512xf32>
    %140 = arith.addf %132, %139 : vector<8x512xf32>
    %141 = vector.extract_strided_slice %109 {offsets = [0, 21], sizes = [8, 1], strides = [1, 1]} : vector<8x49xf32> to vector<8x1xf32>
    %142 = vector.broadcast %141 : vector<8x1xf32> to vector<8x512xf32>
    %143 = arith.mulf %142, %116 : vector<8x512xf32>
    %144 = arith.addf %140, %143 : vector<8x512xf32>
    %c496_i32_53 = arith.constant 496 : i32
    %145 = tpu.dynamic_rotate %116 by %c496_i32_53 dim 1 : vector<8x512xf32>, i32 -> vector<8x512xf32>
    %c4_54 = arith.constant 4 : index
    %c0_55 = arith.constant 0 : index
    %146 = vector.load %arg3[%c4_54, %c0_55] : memref<7x512xf32, #tpu.memory_space<vmem>>, vector<1x512xf32>
    %147 = vector.broadcast %146 : vector<1x512xf32> to vector<8x512xf32>
    %148 = arith.mulf %145, %147 : vector<8x512xf32>
    %149 = vector.extract_strided_slice %109 {offsets = [0, 28], sizes = [8, 1], strides = [1, 1]} : vector<8x49xf32> to vector<8x1xf32>
    %150 = vector.broadcast %149 : vector<8x1xf32> to vector<8x512xf32>
    %151 = arith.mulf %150, %148 : vector<8x512xf32>
    %152 = arith.addf %144, %151 : vector<8x512xf32>
    %c480_i32 = arith.constant 480 : i32
    %153 = tpu.dynamic_rotate %116 by %c480_i32 dim 1 : vector<8x512xf32>, i32 -> vector<8x512xf32>
    %c5 = arith.constant 5 : index
    %c0_56 = arith.constant 0 : index
    %154 = vector.load %arg3[%c5, %c0_56] : memref<7x512xf32, #tpu.memory_space<vmem>>, vector<1x512xf32>
    %155 = vector.broadcast %154 : vector<1x512xf32> to vector<8x512xf32>
    %156 = arith.mulf %153, %155 : vector<8x512xf32>
    %157 = vector.extract_strided_slice %109 {offsets = [0, 35], sizes = [8, 1], strides = [1, 1]} : vector<8x49xf32> to vector<8x1xf32>
    %158 = vector.broadcast %157 : vector<8x1xf32> to vector<8x512xf32>
    %159 = arith.mulf %158, %156 : vector<8x512xf32>
    %160 = arith.addf %152, %159 : vector<8x512xf32>
    %c464_i32 = arith.constant 464 : i32
    %161 = tpu.dynamic_rotate %116 by %c464_i32 dim 1 : vector<8x512xf32>, i32 -> vector<8x512xf32>
    %c6 = arith.constant 6 : index
    %c0_57 = arith.constant 0 : index
    %162 = vector.load %arg3[%c6, %c0_57] : memref<7x512xf32, #tpu.memory_space<vmem>>, vector<1x512xf32>
    %163 = vector.broadcast %162 : vector<1x512xf32> to vector<8x512xf32>
    %164 = arith.mulf %161, %163 : vector<8x512xf32>
    %165 = vector.extract_strided_slice %109 {offsets = [0, 42], sizes = [8, 1], strides = [1, 1]} : vector<8x49xf32> to vector<8x1xf32>
    %166 = vector.broadcast %165 : vector<8x1xf32> to vector<8x512xf32>
    %167 = arith.mulf %166, %164 : vector<8x512xf32>
    %168 = arith.addf %160, %167 : vector<8x512xf32>
    %c2_i32 = arith.constant 2 : i32
    %169 = tpu.dynamic_rotate %108 by %c2_i32 dim 1 : vector<8x512xf32>, i32 -> vector<8x512xf32>
    %c1_58 = arith.constant 1 : index
    %c0_59 = arith.constant 0 : index
    %170 = vector.load %arg2[%c1_58, %c0_59] : memref<7x512xf32, #tpu.memory_space<vmem>>, vector<1x512xf32>
    %171 = vector.broadcast %170 : vector<1x512xf32> to vector<8x512xf32>
    %172 = arith.mulf %169, %171 : vector<8x512xf32>
    %c48_i32_60 = arith.constant 48 : i32
    %173 = tpu.dynamic_rotate %172 by %c48_i32_60 dim 1 : vector<8x512xf32>, i32 -> vector<8x512xf32>
    %c0_61 = arith.constant 0 : index
    %c0_62 = arith.constant 0 : index
    %174 = vector.load %arg3[%c0_61, %c0_62] : memref<7x512xf32, #tpu.memory_space<vmem>>, vector<1x512xf32>
    %175 = vector.broadcast %174 : vector<1x512xf32> to vector<8x512xf32>
    %176 = arith.mulf %173, %175 : vector<8x512xf32>
    %177 = vector.extract_strided_slice %109 {offsets = [0, 1], sizes = [8, 1], strides = [1, 1]} : vector<8x49xf32> to vector<8x1xf32>
    %178 = vector.broadcast %177 : vector<8x1xf32> to vector<8x512xf32>
    %179 = arith.mulf %178, %176 : vector<8x512xf32>
    %180 = arith.addf %168, %179 : vector<8x512xf32>
    %c32_i32_63 = arith.constant 32 : i32
    %181 = tpu.dynamic_rotate %172 by %c32_i32_63 dim 1 : vector<8x512xf32>, i32 -> vector<8x512xf32>
    %c1_64 = arith.constant 1 : index
    %c0_65 = arith.constant 0 : index
    %182 = vector.load %arg3[%c1_64, %c0_65] : memref<7x512xf32, #tpu.memory_space<vmem>>, vector<1x512xf32>
    %183 = vector.broadcast %182 : vector<1x512xf32> to vector<8x512xf32>
    %184 = arith.mulf %181, %183 : vector<8x512xf32>
    %185 = vector.extract_strided_slice %109 {offsets = [0, 8], sizes = [8, 1], strides = [1, 1]} : vector<8x49xf32> to vector<8x1xf32>
    %186 = vector.broadcast %185 : vector<8x1xf32> to vector<8x512xf32>
    %187 = arith.mulf %186, %184 : vector<8x512xf32>
    %188 = arith.addf %180, %187 : vector<8x512xf32>
    %c16_i32_66 = arith.constant 16 : i32
    %189 = tpu.dynamic_rotate %172 by %c16_i32_66 dim 1 : vector<8x512xf32>, i32 -> vector<8x512xf32>
    %c2_67 = arith.constant 2 : index
    %c0_68 = arith.constant 0 : index
    %190 = vector.load %arg3[%c2_67, %c0_68] : memref<7x512xf32, #tpu.memory_space<vmem>>, vector<1x512xf32>
    %191 = vector.broadcast %190 : vector<1x512xf32> to vector<8x512xf32>
    %192 = arith.mulf %189, %191 : vector<8x512xf32>
    %193 = vector.extract_strided_slice %109 {offsets = [0, 15], sizes = [8, 1], strides = [1, 1]} : vector<8x49xf32> to vector<8x1xf32>
    %194 = vector.broadcast %193 : vector<8x1xf32> to vector<8x512xf32>
    %195 = arith.mulf %194, %192 : vector<8x512xf32>
    %196 = arith.addf %188, %195 : vector<8x512xf32>
    %197 = vector.extract_strided_slice %109 {offsets = [0, 22], sizes = [8, 1], strides = [1, 1]} : vector<8x49xf32> to vector<8x1xf32>
    %198 = vector.broadcast %197 : vector<8x1xf32> to vector<8x512xf32>
    %199 = arith.mulf %198, %172 : vector<8x512xf32>
    %200 = arith.addf %196, %199 : vector<8x512xf32>
    %c496_i32_69 = arith.constant 496 : i32
    %201 = tpu.dynamic_rotate %172 by %c496_i32_69 dim 1 : vector<8x512xf32>, i32 -> vector<8x512xf32>
    %c4_70 = arith.constant 4 : index
    %c0_71 = arith.constant 0 : index
    %202 = vector.load %arg3[%c4_70, %c0_71] : memref<7x512xf32, #tpu.memory_space<vmem>>, vector<1x512xf32>
    %203 = vector.broadcast %202 : vector<1x512xf32> to vector<8x512xf32>
    %204 = arith.mulf %201, %203 : vector<8x512xf32>
    %205 = vector.extract_strided_slice %109 {offsets = [0, 29], sizes = [8, 1], strides = [1, 1]} : vector<8x49xf32> to vector<8x1xf32>
    %206 = vector.broadcast %205 : vector<8x1xf32> to vector<8x512xf32>
    %207 = arith.mulf %206, %204 : vector<8x512xf32>
    %208 = arith.addf %200, %207 : vector<8x512xf32>
    %c480_i32_72 = arith.constant 480 : i32
    %209 = tpu.dynamic_rotate %172 by %c480_i32_72 dim 1 : vector<8x512xf32>, i32 -> vector<8x512xf32>
    %c5_73 = arith.constant 5 : index
    %c0_74 = arith.constant 0 : index
    %210 = vector.load %arg3[%c5_73, %c0_74] : memref<7x512xf32, #tpu.memory_space<vmem>>, vector<1x512xf32>
    %211 = vector.broadcast %210 : vector<1x512xf32> to vector<8x512xf32>
    %212 = arith.mulf %209, %211 : vector<8x512xf32>
    %213 = vector.extract_strided_slice %109 {offsets = [0, 36], sizes = [8, 1], strides = [1, 1]} : vector<8x49xf32> to vector<8x1xf32>
    %214 = vector.broadcast %213 : vector<8x1xf32> to vector<8x512xf32>
    %215 = arith.mulf %214, %212 : vector<8x512xf32>
    %216 = arith.addf %208, %215 : vector<8x512xf32>
    %c464_i32_75 = arith.constant 464 : i32
    %217 = tpu.dynamic_rotate %172 by %c464_i32_75 dim 1 : vector<8x512xf32>, i32 -> vector<8x512xf32>
    %c6_76 = arith.constant 6 : index
    %c0_77 = arith.constant 0 : index
    %218 = vector.load %arg3[%c6_76, %c0_77] : memref<7x512xf32, #tpu.memory_space<vmem>>, vector<1x512xf32>
    %219 = vector.broadcast %218 : vector<1x512xf32> to vector<8x512xf32>
    %220 = arith.mulf %217, %219 : vector<8x512xf32>
    %221 = vector.extract_strided_slice %109 {offsets = [0, 43], sizes = [8, 1], strides = [1, 1]} : vector<8x49xf32> to vector<8x1xf32>
    %222 = vector.broadcast %221 : vector<8x1xf32> to vector<8x512xf32>
    %223 = arith.mulf %222, %220 : vector<8x512xf32>
    %224 = arith.addf %216, %223 : vector<8x512xf32>
    %c1_i32_78 = arith.constant 1 : i32
    %225 = tpu.dynamic_rotate %108 by %c1_i32_78 dim 1 : vector<8x512xf32>, i32 -> vector<8x512xf32>
    %c2_79 = arith.constant 2 : index
    %c0_80 = arith.constant 0 : index
    %226 = vector.load %arg2[%c2_79, %c0_80] : memref<7x512xf32, #tpu.memory_space<vmem>>, vector<1x512xf32>
    %227 = vector.broadcast %226 : vector<1x512xf32> to vector<8x512xf32>
    %228 = arith.mulf %225, %227 : vector<8x512xf32>
    %c48_i32_81 = arith.constant 48 : i32
    %229 = tpu.dynamic_rotate %228 by %c48_i32_81 dim 1 : vector<8x512xf32>, i32 -> vector<8x512xf32>
    %c0_82 = arith.constant 0 : index
    %c0_83 = arith.constant 0 : index
    %230 = vector.load %arg3[%c0_82, %c0_83] : memref<7x512xf32, #tpu.memory_space<vmem>>, vector<1x512xf32>
    %231 = vector.broadcast %230 : vector<1x512xf32> to vector<8x512xf32>
    %232 = arith.mulf %229, %231 : vector<8x512xf32>
    %233 = vector.extract_strided_slice %109 {offsets = [0, 2], sizes = [8, 1], strides = [1, 1]} : vector<8x49xf32> to vector<8x1xf32>
    %234 = vector.broadcast %233 : vector<8x1xf32> to vector<8x512xf32>
    %235 = arith.mulf %234, %232 : vector<8x512xf32>
    %236 = arith.addf %224, %235 : vector<8x512xf32>
    %c32_i32_84 = arith.constant 32 : i32
    %237 = tpu.dynamic_rotate %228 by %c32_i32_84 dim 1 : vector<8x512xf32>, i32 -> vector<8x512xf32>
    %c1_85 = arith.constant 1 : index
    %c0_86 = arith.constant 0 : index
    %238 = vector.load %arg3[%c1_85, %c0_86] : memref<7x512xf32, #tpu.memory_space<vmem>>, vector<1x512xf32>
    %239 = vector.broadcast %238 : vector<1x512xf32> to vector<8x512xf32>
    %240 = arith.mulf %237, %239 : vector<8x512xf32>
    %241 = vector.extract_strided_slice %109 {offsets = [0, 9], sizes = [8, 1], strides = [1, 1]} : vector<8x49xf32> to vector<8x1xf32>
    %242 = vector.broadcast %241 : vector<8x1xf32> to vector<8x512xf32>
    %243 = arith.mulf %242, %240 : vector<8x512xf32>
    %244 = arith.addf %236, %243 : vector<8x512xf32>
    %c16_i32_87 = arith.constant 16 : i32
    %245 = tpu.dynamic_rotate %228 by %c16_i32_87 dim 1 : vector<8x512xf32>, i32 -> vector<8x512xf32>
    %c2_88 = arith.constant 2 : index
    %c0_89 = arith.constant 0 : index
    %246 = vector.load %arg3[%c2_88, %c0_89] : memref<7x512xf32, #tpu.memory_space<vmem>>, vector<1x512xf32>
    %247 = vector.broadcast %246 : vector<1x512xf32> to vector<8x512xf32>
    %248 = arith.mulf %245, %247 : vector<8x512xf32>
    %249 = vector.extract_strided_slice %109 {offsets = [0, 16], sizes = [8, 1], strides = [1, 1]} : vector<8x49xf32> to vector<8x1xf32>
    %250 = vector.broadcast %249 : vector<8x1xf32> to vector<8x512xf32>
    %251 = arith.mulf %250, %248 : vector<8x512xf32>
    %252 = arith.addf %244, %251 : vector<8x512xf32>
    %253 = vector.extract_strided_slice %109 {offsets = [0, 23], sizes = [8, 1], strides = [1, 1]} : vector<8x49xf32> to vector<8x1xf32>
    %254 = vector.broadcast %253 : vector<8x1xf32> to vector<8x512xf32>
    %255 = arith.mulf %254, %228 : vector<8x512xf32>
    %256 = arith.addf %252, %255 : vector<8x512xf32>
    %c496_i32_90 = arith.constant 496 : i32
    %257 = tpu.dynamic_rotate %228 by %c496_i32_90 dim 1 : vector<8x512xf32>, i32 -> vector<8x512xf32>
    %c4_91 = arith.constant 4 : index
    %c0_92 = arith.constant 0 : index
    %258 = vector.load %arg3[%c4_91, %c0_92] : memref<7x512xf32, #tpu.memory_space<vmem>>, vector<1x512xf32>
    %259 = vector.broadcast %258 : vector<1x512xf32> to vector<8x512xf32>
    %260 = arith.mulf %257, %259 : vector<8x512xf32>
    %261 = vector.extract_strided_slice %109 {offsets = [0, 30], sizes = [8, 1], strides = [1, 1]} : vector<8x49xf32> to vector<8x1xf32>
    %262 = vector.broadcast %261 : vector<8x1xf32> to vector<8x512xf32>
    %263 = arith.mulf %262, %260 : vector<8x512xf32>
    %264 = arith.addf %256, %263 : vector<8x512xf32>
    %c480_i32_93 = arith.constant 480 : i32
    %265 = tpu.dynamic_rotate %228 by %c480_i32_93 dim 1 : vector<8x512xf32>, i32 -> vector<8x512xf32>
    %c5_94 = arith.constant 5 : index
    %c0_95 = arith.constant 0 : index
    %266 = vector.load %arg3[%c5_94, %c0_95] : memref<7x512xf32, #tpu.memory_space<vmem>>, vector<1x512xf32>
    %267 = vector.broadcast %266 : vector<1x512xf32> to vector<8x512xf32>
    %268 = arith.mulf %265, %267 : vector<8x512xf32>
    %269 = vector.extract_strided_slice %109 {offsets = [0, 37], sizes = [8, 1], strides = [1, 1]} : vector<8x49xf32> to vector<8x1xf32>
    %270 = vector.broadcast %269 : vector<8x1xf32> to vector<8x512xf32>
    %271 = arith.mulf %270, %268 : vector<8x512xf32>
    %272 = arith.addf %264, %271 : vector<8x512xf32>
    %c464_i32_96 = arith.constant 464 : i32
    %273 = tpu.dynamic_rotate %228 by %c464_i32_96 dim 1 : vector<8x512xf32>, i32 -> vector<8x512xf32>
    %c6_97 = arith.constant 6 : index
    %c0_98 = arith.constant 0 : index
    %274 = vector.load %arg3[%c6_97, %c0_98] : memref<7x512xf32, #tpu.memory_space<vmem>>, vector<1x512xf32>
    %275 = vector.broadcast %274 : vector<1x512xf32> to vector<8x512xf32>
    %276 = arith.mulf %273, %275 : vector<8x512xf32>
    %277 = vector.extract_strided_slice %109 {offsets = [0, 44], sizes = [8, 1], strides = [1, 1]} : vector<8x49xf32> to vector<8x1xf32>
    %278 = vector.broadcast %277 : vector<8x1xf32> to vector<8x512xf32>
    %279 = arith.mulf %278, %276 : vector<8x512xf32>
    %280 = arith.addf %272, %279 : vector<8x512xf32>
    %c48_i32_99 = arith.constant 48 : i32
    %281 = tpu.dynamic_rotate %108 by %c48_i32_99 dim 1 : vector<8x512xf32>, i32 -> vector<8x512xf32>
    %c0_100 = arith.constant 0 : index
    %c0_101 = arith.constant 0 : index
    %282 = vector.load %arg3[%c0_100, %c0_101] : memref<7x512xf32, #tpu.memory_space<vmem>>, vector<1x512xf32>
    %283 = vector.broadcast %282 : vector<1x512xf32> to vector<8x512xf32>
    %284 = arith.mulf %281, %283 : vector<8x512xf32>
    %285 = vector.extract_strided_slice %109 {offsets = [0, 3], sizes = [8, 1], strides = [1, 1]} : vector<8x49xf32> to vector<8x1xf32>
    %286 = vector.broadcast %285 : vector<8x1xf32> to vector<8x512xf32>
    %287 = arith.mulf %286, %284 : vector<8x512xf32>
    %288 = arith.addf %280, %287 : vector<8x512xf32>
    %c32_i32_102 = arith.constant 32 : i32
    %289 = tpu.dynamic_rotate %108 by %c32_i32_102 dim 1 : vector<8x512xf32>, i32 -> vector<8x512xf32>
    %c1_103 = arith.constant 1 : index
    %c0_104 = arith.constant 0 : index
    %290 = vector.load %arg3[%c1_103, %c0_104] : memref<7x512xf32, #tpu.memory_space<vmem>>, vector<1x512xf32>
    %291 = vector.broadcast %290 : vector<1x512xf32> to vector<8x512xf32>
    %292 = arith.mulf %289, %291 : vector<8x512xf32>
    %293 = vector.extract_strided_slice %109 {offsets = [0, 10], sizes = [8, 1], strides = [1, 1]} : vector<8x49xf32> to vector<8x1xf32>
    %294 = vector.broadcast %293 : vector<8x1xf32> to vector<8x512xf32>
    %295 = arith.mulf %294, %292 : vector<8x512xf32>
    %296 = arith.addf %288, %295 : vector<8x512xf32>
    %c16_i32_105 = arith.constant 16 : i32
    %297 = tpu.dynamic_rotate %108 by %c16_i32_105 dim 1 : vector<8x512xf32>, i32 -> vector<8x512xf32>
    %c2_106 = arith.constant 2 : index
    %c0_107 = arith.constant 0 : index
    %298 = vector.load %arg3[%c2_106, %c0_107] : memref<7x512xf32, #tpu.memory_space<vmem>>, vector<1x512xf32>
    %299 = vector.broadcast %298 : vector<1x512xf32> to vector<8x512xf32>
    %300 = arith.mulf %297, %299 : vector<8x512xf32>
    %301 = vector.extract_strided_slice %109 {offsets = [0, 17], sizes = [8, 1], strides = [1, 1]} : vector<8x49xf32> to vector<8x1xf32>
    %302 = vector.broadcast %301 : vector<8x1xf32> to vector<8x512xf32>
    %303 = arith.mulf %302, %300 : vector<8x512xf32>
    %304 = arith.addf %296, %303 : vector<8x512xf32>
    %305 = vector.extract_strided_slice %109 {offsets = [0, 24], sizes = [8, 1], strides = [1, 1]} : vector<8x49xf32> to vector<8x1xf32>
    %306 = vector.broadcast %305 : vector<8x1xf32> to vector<8x512xf32>
    %307 = arith.mulf %306, %108 : vector<8x512xf32>
    %308 = arith.addf %304, %307 : vector<8x512xf32>
    %c496_i32_108 = arith.constant 496 : i32
    %309 = tpu.dynamic_rotate %108 by %c496_i32_108 dim 1 : vector<8x512xf32>, i32 -> vector<8x512xf32>
    %c4_109 = arith.constant 4 : index
    %c0_110 = arith.constant 0 : index
    %310 = vector.load %arg3[%c4_109, %c0_110] : memref<7x512xf32, #tpu.memory_space<vmem>>, vector<1x512xf32>
    %311 = vector.broadcast %310 : vector<1x512xf32> to vector<8x512xf32>
    %312 = arith.mulf %309, %311 : vector<8x512xf32>
    %313 = vector.extract_strided_slice %109 {offsets = [0, 31], sizes = [8, 1], strides = [1, 1]} : vector<8x49xf32> to vector<8x1xf32>
    %314 = vector.broadcast %313 : vector<8x1xf32> to vector<8x512xf32>
    %315 = arith.mulf %314, %312 : vector<8x512xf32>
    %316 = arith.addf %308, %315 : vector<8x512xf32>
    %c480_i32_111 = arith.constant 480 : i32
    %317 = tpu.dynamic_rotate %108 by %c480_i32_111 dim 1 : vector<8x512xf32>, i32 -> vector<8x512xf32>
    %c5_112 = arith.constant 5 : index
    %c0_113 = arith.constant 0 : index
    %318 = vector.load %arg3[%c5_112, %c0_113] : memref<7x512xf32, #tpu.memory_space<vmem>>, vector<1x512xf32>
    %319 = vector.broadcast %318 : vector<1x512xf32> to vector<8x512xf32>
    %320 = arith.mulf %317, %319 : vector<8x512xf32>
    %321 = vector.extract_strided_slice %109 {offsets = [0, 38], sizes = [8, 1], strides = [1, 1]} : vector<8x49xf32> to vector<8x1xf32>
    %322 = vector.broadcast %321 : vector<8x1xf32> to vector<8x512xf32>
    %323 = arith.mulf %322, %320 : vector<8x512xf32>
    %324 = arith.addf %316, %323 : vector<8x512xf32>
    %c464_i32_114 = arith.constant 464 : i32
    %325 = tpu.dynamic_rotate %108 by %c464_i32_114 dim 1 : vector<8x512xf32>, i32 -> vector<8x512xf32>
    %c6_115 = arith.constant 6 : index
    %c0_116 = arith.constant 0 : index
    %326 = vector.load %arg3[%c6_115, %c0_116] : memref<7x512xf32, #tpu.memory_space<vmem>>, vector<1x512xf32>
    %327 = vector.broadcast %326 : vector<1x512xf32> to vector<8x512xf32>
    %328 = arith.mulf %325, %327 : vector<8x512xf32>
    %329 = vector.extract_strided_slice %109 {offsets = [0, 45], sizes = [8, 1], strides = [1, 1]} : vector<8x49xf32> to vector<8x1xf32>
    %330 = vector.broadcast %329 : vector<8x1xf32> to vector<8x512xf32>
    %331 = arith.mulf %330, %328 : vector<8x512xf32>
    %332 = arith.addf %324, %331 : vector<8x512xf32>
    %c511_i32_117 = arith.constant 511 : i32
    %333 = tpu.dynamic_rotate %108 by %c511_i32_117 dim 1 : vector<8x512xf32>, i32 -> vector<8x512xf32>
    %c4_118 = arith.constant 4 : index
    %c0_119 = arith.constant 0 : index
    %334 = vector.load %arg2[%c4_118, %c0_119] : memref<7x512xf32, #tpu.memory_space<vmem>>, vector<1x512xf32>
    %335 = vector.broadcast %334 : vector<1x512xf32> to vector<8x512xf32>
    %336 = arith.mulf %333, %335 : vector<8x512xf32>
    %c48_i32_120 = arith.constant 48 : i32
    %337 = tpu.dynamic_rotate %336 by %c48_i32_120 dim 1 : vector<8x512xf32>, i32 -> vector<8x512xf32>
    %c0_121 = arith.constant 0 : index
    %c0_122 = arith.constant 0 : index
    %338 = vector.load %arg3[%c0_121, %c0_122] : memref<7x512xf32, #tpu.memory_space<vmem>>, vector<1x512xf32>
    %339 = vector.broadcast %338 : vector<1x512xf32> to vector<8x512xf32>
    %340 = arith.mulf %337, %339 : vector<8x512xf32>
    %341 = vector.extract_strided_slice %109 {offsets = [0, 4], sizes = [8, 1], strides = [1, 1]} : vector<8x49xf32> to vector<8x1xf32>
    %342 = vector.broadcast %341 : vector<8x1xf32> to vector<8x512xf32>
    %343 = arith.mulf %342, %340 : vector<8x512xf32>
    %344 = arith.addf %332, %343 : vector<8x512xf32>
    %c32_i32_123 = arith.constant 32 : i32
    %345 = tpu.dynamic_rotate %336 by %c32_i32_123 dim 1 : vector<8x512xf32>, i32 -> vector<8x512xf32>
    %c1_124 = arith.constant 1 : index
    %c0_125 = arith.constant 0 : index
    %346 = vector.load %arg3[%c1_124, %c0_125] : memref<7x512xf32, #tpu.memory_space<vmem>>, vector<1x512xf32>
    %347 = vector.broadcast %346 : vector<1x512xf32> to vector<8x512xf32>
    %348 = arith.mulf %345, %347 : vector<8x512xf32>
    %349 = vector.extract_strided_slice %109 {offsets = [0, 11], sizes = [8, 1], strides = [1, 1]} : vector<8x49xf32> to vector<8x1xf32>
    %350 = vector.broadcast %349 : vector<8x1xf32> to vector<8x512xf32>
    %351 = arith.mulf %350, %348 : vector<8x512xf32>
    %352 = arith.addf %344, %351 : vector<8x512xf32>
    %c16_i32_126 = arith.constant 16 : i32
    %353 = tpu.dynamic_rotate %336 by %c16_i32_126 dim 1 : vector<8x512xf32>, i32 -> vector<8x512xf32>
    %c2_127 = arith.constant 2 : index
    %c0_128 = arith.constant 0 : index
    %354 = vector.load %arg3[%c2_127, %c0_128] : memref<7x512xf32, #tpu.memory_space<vmem>>, vector<1x512xf32>
    %355 = vector.broadcast %354 : vector<1x512xf32> to vector<8x512xf32>
    %356 = arith.mulf %353, %355 : vector<8x512xf32>
    %357 = vector.extract_strided_slice %109 {offsets = [0, 18], sizes = [8, 1], strides = [1, 1]} : vector<8x49xf32> to vector<8x1xf32>
    %358 = vector.broadcast %357 : vector<8x1xf32> to vector<8x512xf32>
    %359 = arith.mulf %358, %356 : vector<8x512xf32>
    %360 = arith.addf %352, %359 : vector<8x512xf32>
    %361 = vector.extract_strided_slice %109 {offsets = [0, 25], sizes = [8, 1], strides = [1, 1]} : vector<8x49xf32> to vector<8x1xf32>
    %362 = vector.broadcast %361 : vector<8x1xf32> to vector<8x512xf32>
    %363 = arith.mulf %362, %336 : vector<8x512xf32>
    %364 = arith.addf %360, %363 : vector<8x512xf32>
    %c496_i32_129 = arith.constant 496 : i32
    %365 = tpu.dynamic_rotate %336 by %c496_i32_129 dim 1 : vector<8x512xf32>, i32 -> vector<8x512xf32>
    %c4_130 = arith.constant 4 : index
    %c0_131 = arith.constant 0 : index
    %366 = vector.load %arg3[%c4_130, %c0_131] : memref<7x512xf32, #tpu.memory_space<vmem>>, vector<1x512xf32>
    %367 = vector.broadcast %366 : vector<1x512xf32> to vector<8x512xf32>
    %368 = arith.mulf %365, %367 : vector<8x512xf32>
    %369 = vector.extract_strided_slice %109 {offsets = [0, 32], sizes = [8, 1], strides = [1, 1]} : vector<8x49xf32> to vector<8x1xf32>
    %370 = vector.broadcast %369 : vector<8x1xf32> to vector<8x512xf32>
    %371 = arith.mulf %370, %368 : vector<8x512xf32>
    %372 = arith.addf %364, %371 : vector<8x512xf32>
    %c480_i32_132 = arith.constant 480 : i32
    %373 = tpu.dynamic_rotate %336 by %c480_i32_132 dim 1 : vector<8x512xf32>, i32 -> vector<8x512xf32>
    %c5_133 = arith.constant 5 : index
    %c0_134 = arith.constant 0 : index
    %374 = vector.load %arg3[%c5_133, %c0_134] : memref<7x512xf32, #tpu.memory_space<vmem>>, vector<1x512xf32>
    %375 = vector.broadcast %374 : vector<1x512xf32> to vector<8x512xf32>
    %376 = arith.mulf %373, %375 : vector<8x512xf32>
    %377 = vector.extract_strided_slice %109 {offsets = [0, 39], sizes = [8, 1], strides = [1, 1]} : vector<8x49xf32> to vector<8x1xf32>
    %378 = vector.broadcast %377 : vector<8x1xf32> to vector<8x512xf32>
    %379 = arith.mulf %378, %376 : vector<8x512xf32>
    %380 = arith.addf %372, %379 : vector<8x512xf32>
    %c464_i32_135 = arith.constant 464 : i32
    %381 = tpu.dynamic_rotate %336 by %c464_i32_135 dim 1 : vector<8x512xf32>, i32 -> vector<8x512xf32>
    %c6_136 = arith.constant 6 : index
    %c0_137 = arith.constant 0 : index
    %382 = vector.load %arg3[%c6_136, %c0_137] : memref<7x512xf32, #tpu.memory_space<vmem>>, vector<1x512xf32>
    %383 = vector.broadcast %382 : vector<1x512xf32> to vector<8x512xf32>
    %384 = arith.mulf %381, %383 : vector<8x512xf32>
    %385 = vector.extract_strided_slice %109 {offsets = [0, 46], sizes = [8, 1], strides = [1, 1]} : vector<8x49xf32> to vector<8x1xf32>
    %386 = vector.broadcast %385 : vector<8x1xf32> to vector<8x512xf32>
    %387 = arith.mulf %386, %384 : vector<8x512xf32>
    %388 = arith.addf %380, %387 : vector<8x512xf32>
    %c510_i32 = arith.constant 510 : i32
    %389 = tpu.dynamic_rotate %108 by %c510_i32 dim 1 : vector<8x512xf32>, i32 -> vector<8x512xf32>
    %c5_138 = arith.constant 5 : index
    %c0_139 = arith.constant 0 : index
    %390 = vector.load %arg2[%c5_138, %c0_139] : memref<7x512xf32, #tpu.memory_space<vmem>>, vector<1x512xf32>
    %391 = vector.broadcast %390 : vector<1x512xf32> to vector<8x512xf32>
    %392 = arith.mulf %389, %391 : vector<8x512xf32>
    %c48_i32_140 = arith.constant 48 : i32
    %393 = tpu.dynamic_rotate %392 by %c48_i32_140 dim 1 : vector<8x512xf32>, i32 -> vector<8x512xf32>
    %c0_141 = arith.constant 0 : index
    %c0_142 = arith.constant 0 : index
    %394 = vector.load %arg3[%c0_141, %c0_142] : memref<7x512xf32, #tpu.memory_space<vmem>>, vector<1x512xf32>
    %395 = vector.broadcast %394 : vector<1x512xf32> to vector<8x512xf32>
    %396 = arith.mulf %393, %395 : vector<8x512xf32>
    %397 = vector.extract_strided_slice %109 {offsets = [0, 5], sizes = [8, 1], strides = [1, 1]} : vector<8x49xf32> to vector<8x1xf32>
    %398 = vector.broadcast %397 : vector<8x1xf32> to vector<8x512xf32>
    %399 = arith.mulf %398, %396 : vector<8x512xf32>
    %400 = arith.addf %388, %399 : vector<8x512xf32>
    %c32_i32_143 = arith.constant 32 : i32
    %401 = tpu.dynamic_rotate %392 by %c32_i32_143 dim 1 : vector<8x512xf32>, i32 -> vector<8x512xf32>
    %c1_144 = arith.constant 1 : index
    %c0_145 = arith.constant 0 : index
    %402 = vector.load %arg3[%c1_144, %c0_145] : memref<7x512xf32, #tpu.memory_space<vmem>>, vector<1x512xf32>
    %403 = vector.broadcast %402 : vector<1x512xf32> to vector<8x512xf32>
    %404 = arith.mulf %401, %403 : vector<8x512xf32>
    %405 = vector.extract_strided_slice %109 {offsets = [0, 12], sizes = [8, 1], strides = [1, 1]} : vector<8x49xf32> to vector<8x1xf32>
    %406 = vector.broadcast %405 : vector<8x1xf32> to vector<8x512xf32>
    %407 = arith.mulf %406, %404 : vector<8x512xf32>
    %408 = arith.addf %400, %407 : vector<8x512xf32>
    %c16_i32_146 = arith.constant 16 : i32
    %409 = tpu.dynamic_rotate %392 by %c16_i32_146 dim 1 : vector<8x512xf32>, i32 -> vector<8x512xf32>
    %c2_147 = arith.constant 2 : index
    %c0_148 = arith.constant 0 : index
    %410 = vector.load %arg3[%c2_147, %c0_148] : memref<7x512xf32, #tpu.memory_space<vmem>>, vector<1x512xf32>
    %411 = vector.broadcast %410 : vector<1x512xf32> to vector<8x512xf32>
    %412 = arith.mulf %409, %411 : vector<8x512xf32>
    %413 = vector.extract_strided_slice %109 {offsets = [0, 19], sizes = [8, 1], strides = [1, 1]} : vector<8x49xf32> to vector<8x1xf32>
    %414 = vector.broadcast %413 : vector<8x1xf32> to vector<8x512xf32>
    %415 = arith.mulf %414, %412 : vector<8x512xf32>
    %416 = arith.addf %408, %415 : vector<8x512xf32>
    %417 = vector.extract_strided_slice %109 {offsets = [0, 26], sizes = [8, 1], strides = [1, 1]} : vector<8x49xf32> to vector<8x1xf32>
    %418 = vector.broadcast %417 : vector<8x1xf32> to vector<8x512xf32>
    %419 = arith.mulf %418, %392 : vector<8x512xf32>
    %420 = arith.addf %416, %419 : vector<8x512xf32>
    %c496_i32_149 = arith.constant 496 : i32
    %421 = tpu.dynamic_rotate %392 by %c496_i32_149 dim 1 : vector<8x512xf32>, i32 -> vector<8x512xf32>
    %c4_150 = arith.constant 4 : index
    %c0_151 = arith.constant 0 : index
    %422 = vector.load %arg3[%c4_150, %c0_151] : memref<7x512xf32, #tpu.memory_space<vmem>>, vector<1x512xf32>
    %423 = vector.broadcast %422 : vector<1x512xf32> to vector<8x512xf32>
    %424 = arith.mulf %421, %423 : vector<8x512xf32>
    %425 = vector.extract_strided_slice %109 {offsets = [0, 33], sizes = [8, 1], strides = [1, 1]} : vector<8x49xf32> to vector<8x1xf32>
    %426 = vector.broadcast %425 : vector<8x1xf32> to vector<8x512xf32>
    %427 = arith.mulf %426, %424 : vector<8x512xf32>
    %428 = arith.addf %420, %427 : vector<8x512xf32>
    %c480_i32_152 = arith.constant 480 : i32
    %429 = tpu.dynamic_rotate %392 by %c480_i32_152 dim 1 : vector<8x512xf32>, i32 -> vector<8x512xf32>
    %c5_153 = arith.constant 5 : index
    %c0_154 = arith.constant 0 : index
    %430 = vector.load %arg3[%c5_153, %c0_154] : memref<7x512xf32, #tpu.memory_space<vmem>>, vector<1x512xf32>
    %431 = vector.broadcast %430 : vector<1x512xf32> to vector<8x512xf32>
    %432 = arith.mulf %429, %431 : vector<8x512xf32>
    %433 = vector.extract_strided_slice %109 {offsets = [0, 40], sizes = [8, 1], strides = [1, 1]} : vector<8x49xf32> to vector<8x1xf32>
    %434 = vector.broadcast %433 : vector<8x1xf32> to vector<8x512xf32>
    %435 = arith.mulf %434, %432 : vector<8x512xf32>
    %436 = arith.addf %428, %435 : vector<8x512xf32>
    %c464_i32_155 = arith.constant 464 : i32
    %437 = tpu.dynamic_rotate %392 by %c464_i32_155 dim 1 : vector<8x512xf32>, i32 -> vector<8x512xf32>
    %c6_156 = arith.constant 6 : index
    %c0_157 = arith.constant 0 : index
    %438 = vector.load %arg3[%c6_156, %c0_157] : memref<7x512xf32, #tpu.memory_space<vmem>>, vector<1x512xf32>
    %439 = vector.broadcast %438 : vector<1x512xf32> to vector<8x512xf32>
    %440 = arith.mulf %437, %439 : vector<8x512xf32>
    %441 = vector.extract_strided_slice %109 {offsets = [0, 47], sizes = [8, 1], strides = [1, 1]} : vector<8x49xf32> to vector<8x1xf32>
    %442 = vector.broadcast %441 : vector<8x1xf32> to vector<8x512xf32>
    %443 = arith.mulf %442, %440 : vector<8x512xf32>
    %444 = arith.addf %436, %443 : vector<8x512xf32>
    %c509_i32 = arith.constant 509 : i32
    %445 = tpu.dynamic_rotate %108 by %c509_i32 dim 1 : vector<8x512xf32>, i32 -> vector<8x512xf32>
    %c6_158 = arith.constant 6 : index
    %c0_159 = arith.constant 0 : index
    %446 = vector.load %arg2[%c6_158, %c0_159] : memref<7x512xf32, #tpu.memory_space<vmem>>, vector<1x512xf32>
    %447 = vector.broadcast %446 : vector<1x512xf32> to vector<8x512xf32>
    %448 = arith.mulf %445, %447 : vector<8x512xf32>
    %c48_i32_160 = arith.constant 48 : i32
    %449 = tpu.dynamic_rotate %448 by %c48_i32_160 dim 1 : vector<8x512xf32>, i32 -> vector<8x512xf32>
    %c0_161 = arith.constant 0 : index
    %c0_162 = arith.constant 0 : index
    %450 = vector.load %arg3[%c0_161, %c0_162] : memref<7x512xf32, #tpu.memory_space<vmem>>, vector<1x512xf32>
    %451 = vector.broadcast %450 : vector<1x512xf32> to vector<8x512xf32>
    %452 = arith.mulf %449, %451 : vector<8x512xf32>
    %453 = vector.extract_strided_slice %109 {offsets = [0, 6], sizes = [8, 1], strides = [1, 1]} : vector<8x49xf32> to vector<8x1xf32>
    %454 = vector.broadcast %453 : vector<8x1xf32> to vector<8x512xf32>
    %455 = arith.mulf %454, %452 : vector<8x512xf32>
    %456 = arith.addf %444, %455 : vector<8x512xf32>
    %c32_i32_163 = arith.constant 32 : i32
    %457 = tpu.dynamic_rotate %448 by %c32_i32_163 dim 1 : vector<8x512xf32>, i32 -> vector<8x512xf32>
    %c1_164 = arith.constant 1 : index
    %c0_165 = arith.constant 0 : index
    %458 = vector.load %arg3[%c1_164, %c0_165] : memref<7x512xf32, #tpu.memory_space<vmem>>, vector<1x512xf32>
    %459 = vector.broadcast %458 : vector<1x512xf32> to vector<8x512xf32>
    %460 = arith.mulf %457, %459 : vector<8x512xf32>
    %461 = vector.extract_strided_slice %109 {offsets = [0, 13], sizes = [8, 1], strides = [1, 1]} : vector<8x49xf32> to vector<8x1xf32>
    %462 = vector.broadcast %461 : vector<8x1xf32> to vector<8x512xf32>
    %463 = arith.mulf %462, %460 : vector<8x512xf32>
    %464 = arith.addf %456, %463 : vector<8x512xf32>
    %c16_i32_166 = arith.constant 16 : i32
    %465 = tpu.dynamic_rotate %448 by %c16_i32_166 dim 1 : vector<8x512xf32>, i32 -> vector<8x512xf32>
    %c2_167 = arith.constant 2 : index
    %c0_168 = arith.constant 0 : index
    %466 = vector.load %arg3[%c2_167, %c0_168] : memref<7x512xf32, #tpu.memory_space<vmem>>, vector<1x512xf32>
    %467 = vector.broadcast %466 : vector<1x512xf32> to vector<8x512xf32>
    %468 = arith.mulf %465, %467 : vector<8x512xf32>
    %469 = vector.extract_strided_slice %109 {offsets = [0, 20], sizes = [8, 1], strides = [1, 1]} : vector<8x49xf32> to vector<8x1xf32>
    %470 = vector.broadcast %469 : vector<8x1xf32> to vector<8x512xf32>
    %471 = arith.mulf %470, %468 : vector<8x512xf32>
    %472 = arith.addf %464, %471 : vector<8x512xf32>
    %473 = vector.extract_strided_slice %109 {offsets = [0, 27], sizes = [8, 1], strides = [1, 1]} : vector<8x49xf32> to vector<8x1xf32>
    %474 = vector.broadcast %473 : vector<8x1xf32> to vector<8x512xf32>
    %475 = arith.mulf %474, %448 : vector<8x512xf32>
    %476 = arith.addf %472, %475 : vector<8x512xf32>
    %c496_i32_169 = arith.constant 496 : i32
    %477 = tpu.dynamic_rotate %448 by %c496_i32_169 dim 1 : vector<8x512xf32>, i32 -> vector<8x512xf32>
    %c4_170 = arith.constant 4 : index
    %c0_171 = arith.constant 0 : index
    %478 = vector.load %arg3[%c4_170, %c0_171] : memref<7x512xf32, #tpu.memory_space<vmem>>, vector<1x512xf32>
    %479 = vector.broadcast %478 : vector<1x512xf32> to vector<8x512xf32>
    %480 = arith.mulf %477, %479 : vector<8x512xf32>
    %481 = vector.extract_strided_slice %109 {offsets = [0, 34], sizes = [8, 1], strides = [1, 1]} : vector<8x49xf32> to vector<8x1xf32>
    %482 = vector.broadcast %481 : vector<8x1xf32> to vector<8x512xf32>
    %483 = arith.mulf %482, %480 : vector<8x512xf32>
    %484 = arith.addf %476, %483 : vector<8x512xf32>
    %c480_i32_172 = arith.constant 480 : i32
    %485 = tpu.dynamic_rotate %448 by %c480_i32_172 dim 1 : vector<8x512xf32>, i32 -> vector<8x512xf32>
    %c5_173 = arith.constant 5 : index
    %c0_174 = arith.constant 0 : index
    %486 = vector.load %arg3[%c5_173, %c0_174] : memref<7x512xf32, #tpu.memory_space<vmem>>, vector<1x512xf32>
    %487 = vector.broadcast %486 : vector<1x512xf32> to vector<8x512xf32>
    %488 = arith.mulf %485, %487 : vector<8x512xf32>
    %489 = vector.extract_strided_slice %109 {offsets = [0, 41], sizes = [8, 1], strides = [1, 1]} : vector<8x49xf32> to vector<8x1xf32>
    %490 = vector.broadcast %489 : vector<8x1xf32> to vector<8x512xf32>
    %491 = arith.mulf %490, %488 : vector<8x512xf32>
    %492 = arith.addf %484, %491 : vector<8x512xf32>
    %c464_i32_175 = arith.constant 464 : i32
    %493 = tpu.dynamic_rotate %448 by %c464_i32_175 dim 1 : vector<8x512xf32>, i32 -> vector<8x512xf32>
    %c6_176 = arith.constant 6 : index
    %c0_177 = arith.constant 0 : index
    %494 = vector.load %arg3[%c6_176, %c0_177] : memref<7x512xf32, #tpu.memory_space<vmem>>, vector<1x512xf32>
    %495 = vector.broadcast %494 : vector<1x512xf32> to vector<8x512xf32>
    %496 = arith.mulf %493, %495 : vector<8x512xf32>
    %497 = vector.extract_strided_slice %109 {offsets = [0, 48], sizes = [8, 1], strides = [1, 1]} : vector<8x49xf32> to vector<8x1xf32>
    %498 = vector.broadcast %497 : vector<8x1xf32> to vector<8x512xf32>
    %499 = arith.mulf %498, %496 : vector<8x512xf32>
    %500 = arith.addf %492, %499 : vector<8x512xf32>
    %501 = arith.addf %108, %500 : vector<8x512xf32>
    %cst_178 = arith.constant 5.000000e-01 : f32
    %502 = vector.broadcast %cst_178 : f32 to vector<8x512xf32>
    %503 = arith.mulf %502, %501 : vector<8x512xf32>
    %cst_179 = arith.constant 1.41421354 : f32
    %504 = vector.broadcast %cst_179 : f32 to vector<8x512xf32>
    %505 = arith.divf %501, %504 : vector<8x512xf32>
    %506 = math.erf %505 : vector<8x512xf32>
    %cst_180 = arith.constant 1.000000e+00 : f32
    %507 = vector.broadcast %cst_180 : f32 to vector<8x512xf32>
    %508 = arith.addf %507, %506 : vector<8x512xf32>
    %509 = arith.mulf %503, %508 : vector<8x512xf32>
    %c0_181 = arith.constant 0 : index
    %c0_182 = arith.constant 0 : index
    %510 = vector.load %arg12[%c0_181, %c0_182] : memref<8x8xf32, #tpu.memory_space<vmem>>, vector<8x8xf32>
    %cst_183 = arith.constant dense<0.000000e+00> : vector<8x512xf32>
    %511 = tpu.matmul %510, %509, %cst_183 {dimension_numbers = #tpu.dot_dimension_numbers<[1], [0], [0], [1], [0, 0, 1, 1], [], []>} : vector<8x8xf32>, vector<8x512xf32>, vector<8x512xf32> -> vector<8x512xf32>
    %c0_184 = arith.constant 0 : index
    %c0_185 = arith.constant 0 : index
    %512 = vector.load %arg13[%c0_184, %c0_185] : memref<8x1xf32, #tpu.memory_space<vmem>>, vector<8x1xf32>
    %513 = vector.broadcast %512 : vector<8x1xf32> to vector<8x512xf32>
    %514 = arith.addf %511, %513 : vector<8x512xf32>
    %515 = arith.addf %509, %514 : vector<8x512xf32>
    %cst_186 = arith.constant 5.000000e-01 : f32
    %516 = vector.broadcast %cst_186 : f32 to vector<8x512xf32>
    %517 = arith.mulf %516, %515 : vector<8x512xf32>
    %cst_187 = arith.constant 1.41421354 : f32
    %518 = vector.broadcast %cst_187 : f32 to vector<8x512xf32>
    %519 = arith.divf %515, %518 : vector<8x512xf32>
    %520 = math.erf %519 : vector<8x512xf32>
    %cst_188 = arith.constant 1.000000e+00 : f32
    %521 = vector.broadcast %cst_188 : f32 to vector<8x512xf32>
    %522 = arith.addf %521, %520 : vector<8x512xf32>
    %523 = arith.mulf %517, %522 : vector<8x512xf32>
    %c0_189 = arith.constant 0 : index
    %c0_190 = arith.constant 0 : index
    %524 = vector.load %arg14[%c0_189, %c0_190] : memref<16x8xf32, #tpu.memory_space<vmem>>, vector<16x8xf32>
    %cst_191 = arith.constant dense<0.000000e+00> : vector<16x512xf32>
    %525 = tpu.matmul %524, %523, %cst_191 {dimension_numbers = #tpu.dot_dimension_numbers<[1], [0], [0], [1], [0, 0, 1, 1], [], []>} : vector<16x8xf32>, vector<8x512xf32>, vector<16x512xf32> -> vector<16x512xf32>
    %c0_192 = arith.constant 0 : index
    %c0_193 = arith.constant 0 : index
    %526 = vector.load %arg15[%c0_192, %c0_193] : memref<16x1xf32, #tpu.memory_space<vmem>>, vector<16x1xf32>
    %527 = vector.broadcast %526 : vector<16x1xf32> to vector<16x512xf32>
    %528 = arith.addf %525, %527 : vector<16x512xf32>
    %cst_194 = arith.constant 5.000000e-01 : f32
    %529 = vector.broadcast %cst_194 : f32 to vector<16x512xf32>
    %530 = arith.mulf %529, %528 : vector<16x512xf32>
    %cst_195 = arith.constant 1.41421354 : f32
    %531 = vector.broadcast %cst_195 : f32 to vector<16x512xf32>
    %532 = arith.divf %528, %531 : vector<16x512xf32>
    %533 = math.erf %532 : vector<16x512xf32>
    %cst_196 = arith.constant 1.000000e+00 : f32
    %534 = vector.broadcast %cst_196 : f32 to vector<16x512xf32>
    %535 = arith.addf %534, %533 : vector<16x512xf32>
    %536 = arith.mulf %530, %535 : vector<16x512xf32>
    %c0_197 = arith.constant 0 : index
    %c0_198 = arith.constant 0 : index
    %537 = vector.load %arg16[%c0_197, %c0_198] : memref<16x16xf32, #tpu.memory_space<vmem>>, vector<16x16xf32>
    %cst_199 = arith.constant dense<0.000000e+00> : vector<16x512xf32>
    %538 = tpu.matmul %537, %536, %cst_199 {dimension_numbers = #tpu.dot_dimension_numbers<[1], [0], [0], [1], [0, 0, 1, 1], [], []>} : vector<16x16xf32>, vector<16x512xf32>, vector<16x512xf32> -> vector<16x512xf32>
    %c0_200 = arith.constant 0 : index
    %c0_201 = arith.constant 0 : index
    %539 = vector.load %arg17[%c0_200, %c0_201] : memref<16x1xf32, #tpu.memory_space<vmem>>, vector<16x1xf32>
    %540 = vector.broadcast %539 : vector<16x1xf32> to vector<16x512xf32>
    %541 = arith.addf %538, %540 : vector<16x512xf32>
    %c0_202 = arith.constant 0 : index
    %c0_203 = arith.constant 0 : index
    %542 = vector.load %arg18[%c0_202, %c0_203] : memref<16x512xf32, #tpu.memory_space<vmem>>, vector<16x512xf32>
    tpu.vector_store %arg18[%c0_202, %c0_203], %541 {strides = array<i32>} : memref<16x512xf32, #tpu.memory_space<vmem>>, vector<16x512xf32>,
    return
  }
  func.func @transform_0(%arg0: i32) -> (i32, i32) {
    %c0_i32 = arith.constant 0 : i32
    %c0_i32_0 = arith.constant 0 : i32
    return %c0_i32, %arg0 : i32, i32
  }
  func.func @transform_1(%arg0: i32) -> (i32, i32) {
    %c0_i32 = arith.constant 0 : i32
    %c0_i32_0 = arith.constant 0 : i32
    %c0_i32_1 = arith.constant 0 : i32
    return %c0_i32, %c0_i32_0 : i32, i32
  }
  func.func @transform_2(%arg0: i32) -> (i32, i32) {
    %c0_i32 = arith.constant 0 : i32
    %c0_i32_0 = arith.constant 0 : i32
    %c0_i32_1 = arith.constant 0 : i32
    return %c0_i32, %c0_i32_0 : i32, i32
  }
  func.func @transform_3(%arg0: i32) -> (i32, i32) {
    %c0_i32 = arith.constant 0 : i32
    %c0_i32_0 = arith.constant 0 : i32
    %c0_i32_1 = arith.constant 0 : i32
    return %c0_i32, %c0_i32_0 : i32, i32
  }
  func.func @transform_4(%arg0: i32) -> (i32, i32) {
    %c0_i32 = arith.constant 0 : i32
    %c0_i32_0 = arith.constant 0 : i32
    %c0_i32_1 = arith.constant 0 : i32
    return %c0_i32, %c0_i32_0 : i32, i32
  }
  func.func @transform_5(%arg0: i32) -> (i32, i32) {
    %c0_i32 = arith.constant 0 : i32
    %c0_i32_0 = arith.constant 0 : i32
    %c0_i32_1 = arith.constant 0 : i32
    return %c0_i32, %c0_i32_0 : i32, i32
  }
  func.func @transform_6(%arg0: i32) -> (i32, i32) {
    %c0_i32 = arith.constant 0 : i32
    %c0_i32_0 = arith.constant 0 : i32
    %c0_i32_1 = arith.constant 0 : i32
    return %c0_i32, %c0_i32_0 : i32, i32
  }
  func.func @transform_7(%arg0: i32) -> (i32, i32) {
    %c0_i32 = arith.constant 0 : i32
    %c0_i32_0 = arith.constant 0 : i32
    %c0_i32_1 = arith.constant 0 : i32
    return %c0_i32, %c0_i32_0 : i32, i32
  }
  func.func @transform_8(%arg0: i32) -> (i32, i32) {
    %c0_i32 = arith.constant 0 : i32
    %c0_i32_0 = arith.constant 0 : i32
    %c0_i32_1 = arith.constant 0 : i32
    return %c0_i32, %c0_i32_0 : i32, i32
  }
  func.func @transform_9(%arg0: i32) -> (i32, i32) {
    %c0_i32 = arith.constant 0 : i32
    %c0_i32_0 = arith.constant 0 : i32
    %c0_i32_1 = arith.constant 0 : i32
    return %c0_i32, %c0_i32_0 : i32, i32
  }
  func.func @transform_10(%arg0: i32) -> (i32, i32) {
    %c0_i32 = arith.constant 0 : i32
    %c0_i32_0 = arith.constant 0 : i32
    %c0_i32_1 = arith.constant 0 : i32
    return %c0_i32, %c0_i32_0 : i32, i32
  }
  func.func @transform_11(%arg0: i32) -> (i32, i32) {
    %c0_i32 = arith.constant 0 : i32
    %c0_i32_0 = arith.constant 0 : i32
    %c0_i32_1 = arith.constant 0 : i32
    return %c0_i32, %c0_i32_0 : i32, i32
  }
  func.func @transform_12(%arg0: i32) -> (i32, i32) {
    %c0_i32 = arith.constant 0 : i32
    %c0_i32_0 = arith.constant 0 : i32
    %c0_i32_1 = arith.constant 0 : i32
    return %c0_i32, %c0_i32_0 : i32, i32
  }
  func.func @transform_13(%arg0: i32) -> (i32, i32) {
    %c0_i32 = arith.constant 0 : i32
    %c0_i32_0 = arith.constant 0 : i32
    %c0_i32_1 = arith.constant 0 : i32
    return %c0_i32, %c0_i32_0 : i32, i32
  }
  func.func @transform_14(%arg0: i32) -> (i32, i32) {
    %c0_i32 = arith.constant 0 : i32
    %c0_i32_0 = arith.constant 0 : i32
    %c0_i32_1 = arith.constant 0 : i32
    return %c0_i32, %c0_i32_0 : i32, i32
  }
  func.func @transform_15(%arg0: i32) -> (i32, i32) {
    %c0_i32 = arith.constant 0 : i32
    %c0_i32_0 = arith.constant 0 : i32
    %c0_i32_1 = arith.constant 0 : i32
    return %c0_i32, %c0_i32_0 : i32, i32
  }
  func.func @transform_16(%arg0: i32) -> (i32, i32) {
    %c0_i32 = arith.constant 0 : i32
    %c0_i32_0 = arith.constant 0 : i32
    %c0_i32_1 = arith.constant 0 : i32
    return %c0_i32, %c0_i32_0 : i32, i32
  }
  func.func @transform_17(%arg0: i32) -> (i32, i32) {
    %c0_i32 = arith.constant 0 : i32
    %c0_i32_0 = arith.constant 0 : i32
    return %c0_i32, %arg0 : i32, i32
  }
}

</mosaic_0001>

<bundles_post_ra>
// kernel: tile.15
= control target key start
LH: loop header
LB: loop body
LE: loop exit
PB: predicated region body
PF: predicated region fallthrough
CT: control target
= control target key end

     0   :  { %s7_s6 = smov 3  ;;  %s21_s9 = smov 3  ;;  %vm4_vm0 = vcmask 130048   ;;  %vm11_vm1 = vcmask 1048448   ;;  %vm18_vm2 = vcmask 917248   ;;  %vm25_vm3 = vcmask 786048   ;;  %s121_s0 = inlined_call_operand.vmem [shape: s32[16,16], index: 0, kind: input, shape index: {}]   ;;  %s122_s1 = inlined_call_operand.vmem [shape: s32[256], index: 1, kind: output, shape index: {}]  }
   0x1   :  { %v63_v0 = vld [vmem:[%s121_s0 + $0x7] ss:$8 sm:%s7_s6]   ;;  %s77_s10 = smov 112   ;;  %v65_v1 = vld [vmem:[%s121_s0 + $0x5] ss:$8 sm:%s21_s9]   ;;  %s14_s13 = smov 3 }
   0x2   :  { %9 = vrot.lane.b32.xlu0 %v63_v0, %s77_s10  ;;  %s78_s14 = smov 80   ;;  %v64_v2 = vld [vmem:[%s121_s0 + $0x6] ss:$8 sm:%s14_s13]   ;;  %s28_s17 = smov 3  ;;  %vm32_vm4 = vcmask 654848   ;;  %vm39_vm5 = vcmask 523648  }
   0x3   :  { %23 = vrot.lane.b32.xlu1 %v65_v1, %s78_s14  ;;  %v66_v3 = vld [vmem:[%s121_s0 + $0x4] ss:$8 sm:%s28_s17]   ;;  %s35_s20 = smov 3  ;;  %s42_s21 = smov 3  ;;  %vm46_vm6 = vcmask 392448   ;;  %vm53_vm7 = vcmask 261248  }
   0x4   :  { %s79_s22 = smov 96   ;;  %s80_s23 = smov 64   ;;  %v67_v4 = vld [vmem:[%s121_s0 + $0x3] ss:$8 sm:%s35_s20]   ;;  %v68_v5 = vld [vmem:[%s121_s0 + $0x2] ss:$8 sm:%s42_s21]  }
   0x5   :  { %s2_s26 = smov 3  ;;  %s49_s29 = smov 3 }
   0x6   :  { %16 = vrot.lane.b32.xlu0 %v64_v2, %s79_s22  ;;  %v3_v6 = vld [vmem:[%s121_s0] ss:$8 sm:%s2_s26]   ;;  %s81_s3 = smov 48   ;;  %s82_s4 = smov 32  }
   0x7   :  { %30 = vrot.lane.b32.xlu1 %v66_v3, %s80_s23  ;;  %5 = vst.msk [vmem:[#allocation0] sm:$0x3] %vm4_vm0, %v3_v6   ;;  %v69_v7 = vld [vmem:[%s121_s0 + $0x1] ss:$8 sm:%s49_s29]   ;;  %s83_s0 = smov 16  }
   0xa   :  { %37 = vrot.lane.b32.xlu0 %v67_v4, %s81_s3 }
   0xb   :  { %44 = vrot.lane.b32.xlu1 %v68_v5, %s82_s4 }
   0xe   :  { %51 = vrot.lane.b32.xlu0 %v69_v7, %s83_s0 }
  0x74   :  { %v10_v8 = vpop.permute.xlu0 %9  }
  0x75   :  { %12 = vst.msk [vmem:[#allocation0] sm:$0x3] %vm11_vm1, %v10_v8   ;;  %v24_v9 = vpop.permute.xlu1 %23  }
  0x78   :  { %v17_v10 = vpop.permute.xlu0 %16  }
  0x79   :  { %19 = vst.msk [vmem:[#allocation0] sm:$0x3] %vm18_vm2, %v17_v10   ;;  %v31_v11 = vpop.permute.xlu1 %30  }
  0x7a   :  { %26 = vst.msk [vmem:[#allocation0] sm:$0x3] %vm25_vm3, %v24_v9  }
  0x7b   :  { %33 = vst.msk [vmem:[#allocation0] sm:$0x3] %vm32_vm4, %v31_v11  }
  0x7c   :  { %v38_v12 = vpop.permute.xlu0 %37  }
  0x7d   :  { %40 = vst.msk [vmem:[#allocation0] sm:$0x3] %vm39_vm5, %v38_v12   ;;  %v45_v13 = vpop.permute.xlu1 %44  }
  0x7e   :  { %47 = vst.msk [vmem:[#allocation0] sm:$0x3] %vm46_vm6, %v45_v13  }
  0x80   :  { %v52_v14 = vpop.permute.xlu0 %51  }
  0x81   :  { %54 = vst.msk [vmem:[#allocation0] sm:$0x3] %vm53_vm7, %v52_v14  }
  0x88   :  { %v59_v15 = vld [vmem:[#allocation0] sm:$0x3] }
  0x89   :  { %62 = vst [vmem:[%s122_s1] sm:$0x3] %v59_v15 }

// kernel: pcblock_forward.1
= control target key start
LH: loop header
LB: loop body
LE: loop exit
PB: predicated region body
PF: predicated region fallthrough
CT: control target
= control target key end

     0   :  { %v5720_v3 = vmov 0.0   ;;  %vm74_vm0 = vcmask 64512   ;;  %v3183_v8 = vmov 0   ;;  %v3184_v10 = vmov 7   ;;  %s3234_s18 = smov 127   ;;  %s3236_s29 = smov 3   ;;  %s5700_s0 = inlined_call_operand.vmem [shape: f32[8,512], index: 0, kind: input, shape index: {}]   ;;  %s5701_s3 = inlined_call_operand.vmem [shape: f32[16,8], index: 3, kind: input, shape index: {}]   ;;  %s5702_s4 = inlined_call_operand.vmem [shape: f32[16,1], index: 4, kind: input, shape index: {}]   ;;  %s5703_s9 = inlined_call_operand.vmem [shape: f32[8,49], index: 9, kind: input, shape index: {}]   ;;  %s5704_s6 = inlined_call_operand.vmem [shape: f32[8,1], index: 6, kind: input, shape index: {}]   ;;  %s5705_s7 = inlined_call_operand.vmem [shape: f32[8,9], index: 7, kind: input, shape index: {}]   ;;  %s5706_s5 = inlined_call_operand.vmem [shape: f32[8,16], index: 5, kind: input, shape index: {}]   ;;  %s5707_s8 = inlined_call_operand.vmem [shape: f32[8,1], index: 8, kind: input, shape index: {}]   ;;  %s5708_s10 = inlined_call_operand.vmem [shape: f32[8,1], index: 10, kind: input, shape index: {}]   ;;  %s5709_s1 = inlined_call_operand.vmem [shape: f32[7,512], index: 1, kind: input, shape index: {}]   ;;  %s5710_s2 = inlined_call_operand.vmem [shape: f32[7,512], index: 2, kind: input, shape index: {}]   ;;  %s5711_s12 = inlined_call_operand.vmem [shape: f32[8,1], index: 12, kind: input, shape index: {}]   ;;  %s5712_s16 = inlined_call_operand.vmem [shape: f32[16,1], index: 16, kind: input, shape index: {}]   ;;  %s5713_s11 = inlined_call_operand.vmem [shape: f32[8,8], index: 11, kind: input, shape index: {}]   ;;  %s5714_s14 = inlined_call_operand.vmem [shape: f32[16,1], index: 14, kind: input, shape index: {}]   ;;  %s5715_s13 = inlined_call_operand.vmem [shape: f32[16,8], index: 13, kind: input, shape index: {}]   ;;  %s5716_s15 = inlined_call_operand.vmem [shape: f32[16,16], index: 15, kind: input, shape index: {}]   ;;  %s5717_s17 = inlined_call_operand.vmem [shape: f32[16,512], index: 17, kind: output, shape index: {}]  }
   0x1   :  { %5871 = sst [smem:[#allocation102_spill]] %s5700_s0  ;;  %145 = vmatprep.mubr.f32.mxu0 %v5720_v3  ;;  %222 = vmatprep.mubr.f32.mxu1 %v5720_v3  ;;  %v63_v6 = vld [vmem:[%s5702_s4 + $0x8] sm:$0xff]  ;;  %v62_v9 = vld [vmem:[%s5702_s4] sm:$0xff]  ;;  %v3185_v12 = vmov 14   ;;  %v3186_v14 = vmov 21   ;;  %v3187_v16 = vmov 42  }
   0x2   :  { %5872 = sst [smem:[#allocation103_spill]] %s5701_s3  ;;  %3061 = vset.pattern.permute.xlu0 %v3183_v8  ;;  %3062 = vset.pattern.permute.xlu1 %v3183_v8  ;;  %v3385_v11 = vld [vmem:[%s5703_s9] sm:$0xff]  ;;  %v3188_v17 = vmov 3   ;;  %v3189_v18 = vmov 1   ;;  %v3190_v19 = vmov 2   ;;  %v3191_v20 = vmov 8  }
   0x3   :  { %s5873_s26 = sld [smem:[#allocation102_spill]]  ;;  %71 = vperm.xlu0 %3061, %v63_v6   ;;  %v277_v13 = vld [vmem:[%s5704_s6] sm:$0xff]  ;;  %v3192_v21 = vmov 15   ;;  %v3193_v22 = vmov 22   ;;  %v3194_v23 = vmov 28   ;;  %v3195_v24 = vmov 43  }
   0x4   :  { %s5874_s20 = sld [smem:[#allocation103_spill]]  ;;  %280 = vperm.xlu1 %3062, %v277_v13   ;;  %v3396_v15 = vld [vmem:[%s5705_s7] sm:$0xff]  ;;  %v3196_v25 = vmov 35   ;;  %v3197_v26 = vmov 29   ;;  %v3198_v27 = vmov 9   ;;  %v3199_v28 = vmov 36  }
   0x5   :  { %v3200_v29 = vmov 16   ;;  %v3201_v30 = vmov 30   ;;  %v3202_v31 = vmov 23   ;;  %v3203_v32 = vmov 37   ;;  %s3233_s9 = smov 16   ;;  %s3237_s4 = smov 2  }
   0x6   :  { %v3204_v33 = vmov 44   ;;  %v3205_v34 = vmov 31   ;;  %v3206_v35 = vmov 38   ;;  %v3207_v36 = vmov 10   ;;  %s3238_s0 = smov 126   ;;  %s3239_s30 = smov 125  }
   0x7   :  { %66 = vperm.xlu0 %3061, %v62_v9   ;;  %v3208_v37 = vmov 32   ;;  %v3209_v38 = vmov 17   ;;  %v3210_v39 = vmov 39   ;;  %v3211_v40 = vmov 24   ;;  %s3240_s6 = smov 48   ;;  %s3241_s7 = smov 32  }
   0x8   :  { %544 = vperm.xlu1 %3062, %v3396_v15   ;;  %v3212_v42 = vmov 33   ;;  %v3213_v43 = vmov 45   ;;  %v3214_v45 = vmov 4   ;;  %vm283_vm1 = vcmask 130048  }
   0x9   :  { %v3337_v0 = vld [vmem:[%s5873_s26 + $0x8] sm:$0xff]  ;;  %v3342_v1 = vld [vmem:[%s5873_s26 + $0x18] sm:$0xff]  ;;  %v3347_v2 = vld [vmem:[%s5873_s26] sm:$0xff] }
   0xa   :  { %111 = vmatprep.subr.mxu0 %v3337_v0  ;;  %188 = vmatprep.subr.mxu1 %v3342_v1  ;;  %v3356_v4 = vld [vmem:[%s5873_s26 + $0x10] sm:$0xff]  ;;  %v60_v5 = vld [vmem:[%s5874_s20] sm:$0xff]  ;;  %v61_v7 = vld [vmem:[%s5874_s20 + $0x8] sm:$0xff]  ;;  %s3235_s20 = smov 112  }
   0xb   :  { %112 = vmatpush1.msra.mxu0 %v3347_v2  ;;  %189 = vmatpush1.msra.mxu1 %v3356_v4 }
   0xc   :  { %2973 = vmatmul.mubr.msk.f32.vlgmr.msra.gmra.mxu0 %vm74_vm0, %v60_v5  ;;  %2975 = vmatmul.mubr.msk.f32.vlgmr.msra.gmra.mxu1 %vm74_vm0, %v60_v5 }
   0xd   :  { %151 = vmatprep.mubr.f32.mxu0 %v5720_v3  ;;  %228 = vmatprep.mubr.f32.mxu1 %v5720_v3 }
   0xe   :  { %3068 = vset.pattern.permute.xlu0 %v3184_v10  ;;  %3063 = vset.pattern.permute.xlu1 %v3188_v17 }
   0xf   :  { %958 = vperm.xlu0 %3068, %v3385_v11   ;;  %556 = vperm.xlu1 %3063, %v3396_v15  }
  0x10   :  { %2974 = vmatmul.mubr.msk.f32.gmra.mxu0 %vm74_vm0, %v61_v7  ;;  %2976 = vmatmul.mubr.msk.f32.gmra.mxu1 %vm74_vm0, %v61_v7 }
  0x11   :  { %351 = vmatprep.mubr.f32.mxu0 %v5720_v3  ;;  %422 = vmatprep.mubr.f32.mxu1 %v5720_v3 }
  0x13   :  { %3069 = vset.pattern.permute.xlu0 %v3185_v12  ;;  %3064 = vset.pattern.permute.xlu1 %v3184_v10  ;;  %v3215_v10 = vmov 11  }
  0x14   :  { %986 = vperm.xlu0 %3069, %v3385_v11   ;;  %676 = vperm.xlu1 %3064, %v3396_v15  }
  0x18   :  { %3070 = vset.pattern.permute.xlu0 %v3186_v14  ;;  %3065 = vset.pattern.permute.xlu1 %v3190_v19  ;;  %v3216_v14 = vmov 18  }
  0x19   :  { %998 = vperm.xlu0 %3070, %v3385_v11   ;;  %744 = vperm.xlu1 %3065, %v3396_v15  }
  0x1d   :  { %3073 = vset.pattern.permute.xlu0 %v3187_v16  ;;  %3066 = vset.pattern.permute.xlu1 %v3191_v20  ;;  %v3217_v16 = vmov 25  }
  0x1e   :  { %1130 = vperm.xlu0 %3073, %v3385_v11   ;;  %784 = vperm.xlu1 %3066, %v3396_v15  }
  0x22   :  { %3074 = vset.pattern.permute.xlu0 %v3189_v18  ;;  %3067 = vset.pattern.permute.xlu1 %v3183_v8 }
  0x23   :  { %636 = vperm.xlu0 %3074, %v3396_v15   ;;  %906 = vperm.xlu1 %3067, %v3385_v11  }
  0x27   :  { %1198 = vperm.xlu0 %3074, %v3385_v11   ;;  %3071 = vset.pattern.permute.xlu1 %v3194_v23 }
  0x28   :  { %1026 = vperm.xlu1 %3071, %v3385_v11  }
  0x2b   :  { %3075 = vset.pattern.permute.xlu0 %v3191_v20 }
  0x2c   :  { %1226 = vperm.xlu0 %3075, %v3385_v11   ;;  %3072 = vset.pattern.permute.xlu1 %v3196_v25 }
  0x2d   :  { %1078 = vperm.xlu1 %3072, %v3385_v11  }
  0x30   :  { %3076 = vset.pattern.permute.xlu0 %v3192_v21 }
  0x31   :  { %1254 = vperm.xlu0 %3076, %v3385_v11   ;;  %3078 = vset.pattern.permute.xlu1 %v3197_v26 }
  0x32   :  { %1294 = vperm.xlu1 %3078, %v3385_v11  }
  0x35   :  { %3077 = vset.pattern.permute.xlu0 %v3193_v22  ;;  %v3218_v22 = vmov 46  }
  0x36   :  { %1266 = vperm.xlu0 %3077, %v3385_v11   ;;  %3079 = vset.pattern.permute.xlu1 %v3199_v28 }
  0x37   :  { %1322 = vperm.xlu1 %3079, %v3385_v11  }
  0x3a   :  { %3080 = vset.pattern.permute.xlu0 %v3195_v24 }
  0x3b   :  { %1350 = vperm.xlu0 %3080, %v3385_v11   ;;  %3085 = vset.pattern.permute.xlu1 %v3201_v30 }
  0x3c   :  { %1490 = vperm.xlu1 %3085, %v3385_v11  }
  0x3f   :  { %3081 = vset.pattern.permute.xlu0 %v3190_v19 }
  0x40   :  { %1394 = vperm.xlu0 %3081, %v3385_v11   ;;  %3086 = vset.pattern.permute.xlu1 %v3203_v32 }
  0x41   :  { %1518 = vperm.xlu1 %3086, %v3385_v11  }
  0x44   :  { %3082 = vset.pattern.permute.xlu0 %v3198_v27 }
  0x45   :  { %1422 = vperm.xlu0 %3082, %v3385_v11   ;;  %3092 = vset.pattern.permute.xlu1 %v3205_v34 }
  0x46   :  { %1670 = vperm.xlu1 %3092, %v3385_v11  }
  0x49   :  { %3083 = vset.pattern.permute.xlu0 %v3200_v29 }
  0x4a   :  { %1450 = vperm.xlu0 %3083, %v3385_v11   ;;  %3093 = vset.pattern.permute.xlu1 %v3206_v35 }
  0x4b   :  { %1698 = vperm.xlu1 %3093, %v3385_v11  }
  0x4e   :  { %3084 = vset.pattern.permute.xlu0 %v3202_v31 }
  0x4f   :  { %1462 = vperm.xlu0 %3084, %v3385_v11   ;;  %3099 = vset.pattern.permute.xlu1 %v3208_v37 }
  0x50   :  { %1866 = vperm.xlu1 %3099, %v3385_v11  }
  0x53   :  { %3087 = vset.pattern.permute.xlu0 %v3204_v33 }
  0x54   :  { %1546 = vperm.xlu0 %3087, %v3385_v11   ;;  %3100 = vset.pattern.permute.xlu1 %v3210_v39 }
  0x55   :  { %1894 = vperm.xlu1 %3100, %v3385_v11  }
  0x58   :  { %3088 = vset.pattern.permute.xlu0 %v3188_v17 }
  0x59   :  { %1574 = vperm.xlu0 %3088, %v3385_v11   ;;  %3106 = vset.pattern.permute.xlu1 %v3212_v42 }
  0x5a   :  { %2086 = vperm.xlu1 %3106, %v3385_v11  }
  0x5d   :  { %3089 = vset.pattern.permute.xlu0 %v3207_v36 }
  0x5e   :  { %1602 = vperm.xlu0 %3089, %v3385_v11  }
  0x62   :  { %3090 = vset.pattern.permute.xlu0 %v3209_v38 }
  0x63   :  { %1630 = vperm.xlu0 %3090, %v3385_v11  }
  0x67   :  { %3091 = vset.pattern.permute.xlu0 %v3211_v40  ;;  %v3219_v40 = vmov 5  }
  0x68   :  { %1642 = vperm.xlu0 %3091, %v3385_v11  }
  0x6c   :  { %3094 = vset.pattern.permute.xlu0 %v3213_v43 }
  0x6d   :  { %1726 = vperm.xlu0 %3094, %v3385_v11  }
  0x71   :  { %3095 = vset.pattern.permute.xlu0 %v3214_v45 }
  0x72   :  { %648 = vperm.xlu0 %3095, %v3396_v15  }
  0x76   :  { %1770 = vperm.xlu0 %3095, %v3385_v11  }
  0x7a   :  { %3096 = vset.pattern.permute.xlu0 %v3215_v10 }
  0x7b   :  { %1798 = vperm.xlu0 %3096, %v3385_v11  }
  0x7e   :  { %v72_v41 = vpop.permute.xlu0 %71 }
  0x7f   :  { %3097 = vset.pattern.permute.xlu0 %v3216_v14 }
  0x80   :  { %1826 = vperm.xlu0 %3097, %v3385_v11  }
  0x82   :  { %v67_v44 = vpop.permute.xlu0 %66 }
  0x84   :  { %3098 = vset.pattern.permute.xlu0 %v3217_v16 }
  0x85   :  { %1838 = vperm.xlu0 %3098, %v3385_v11  }
  0x89   :  { %3101 = vset.pattern.permute.xlu0 %v3218_v22 }
  0x8a   :  { %1922 = vperm.xlu0 %3101, %v3385_v11  }
  0x8e   :  { %3102 = vset.pattern.permute.xlu0 %v3219_v40 }
  0x8f   :  { %756 = vperm.xlu0 %3102, %v3396_v15  }
  0x93   :  { %1990 = vperm.xlu0 %3102, %v3385_v11  }
  0xcc   :  { %v147_v46 = vpop.f32.mrf.mxu0  ;;  %v224_v47 = vpop.f32.mrf.mxu1 }
  0xcd   :  { %v3434_v48 = vadd.f32 %v147_v46, %v67_v44  ;;  %v3436_v49 = vadd.f32 %v224_v47, %v67_v44 }
  0xce   :  { %v149_v50 = vpop.f32.mrf.mxu0  ;;  %v226_v51 = vpop.f32.mrf.mxu1 }
  0xcf   :  { %v244_v52 = vmul.f32 0.70710677, %v3434_v48  ;;  %v246_v53 = vmul.f32 0.70710677, %v3436_v49  ;;  %v150_v54 = vadd.f32 %v149_v50, %v67_v44  ;;  %v227_v55 = vadd.f32 %v226_v51, %v67_v44 }
  0xd0   :  { %v153_v56 = vpop.f32.mrf.mxu0  ;;  %v230_v57 = vpop.f32.mrf.mxu1  ;;  %v237_v45 = vmul.f32 0.5, %v3436_v49  ;;  %v3220_v49 = vmov 12  }
  0xd1   :  { %v154_v58 = vadd.f32 %v153_v56, %v72_v41  ;;  %v231_v59 = vadd.f32 %v230_v57, %v72_v41  ;;  %3118 = verf.f32 %v244_v52  ;;  %v245_v60 = vmul.f32 0.70710677, %v150_v54  ;;  %v276_v52 = vld [vmem:[%s5706_s5] sm:$0xff]  ;;  %3103 = vset.pattern.permute.xlu0 %v3220_v49  ;;  %s3232_s5 = smov 1  }
  0xd2   :  { %v155_v61 = vpop.f32.mrf.mxu0  ;;  %v232_v62 = vpop.f32.mrf.mxu1  ;;  %3120 = verf.f32 %v246_v53  ;;  %v247_v63 = vmul.f32 0.70710677, %v227_v55  ;;  %v236_v37 = vmul.f32 0.5, %v150_v54  ;;  %v238_v42 = vmul.f32 0.5, %v227_v55  ;;  %2018 = vperm.xlu0 %3103, %v3385_v11  }
  0xd3   :  { %v248_v5 = vmul.f32 0.70710677, %v154_v58  ;;  %3122 = verf.f32 %v245_v60  ;;  %v250_v6 = vmul.f32 0.70710677, %v231_v59  ;;  %v156_v7 = vadd.f32 %v155_v61, %v72_v41 }
  0xd4   :  { %v233_v9 = vadd.f32 %v232_v62, %v72_v41  ;;  %3124 = verf.f32 %v247_v63  ;;  %v239_v25 = vmul.f32 0.5, %v154_v58  ;;  %v241_v38 = vmul.f32 0.5, %v231_v59  ;;  %v3471_v63 = vpop.permute.xlu0 %958 }
  0xd5   :  { %3126 = verf.f32 %v248_v5  ;;  %v249_v12 = vmul.f32 0.70710677, %v156_v7  ;;  %v240_v29 = vmul.f32 0.5, %v156_v7  ;;  %v235_v41 = vmul.f32 0.5, %v3434_v48  ;;  %5875 = vst [vmem:[#allocation2_spill] sm:$0xff] %v3471_v63 }
  0xd6   :  { %3128 = verf.f32 %v250_v6  ;;  %v251_v13 = vmul.f32 0.70710677, %v233_v9  ;;  %v242_v33 = vmul.f32 0.5, %v233_v9  ;;  %v3221_v53 = vmov 19  }
  0xd7   :  { %3130 = verf.f32 %v249_v12  ;;  %3104 = vset.pattern.permute.xlu0 %v3221_v53  ;;  %v3222_v54 = vmov 26   ;;  %v3223_v55 = vmov 47   ;;  %v3224_v56 = vmov 6  }
  0xd8   :  { %3132 = verf.f32 %v251_v13  ;;  %2046 = vperm.xlu0 %3104, %v3385_v11   ;;  %v3225_v57 = vmov 13   ;;  %v3226_v58 = vmov 40   ;;  %v3227_v59 = vmov 20   ;;  %v3473_v5 = vpop.permute.xlu0 %986 }
  0xd9   :  { %3107 = vset.pattern.permute.xlu1 %v3226_v58  ;;  %v3228_v60 = vmov 34   ;;  %v3229_v61 = vmov 27   ;;  %v3231_v62 = vmov 48   ;;  %5876 = vst [vmem:[#allocation3_spill] sm:$0xff] %v3473_v5 }
  0xda   :  { %2114 = vperm.xlu1 %3107, %v3385_v11  }
  0xdc   :  { %3105 = vset.pattern.permute.xlu0 %v3222_v54  ;;  %v3475_v6 = vpop.permute.xlu0 %998 }
  0xdd   :  { %2058 = vperm.xlu0 %3105, %v3385_v11   ;;  %5877 = vst [vmem:[#allocation4_spill] sm:$0xff] %v3475_v6 }
  0xde   :  { %v3119_v17 = vpop.eup %3118  ;;  %3113 = vset.pattern.permute.xlu1 %v3228_v60 }
  0xdf   :  { %v3121_v18 = vpop.eup %3120  ;;  %v260_v32 = vadd.f32 1.0, %v3119_v17  ;;  %2306 = vperm.xlu1 %3113, %v3385_v11  }
  0xe0   :  { %v3123_v19 = vpop.eup %3122  ;;  %v262_v36 = vadd.f32 1.0, %v3121_v18  ;;  %v3477_v7 = vpop.permute.xlu0 %1130 }
  0xe1   :  { %v3125_v20 = vpop.eup %3124  ;;  %v261_v31 = vadd.f32 1.0, %v3123_v19  ;;  %v268_v50 = vmul.f32 %v260_v32, %v235_v41  ;;  %3108 = vset.pattern.permute.xlu0 %v3223_v55  ;;  %5878 = vst [vmem:[#allocation5_spill] sm:$0xff] %v3477_v7  ;;  %v281_v19 = vpop.permute.xlu1 %280 }
  0xe2   :  { %v3127_v21 = vpop.eup %3126  ;;  %v263_v35 = vadd.f32 1.0, %v3125_v20  ;;  %v270_v48 = vmul.f32 %v262_v36, %v237_v45  ;;  %2142 = vperm.xlu0 %3108, %v3385_v11  }
  0xe3   :  { %v3129_v23 = vpop.eup %3128  ;;  %v264_v26 = vadd.f32 1.0, %v3127_v21  ;;  %v269_v47 = vmul.f32 %v261_v31, %v236_v37 }
  0xe4   :  { %v3131_v24 = vpop.eup %3130  ;;  %v266_v28 = vadd.f32 1.0, %v3129_v23  ;;  %v271_v51 = vmul.f32 %v263_v35, %v238_v42  ;;  %v3479_v9 = vpop.permute.xlu0 %636 }
  0xe5   :  { %v3133_v27 = vpop.eup %3132  ;;  %v265_v30 = vadd.f32 1.0, %v3131_v24  ;;  %v272_v43 = vmul.f32 %v264_v26, %v239_v25 }
  0xe6   :  { %v267_v34 = vadd.f32 1.0, %v3133_v27  ;;  %v274_v46 = vmul.f32 %v266_v28, %v241_v38  ;;  %3109 = vset.pattern.permute.xlu0 %v3224_v56 }
  0xe7   :  { %v273_v39 = vmul.f32 %v265_v30, %v240_v29  ;;  %608 = vperm.xlu0 %3109, %v3396_v15   ;;  %v3230_v15 = vmov 41  }
  0xe8   :  { %v275_v44 = vmul.f32 %v267_v34, %v242_v33  ;;  %3114 = vset.pattern.permute.xlu1 %v3230_v15  ;;  %v3481_v10 = vpop.permute.xlu0 %1198  ;;  %v820_v15 = vld [vmem:[%s5708_s10] sm:$0xff] }
  0xe9   :  { %315 = vmatprep.subr.mxu0 %v273_v39  ;;  %2334 = vperm.xlu1 %3114, %v3385_v11   ;;  %5879 = vst [vmem:[#allocation6_spill] sm:$0xff] %v3481_v10 }
  0xea   :  { %386 = vmatprep.subr.mxu1 %v275_v44  ;;  %316 = vmatpush1.msra.mxu0 %v272_v43  ;;  %v3513_v44 = vpop.permute.xlu1 %544 }
  0xeb   :  { %387 = vmatpush1.msra.mxu1 %v274_v46  ;;  %317 = vmatprep.subr.mxu0 %v269_v47 }
  0xec   :  { %388 = vmatprep.subr.mxu1 %v271_v51  ;;  %318 = vmatpush1.msra.mxu0 %v268_v50  ;;  %v3483_v12 = vpop.permute.xlu0 %1226 }
  0xed   :  { %389 = vmatpush1.msra.mxu1 %v270_v48  ;;  %2977 = vmatmul.mubr.msk.f32.vlgmr.msra.gmra.mxu0 %vm283_vm1, %v276_v52  ;;  %5880 = vst [vmem:[#allocation7_spill] sm:$0xff] %v3483_v12 }
  0xee   :  { %2978 = vmatmul.mubr.msk.f32.vlgmr.msra.gmra.mxu1 %vm283_vm1, %v276_v52  ;;  %2471 = vmatprep.mubr.f32.mxu0 %v5720_v3  ;;  %v3525_v49 = vpop.permute.xlu1 %556 }
  0xef   :  { %2542 = vmatprep.mubr.f32.mxu1 %v5720_v3  ;;  %2210 = vperm.xlu0 %3109, %v3385_v11  }
  0xf0   :  { %3117 = vset.pattern.permute.xlu1 %v3183_v8  ;;  %v3485_v13 = vpop.permute.xlu0 %1254 }
  0xf1   :  { %5881 = vst [vmem:[#allocation8_spill] sm:$0xff] %v3485_v13 }
  0xf2   :  { %v3539_v56 = vpop.permute.xlu1 %676 }
  0xf3   :  { %3110 = vset.pattern.permute.xlu0 %v3225_v57  ;;  %v454_v57 = vld [vmem:[%s5707_s8] sm:$0xff] }
  0xf4   :  { %2238 = vperm.xlu0 %3110, %v3385_v11  }
  0xf8   :  { %3111 = vset.pattern.permute.xlu0 %v3227_v59  ;;  %v3548_v59 = vpop.permute.xlu1 %744 }
  0xf9   :  { %2266 = vperm.xlu0 %3111, %v3385_v11  }
  0xfd   :  { %3112 = vset.pattern.permute.xlu0 %v3229_v61  ;;  %v3560_v61 = vpop.permute.xlu1 %784 }
  0xfe   :  { %2278 = vperm.xlu0 %3112, %v3385_v11  }
 0x102   :  { %3115 = vset.pattern.permute.xlu0 %v3231_v62 }
 0x103   :  { %2362 = vperm.xlu0 %3115, %v3385_v11   ;;  %v3487_v11 = vpop.permute.xlu0 %1266 }
 0x104   :  { %5882 = vst [vmem:[#allocation9_spill] sm:$0xff] %v3487_v11 }
 0x107   :  { %3116 = vset.pattern.permute.xlu0 %v3183_v8  ;;  %v3489_v14 = vpop.permute.xlu0 %1350 }
 0x108   :  { %5883 = vst [vmem:[#allocation10_spill] sm:$0xff] %v3489_v14 }
 0x10b   :  { %v3491_v8 = vpop.permute.xlu0 %1394 }
 0x10c   :  { %5884 = vst [vmem:[#allocation11_spill] sm:$0xff] %v3491_v8 }
 0x10f   :  { %v3493_v16 = vpop.permute.xlu0 %1422 }
 0x110   :  { %5885 = vst [vmem:[#allocation12_spill] sm:$0xff] %v3493_v16 }
 0x113   :  { %v3495_v17 = vpop.permute.xlu0 %1450 }
 0x114   :  { %5886 = vst [vmem:[#allocation13_spill] sm:$0xff] %v3495_v17 }
 0x117   :  { %v3497_v18 = vpop.permute.xlu0 %1462 }
 0x118   :  { %5887 = vst [vmem:[#allocation14_spill] sm:$0xff] %v3497_v18 }
 0x11b   :  { %v3500_v28 = vpop.permute.xlu0 %1546 }
 0x11c   :  { %5888 = vst [vmem:[#allocation15_spill] sm:$0xff] %v3500_v28 }
 0x11f   :  { %v3505_v37 = vpop.permute.xlu0 %1574 }
 0x120   :  { %5889 = vst [vmem:[#allocation16_spill] sm:$0xff] %v3505_v37 }
 0x1ad   :  { %v353_v20 = vpop.f32.mrf.mxu0 }
 0x1ae   :  { %v354_v21 = vadd.f32 %v353_v20, %v281_v19  ;;  %v424_v22 = vpop.f32.mrf.mxu1 }
 0x1af   :  { %v425_v23 = vadd.f32 %v424_v22, %v281_v19  ;;  %v355_v24 = vpop.f32.mrf.mxu0 }
 0x1b0   :  { %v429_v25 = vadd.f32 %v354_v21, %v3347_v2  ;;  %v356_v26 = vadd.f32 %v355_v24, %v281_v19  ;;  %v426_v27 = vpop.f32.mrf.mxu1  ;;  %v3507_v2 = vpop.permute.xlu0 %1602 }
 0x1b1   :  { %v431_v29 = vadd.f32 %v425_v23, %v3356_v4  ;;  %v427_v30 = vadd.f32 %v426_v27, %v281_v19  ;;  %5890 = vst [vmem:[#allocation17_spill] sm:$0xff] %v3507_v2  ;;  %v3569_v19 = vpop.permute.xlu1 %906 }
 0x1b2   :  { %v437_v31 = vmul.f32 0.70710677, %v429_v25  ;;  %v430_v32 = vadd.f32 %v356_v26, %v3337_v0  ;;  %v433_v4 = vmul.f32 0.5, %v429_v25  ;;  %5896 = vst [vmem:[#allocation23_spill] sm:$0xff] %v3569_v19 }
 0x1b3   :  { %v439_v33 = vmul.f32 0.70710677, %v431_v29  ;;  %v432_v34 = vadd.f32 %v427_v30, %v3342_v1  ;;  %v435_v42 = vmul.f32 0.5, %v431_v29 }
 0x1b4   :  { %3134 = verf.f32 %v437_v31  ;;  %v438_v35 = vmul.f32 0.70710677, %v430_v32  ;;  %v3509_v43 = vpop.permute.xlu0 %1630  ;;  %v434_v50 = vmul.f32 0.5, %v430_v32 }
 0x1b5   :  { %3136 = verf.f32 %v439_v33  ;;  %v440_v36 = vmul.f32 0.70710677, %v432_v34  ;;  %5891 = vst [vmem:[#allocation18_spill] sm:$0xff] %v3509_v43  ;;  %v436_v53 = vmul.f32 0.5, %v432_v34  ;;  %v3581_v21 = vpop.permute.xlu1 %1026 }
 0x1b6   :  { %3138 = verf.f32 %v438_v35  ;;  %5898 = vst [vmem:[#allocation25_spill] sm:$0xff] %v3581_v21 }
 0x1b7   :  { %3140 = verf.f32 %v440_v36 }
 0x1b8   :  { %v3523_v48 = vpop.permute.xlu0 %1642 }
 0x1b9   :  { %5892 = vst [vmem:[#allocation19_spill] sm:$0xff] %v3523_v48  ;;  %v3585_v23 = vpop.permute.xlu1 %1078 }
 0x1ba   :  { %5900 = vst [vmem:[#allocation27_spill] sm:$0xff] %v3585_v23  ;;  %v2981_v23 = vld [vmem:[%s5710_s2 + $0x4] ss:$8 sm:$0xf] }
 0x1bc   :  { %v3535_v55 = vpop.permute.xlu0 %1726 }
 0x1bd   :  { %5893 = vst [vmem:[#allocation20_spill] sm:$0xff] %v3535_v55  ;;  %v3589_v25 = vpop.permute.xlu1 %1294 }
 0x1be   :  { %5902 = vst [vmem:[#allocation29_spill] sm:$0xff] %v3589_v25 }
 0x1c0   :  { %v3546_v58 = vpop.permute.xlu0 %648 }
 0x1c1   :  { %v3135_v38 = vpop.eup %3134  ;;  %v3593_v27 = vpop.permute.xlu1 %1322 }
 0x1c2   :  { %v3137_v39 = vpop.eup %3136  ;;  %v445_v40 = vadd.f32 1.0, %v3135_v38  ;;  %5903 = vst [vmem:[#allocation30_spill] sm:$0xff] %v3593_v27 }
 0x1c3   :  { %v3139_v41 = vpop.eup %3138  ;;  %v447_v0 = vadd.f32 1.0, %v3137_v39 }
 0x1c4   :  { %v3511_v1 = vmul.f32 %v445_v40, %v433_v4  ;;  %v446_v46 = vadd.f32 1.0, %v3139_v41  ;;  %v3141_v47 = vpop.eup %3140  ;;  %v3554_v60 = vpop.permute.xlu0 %1770 }
 0x1c5   :  { %v3515_v45 = vmul.f32 %v447_v0, %v435_v42  ;;  %v448_v52 = vadd.f32 1.0, %v3141_v47  ;;  %5894 = vst [vmem:[#allocation21_spill] sm:$0xff] %v3554_v60  ;;  %v3599_v31 = vpop.permute.xlu1 %1490 }
 0x1c6   :  { %460 = vrot.lane.b32.xlu1 %v3511_v1, %s3232_s5  ;;  %v3521_v51 = vmul.f32 %v446_v46, %v434_v50  ;;  %5906 = vst [vmem:[#allocation33_spill] sm:$0xff] %v3599_v31  ;;  %v3781_v25 = vmul.f32 %v3546_v58, %v3511_v1 }
 0x1c7   :  { %623 = vrot.lane.b32.xlu0 %v3515_v45, %s3233_s9  ;;  %v3531_v54 = vmul.f32 %v448_v52, %v436_v53  ;;  %v468_v53 = vlaneseq }
 0x1c8   :  { %v3565_v62 = vpop.permute.xlu0 %1798 }
 0x1c9   :  { %5895 = vst [vmem:[#allocation22_spill] sm:$0xff] %v3565_v62  ;;  %v3603_v33 = vpop.permute.xlu1 %1518 }
 0x1ca   :  { %464 = vrot.lane.b32.xlu1 %v3515_v45, %s3232_s5  ;;  %5908 = vst [vmem:[#allocation35_spill] sm:$0xff] %v3603_v33 }
 0x1cb   :  { %462 = vrot.lane.b32.xlu0 %v3521_v51, %s3232_s5 }
 0x1cc   :  { %v3575_v20 = vpop.permute.xlu0 %1826 }
 0x1cd   :  { %5897 = vst [vmem:[#allocation24_spill] sm:$0xff] %v3575_v20  ;;  %v3607_v35 = vpop.permute.xlu1 %1670 }
 0x1ce   :  { %687 = vrot.lane.b32.xlu1 %v3511_v1, %s3234_s18  ;;  %5910 = vst [vmem:[#allocation37_spill] sm:$0xff] %v3607_v35  ;;  %v2980_v35 = vld [vmem:[%s5710_s2 + $0x2] ss:$8 sm:$0xf] }
 0x1cf   :  { %466 = vrot.lane.b32.xlu0 %v3531_v54, %s3232_s5 }
 0x1d0   :  { %v3583_v22 = vpop.permute.xlu0 %1838 }
 0x1d1   :  { %5899 = vst [vmem:[#allocation26_spill] sm:$0xff] %v3583_v22  ;;  %v3611_v38 = vpop.permute.xlu1 %1698 }
 0x1d2   :  { %691 = vrot.lane.b32.xlu1 %v3515_v45, %s3234_s18  ;;  %5912 = vst [vmem:[#allocation39_spill] sm:$0xff] %v3611_v38 }
 0x1d3   :  { %457 = vperm.xlu0 %3116, %v454_v57  }
 0x1d4   :  { %v3587_v24 = vpop.permute.xlu0 %1922 }
 0x1d5   :  { %5901 = vst [vmem:[#allocation28_spill] sm:$0xff] %v3587_v24  ;;  %v3615_v4 = vpop.permute.xlu1 %1866 }
 0x1d6   :  { %619 = vrot.lane.b32.xlu1 %v3511_v1, %s3233_s9  ;;  %5913 = vst [vmem:[#allocation40_spill] sm:$0xff] %v3615_v4 }
 0x1d7   :  { %689 = vrot.lane.b32.xlu0 %v3521_v51, %s3234_s18 }
 0x1d8   :  { %v3591_v26 = vpop.permute.xlu0 %756 }
 0x1d9   :  { %v3619_v41 = vpop.permute.xlu1 %1894 }
 0x1da   :  { %659 = vrot.lane.b32.xlu1 %v3511_v1, %s3235_s20  ;;  %5915 = vst [vmem:[#allocation42_spill] sm:$0xff] %v3619_v41 }
 0x1db   :  { %693 = vrot.lane.b32.xlu0 %v3531_v54, %s3234_s18 }
 0x1dc   :  { %v3595_v29 = vpop.permute.xlu0 %1990 }
 0x1dd   :  { %5904 = vst [vmem:[#allocation31_spill] sm:$0xff] %v3595_v29  ;;  %v3623_v0 = vpop.permute.xlu1 %2086 }
 0x1de   :  { %663 = vrot.lane.b32.xlu1 %v3515_v45, %s3235_s20  ;;  %5917 = vst [vmem:[#allocation44_spill] sm:$0xff] %v3623_v0 }
 0x1df   :  { %823 = vperm.xlu0 %3116, %v820_v15   ;;  %v479_v15 = vshrl.u32 %v468_v53, 7 }
 0x1e0   :  { %v3597_v30 = vpop.permute.xlu0 %2018 }
 0x1e1   :  { %5905 = vst [vmem:[#allocation32_spill] sm:$0xff] %v3597_v30  ;;  %v3627_v47 = vpop.permute.xlu1 %2114  ;;  %v3665_v30 = vsub.s32 2, %v479_v15 }
 0x1e2   :  { %621 = vrot.lane.b32.xlu1 %v3521_v51, %s3233_s9  ;;  %5919 = vst [vmem:[#allocation46_spill] sm:$0xff] %v3627_v47 }
 0x1e3   :  { %661 = vrot.lane.b32.xlu0 %v3521_v51, %s3235_s20  ;;  %v3784_v11 = vrot.slane %v2980_v35, %v3665_v30 }
 0x1e4   :  { %v3601_v32 = vpop.permute.xlu0 %2046 }
 0x1e5   :  { %5907 = vst [vmem:[#allocation34_spill] sm:$0xff] %v3601_v32  ;;  %v3631_v52 = vpop.permute.xlu1 %2306  ;;  %5934 = vst [vmem:[#allocation61_spill] sm:$0xff] %v3784_v11 }
 0x1e6   :  { %625 = vrot.lane.b32.xlu1 %v3531_v54, %s3233_s9  ;;  %5921 = vst [vmem:[#allocation48_spill] sm:$0xff] %v3631_v52 }
 0x1e7   :  { %665 = vrot.lane.b32.xlu0 %v3531_v54, %s3235_s20 }
 0x1e8   :  { %v3605_v34 = vpop.permute.xlu0 %2058 }
 0x1e9   :  { %5909 = vst [vmem:[#allocation36_spill] sm:$0xff] %v3605_v34  ;;  %v3635_v3 = vpop.permute.xlu1 %2334 }
 0x1ea   :  { %5923 = vst [vmem:[#allocation50_spill] sm:$0xff] %v3635_v3 }
 0x1ec   :  { %v3609_v36 = vpop.permute.xlu0 %2142 }
 0x1ed   :  { %5911 = vst [vmem:[#allocation38_spill] sm:$0xff] %v3609_v36  ;;  %v3639_v36 = vsub.s32 1, %v479_v15 }
 0x1ef   :  { %v3774_v48 = vrot.slane %v2980_v35, %v3639_v36 }
 0x1f0   :  { %v3613_v39 = vpop.permute.xlu0 %608 }
 0x1f4   :  { %v3617_v40 = vpop.permute.xlu0 %2210 }
 0x1f5   :  { %5914 = vst [vmem:[#allocation41_spill] sm:$0xff] %v3617_v40  ;;  %v3637_v40 = vand.u32 127, %v468_v53 }
 0x1f7   :  { %vm470_vm2 = vcmp.lt.s32.totalorder %v3637_v40, 1  ;;  %vm695_vm3 = vcmp.lt.s32.totalorder %v3637_v40, 127  ;;  %vm510_vm4 = vcmp.lt.s32.totalorder %v3637_v40, 16  ;;  %vm575_vm5 = vcmp.lt.s32.totalorder %v3637_v40, 112 }
 0x1f8   :  { %v3621_v42 = vpop.permute.xlu0 %2238  ;;  %vm834_vm6 = vcmp.lt.s32.totalorder %v3637_v40, 3  ;;  %vm1149_vm7 = vcmp.lt.s32.totalorder %v3637_v40, 2  ;;  %vm1941_vm8 = vcmp.lt.s32.totalorder %v3637_v40, 126  ;;  %vm873_vm9 = vcmp.lt.s32.totalorder %v3637_v40, 48 }
 0x1f9   :  { %5916 = vst [vmem:[#allocation43_spill] sm:$0xff] %v3621_v42  ;;  %vm925_vm10 = vcmp.lt.s32.totalorder %v3637_v40, 32  ;;  %vm2161_vm11 = vcmp.lt.s32.totalorder %v3637_v40, 125  ;;  %vm1045_vm12 = vcmp.lt.s32.totalorder %v3637_v40, 96  ;;  %vm1097_vm13 = vcmp.lt.s32.totalorder %v3637_v40, 80 }
 0x1fc   :  { %v3625_v46 = vpop.permute.xlu0 %2266 }
 0x1fd   :  { %5918 = vst [vmem:[#allocation45_spill] sm:$0xff] %v3625_v46  ;;  %v2979_v46 = vld [vmem:[%s5709_s1 + $0x2] ss:$8 sm:$0xf] }
 0x1fe   :  { %v3648_v52 = vrot.slane %v2979_v46, %v3639_v36 }
 0x200   :  { %v3629_v50 = vpop.permute.xlu0 %2278  ;;  %5924 = vst [vmem:[#allocation51_spill] sm:$0xff] %v3648_v52 }
 0x201   :  { %5920 = vst [vmem:[#allocation47_spill] sm:$0xff] %v3629_v50  ;;  %v3652_v50 = vsub.s32 0, %v479_v15 }
 0x203   :  { %v3663_v32 = vrot.slane %v2979_v46, %v3652_v50  ;;  %v3777_v27 = vrot.slane %v2980_v35, %v3652_v50  ;;  %v3822_v63 = vrot.slane %v2981_v23, %v3652_v50 }
 0x204   :  { %v3633_v57 = vpop.permute.xlu0 %2362 }
 0x205   :  { %5922 = vst [vmem:[#allocation49_spill] sm:$0xff] %v3633_v57  ;;  %v3650_v57 = vsub.s32 3, %v479_v15  ;;  %5926 = vst [vmem:[#allocation53_spill] sm:$0xff] %v3663_v32  ;;  %v3680_v15 = vrot.slane %v2979_v46, %v3665_v30 }
 0x206   :  { %5933 = vst [vmem:[#allocation60_spill] sm:$0xff] %v3777_v27  ;;  %5936 = vst [vmem:[#allocation63_spill] sm:$0xff] %v3822_v63 }
 0x207   :  { %v3660_v34 = vrot.slane %v2979_v46, %v3650_v57  ;;  %5927 = vst [vmem:[#allocation54_spill] sm:$0xff] %v3680_v15  ;;  %v3791_v7 = vrot.slane %v2980_v35, %v3650_v57  ;;  %v3810_v35 = vmul.f32 %v3546_v58, %v3531_v54 }
 0x209   :  { %5925 = vst [vmem:[#allocation52_spill] sm:$0xff] %v3660_v34  ;;  %5935 = vst [vmem:[#allocation62_spill] sm:$0xff] %v3791_v7 }
 0x238   :  { %v461_v47 = vpop.permute.xlu1 %460 }
 0x239   :  { %v3644_v42 = vpop.permute.xlu0 %623 }
 0x23c   :  { %v465_v29 = vpop.permute.xlu1 %464 }
 0x23d   :  { %v463_v53 = vpop.permute.xlu0 %462 }
 0x23e   :  { %v473_v3 = vsel %vm470_vm2, %v461_v47, %v463_v53  ;;  %v472_v20 = vsel %vm470_vm2, %v463_v53, %v465_v29 }
 0x23f   :  { %v3657_v0 = vmul.f32 %v3648_v52, %v473_v3 }
 0x241   :  { %v467_v24 = vpop.permute.xlu0 %466  ;;  %504 = vrot.lane.b32.xlu0 %v3657_v0, %s3233_s9 }
 0x242   :  { %v471_v41 = vsel %vm470_vm2, %v465_v29, %v467_v24  ;;  %v474_v3 = vsel %vm470_vm2, %v467_v24, %v461_v47  ;;  %v3689_v24 = vmul.f32 %v3680_v15, %v472_v20  ;;  %v2982_v29 = vld [vmem:[%s5709_s1 + $0x4] ss:$8 sm:$0xf] }
 0x243   :  { %v3674_v4 = vmul.f32 %v3660_v34, %v471_v41  ;;  %v3677_v22 = vmul.f32 %v3663_v32, %v474_v3  ;;  %v688_v41 = vpop.permute.xlu1 %687  ;;  %v3704_v20 = vrot.slane %v2982_v29, %v3652_v50  ;;  %v3711_v62 = vrot.slane %v2982_v29, %v3639_v36 }
 0x244   :  { %v3719_v38 = vrot.slane %v2982_v29, %v3665_v30 }
 0x245   :  { %502 = vrot.lane.b32.xlu1 %v3677_v22, %s3233_s9  ;;  %508 = vrot.lane.b32.xlu0 %v3674_v4, %s3233_s9  ;;  %5928 = vst [vmem:[#allocation55_spill] sm:$0xff] %v3704_v20  ;;  %5929 = vst [vmem:[#allocation56_spill] sm:$0xff] %v3711_v62 }
 0x246   :  { %5930 = vst [vmem:[#allocation57_spill] sm:$0xff] %v3719_v38 }
 0x247   :  { %v692_v53 = vpop.permute.xlu1 %691 }
 0x249   :  { %506 = vrot.lane.b32.xlu1 %v3689_v24, %s3233_s9  ;;  %571 = vrot.lane.b32.xlu0 %v3689_v24, %s3235_s20 }
 0x24d   :  { %567 = vrot.lane.b32.xlu1 %v3677_v22, %s3235_s20 }
 0x24e   :  { %v3700_v46 = vpop.permute.xlu0 %457 }
 0x251   :  { %569 = vrot.lane.b32.xlu1 %v3657_v0, %s3235_s20 }
 0x252   :  { %v690_v47 = vpop.permute.xlu0 %689 }
 0x253   :  { %v698_v3 = vsel %vm695_vm3, %v688_v41, %v690_v47  ;;  %v697_v60 = vsel %vm695_vm3, %v690_v47, %v692_v53  ;;  %v3731_v47 = vrot.slane %v2982_v29, %v3650_v57 }
 0x254   :  { %v3716_v55 = vmul.f32 %v3704_v20, %v698_v3  ;;  %v3728_v31 = vmul.f32 %v3711_v62, %v697_v60  ;;  %v559_v62 = vmul.f32 %v3525_v49, %v3677_v22 }
 0x255   :  { %573 = vrot.lane.b32.xlu1 %v3674_v4, %s3235_s20  ;;  %5931 = vst [vmem:[#allocation58_spill] sm:$0xff] %v3731_v47 }
 0x256   :  { %v694_v28 = vpop.permute.xlu0 %693  ;;  %727 = vrot.lane.b32.xlu0 %v3716_v55, %s3233_s9 }
 0x257   :  { %v696_v33 = vsel %vm695_vm3, %v692_v53, %v694_v28  ;;  %v699_v3 = vsel %vm695_vm3, %v694_v28, %v688_v41  ;;  %v620_v28 = vpop.permute.xlu1 %619 }
 0x258   :  { %v3736_v17 = vmul.f32 %v3719_v38, %v696_v33  ;;  %v3743_v53 = vmul.f32 %v3731_v47, %v699_v3  ;;  %v3831_v47 = vrot.slane %v2981_v23, %v3665_v30 }
 0x259   :  { %729 = vrot.lane.b32.xlu1 %v3728_v31, %s3233_s9 }
 0x25a   :  { %731 = vrot.lane.b32.xlu0 %v3736_v17, %s3233_s9  ;;  %v3757_v33 = vpop.permute.xlu0 %823  ;;  %5938 = vst [vmem:[#allocation65_spill] sm:$0xff] %v3831_v47 }
 0x25b   :  { %v3755_v60 = vpop.permute.xlu1 %659  ;;  %5932 = vst [vmem:[#allocation59_spill] sm:$0xff] %v3757_v33 }
 0x25d   :  { %733 = vrot.lane.b32.xlu1 %v3743_v53, %s3233_s9 }
 0x25e   :  { %769 = vrot.lane.b32.xlu0 %v3728_v31, %s3235_s20  ;;  %v3761_v29 = vpop.permute.xlu0 %661 }
 0x25f   :  { %v3759_v41 = vpop.permute.xlu1 %663 }
 0x261   :  { %767 = vrot.lane.b32.xlu1 %v3716_v55, %s3235_s20 }
 0x262   :  { %773 = vrot.lane.b32.xlu0 %v3743_v53, %s3235_s20  ;;  %v3763_v16 = vpop.permute.xlu0 %665 }
 0x263   :  { %v622_v3 = vpop.permute.xlu1 %621 }
 0x264   :  { %v628_v6 = vsel %vm510_vm4, %v622_v3, %v3644_v42 }
 0x265   :  { %771 = vrot.lane.b32.xlu1 %v3736_v17, %s3235_s20 }
 0x267   :  { %v626_v8 = vpop.permute.xlu1 %625 }
 0x2b3   :  { %v505_v14 = vpop.permute.xlu0 %504 }
 0x2b7   :  { %v509_v43 = vpop.permute.xlu0 %508  ;;  %v503_v2 = vpop.permute.xlu1 %502 }
 0x2b8   :  { %v513_v37 = vsel %vm510_vm4, %v503_v2, %v505_v14  ;;  %v514_v18 = vsel %vm510_vm4, %v509_v43, %v503_v2  ;;  %v629_v2 = vsel %vm510_vm4, %v620_v28, %v622_v3  ;;  %v633_v3 = vmul.f32 %v628_v6, %v3784_v11 }
 0x2b9   :  { %v538_v13 = vmul.f32 %v3777_v27, %v514_v18  ;;  %v539_v12 = vmul.f32 %v3774_v48, %v513_v37  ;;  %v3802_v18 = vmul.f32 %v3546_v58, %v3521_v51  ;;  %v3806_v37 = vmul.f32 %v3546_v58, %v3515_v45 }
 0x2ba   :  { %v632_v33 = vmul.f32 %v629_v2, %v3774_v48  ;;  %v562_v2 = vmul.f32 %v3525_v49, %v3674_v4  ;;  %v641_v4 = vmul.f32 %v3479_v9, %v633_v3 }
 0x2bb   :  { %v507_v10 = vpop.permute.xlu1 %506  ;;  %v547_v58 = vmul.f32 %v3513_v44, %v538_v13  ;;  %v548_v19 = vmul.f32 %v3513_v44, %v539_v12  ;;  %v561_v13 = vmul.f32 %v3525_v49, %v3689_v24  ;;  %v627_v12 = vsel %vm510_vm4, %v3644_v42, %v626_v8 }
 0x2bc   :  { %v511_v21 = vsel %vm510_vm4, %v507_v10, %v509_v43  ;;  %v512_v5 = vsel %vm510_vm4, %v505_v14, %v507_v10  ;;  %v630_v43 = vsel %vm510_vm4, %v626_v8, %v620_v28  ;;  %v3828_v28 = vrot.slane %v2981_v23, %v3639_v36 }
 0x2bd   :  { %v540_v10 = vmul.f32 %v3784_v11, %v512_v5  ;;  %v541_v14 = vmul.f32 %v3791_v7, %v511_v21  ;;  %v3834_v5 = vrot.slane %v2981_v23, %v3650_v57  ;;  %v560_v21 = vmul.f32 %v3525_v49, %v3657_v0 }
 0x2be   :  { %5937 = vst [vmem:[#allocation64_spill] sm:$0xff] %v3828_v28  ;;  %v631_v6 = vmul.f32 %v630_v43, %v3777_v27  ;;  %v640_v0 = vmul.f32 %v3479_v9, %v632_v33  ;;  %v3853_v24 = vmul.f32 %v3591_v26, %v3728_v31  ;;  %v551_v8 = vadd.f32 %v547_v58, %v3700_v46  ;;  %v572_v43 = vpop.permute.xlu0 %571 }
 0x2bf   :  { %v568_v20 = vpop.permute.xlu1 %567  ;;  %5939 = vst [vmem:[#allocation66_spill] sm:$0xff] %v3834_v5  ;;  %v549_v23 = vmul.f32 %v3513_v44, %v540_v10  ;;  %v550_v38 = vmul.f32 %v3513_v44, %v541_v14  ;;  %v552_v42 = vadd.f32 %v548_v19, %v3700_v46  ;;  %v634_v49 = vmul.f32 %v627_v12, %v3791_v7 }
 0x2c0   :  { %v639_v33 = vmul.f32 %v3479_v9, %v631_v6  ;;  %v668_v31 = vsel %vm575_vm5, %v3761_v29, %v3759_v41  ;;  %v669_v14 = vsel %vm575_vm5, %v3755_v60, %v3761_v29  ;;  %v563_v12 = vadd.f32 %v559_v62, %v551_v8 }
 0x2c1   :  { %v553_v58 = vadd.f32 %v549_v23, %v3700_v46  ;;  %v554_v3 = vadd.f32 %v550_v38, %v3700_v46  ;;  %v564_v6 = vadd.f32 %v560_v21, %v552_v42  ;;  %v672_v52 = vmul.f32 %v668_v31, %v3828_v28 }
 0x2c2   :  { %v670_v29 = vsel %vm575_vm5, %v3763_v16, %v3755_v60  ;;  %v671_v42 = vmul.f32 %v669_v14, %v3822_v63 }
 0x2c3   :  { %v570_v32 = vpop.permute.xlu1 %569 }
 0x2c4   :  { %v577_v22 = vsel %vm575_vm5, %v570_v32, %v572_v43  ;;  %v578_v44 = vsel %vm575_vm5, %v568_v20, %v570_v32  ;;  %v667_v32 = vsel %vm575_vm5, %v3759_v41, %v3763_v16 }
 0x2c5   :  { %v603_v19 = vmul.f32 %v3822_v63, %v578_v44  ;;  %v604_v10 = vmul.f32 %v3828_v28, %v577_v22  ;;  %v673_v31 = vmul.f32 %v667_v32, %v3831_v47 }
 0x2c7   :  { %v611_v44 = vmul.f32 %v3613_v39, %v603_v19  ;;  %v612_v22 = vmul.f32 %v3613_v39, %v604_v10  ;;  %v574_v34 = vpop.permute.xlu1 %573  ;;  %v565_v19 = vadd.f32 %v561_v13, %v553_v58  ;;  %v566_v10 = vadd.f32 %v562_v2, %v554_v3 }
 0x2c8   :  { %v576_v41 = vsel %vm575_vm5, %v572_v43, %v574_v34  ;;  %v579_v38 = vsel %vm575_vm5, %v574_v34, %v568_v20  ;;  %v728_v62 = vpop.permute.xlu0 %727  ;;  %v642_v20 = vmul.f32 %v3479_v9, %v634_v49 }
 0x2c9   :  { %v615_v46 = vadd.f32 %v611_v44, %v563_v12  ;;  %v616_v21 = vadd.f32 %v612_v22, %v564_v6  ;;  %v605_v23 = vmul.f32 %v3831_v47, %v576_v41  ;;  %v606_v8 = vmul.f32 %v3834_v5, %v579_v38 }
 0x2ca   :  { %v680_v12 = vmul.f32 %v3539_v56, %v672_v52  ;;  %v674_v6 = vmul.f32 %v670_v29, %v3834_v5 }
 0x2cb   :  { %v643_v16 = vadd.f32 %v639_v33, %v615_v46  ;;  %v644_v60 = vadd.f32 %v640_v0, %v616_v21  ;;  %v613_v43 = vmul.f32 %v3613_v39, %v605_v23  ;;  %v614_v15 = vmul.f32 %v3613_v39, %v606_v8  ;;  %v730_v34 = vpop.permute.xlu1 %729 }
 0x2cc   :  { %v737_v14 = vsel %vm510_vm4, %v728_v62, %v730_v34  ;;  %v732_v44 = vpop.permute.xlu0 %731  ;;  %v679_v33 = vmul.f32 %v3539_v56, %v671_v42  ;;  %v681_v39 = vmul.f32 %v3539_v56, %v673_v31 }
 0x2cd   :  { %v617_v32 = vadd.f32 %v613_v43, %v565_v19  ;;  %v618_v13 = vadd.f32 %v614_v15, %v566_v10  ;;  %v656_v2 = vadd.f32 %v3802_v18, %v644_v60  ;;  %v740_v0 = vmul.f32 %v737_v14, %v3774_v48 }
 0x2ce   :  { %v736_v9 = vsel %vm510_vm4, %v730_v34, %v732_v44  ;;  %v655_v52 = vadd.f32 %v3781_v25, %v643_v16  ;;  %v682_v15 = vmul.f32 %v3539_v56, %v674_v6  ;;  %v759_v60 = vmul.f32 %v3591_v26, %v3716_v55 }
 0x2cf   :  { %v645_v49 = vadd.f32 %v641_v4, %v617_v32  ;;  %v646_v58 = vadd.f32 %v642_v20, %v618_v13  ;;  %v684_v3 = vadd.f32 %v680_v12, %v656_v2  ;;  %v748_v22 = vmul.f32 %v3548_v59, %v740_v0  ;;  %v734_v29 = vpop.permute.xlu1 %733 }
 0x2d0   :  { %v741_v18 = vmul.f32 %v736_v9, %v3784_v11  ;;  %v735_v41 = vsel %vm510_vm4, %v732_v44, %v734_v29  ;;  %v738_v38 = vsel %vm510_vm4, %v734_v29, %v728_v62  ;;  %v770_v46 = vpop.permute.xlu0 %769  ;;  %v683_v42 = vadd.f32 %v679_v33, %v655_v52 }
 0x2d1   :  { %v752_v21 = vadd.f32 %v748_v22, %v684_v3  ;;  %v657_v25 = vadd.f32 %v3806_v37, %v645_v49  ;;  %v658_v4 = vadd.f32 %v3810_v35, %v646_v58  ;;  %v739_v23 = vmul.f32 %v738_v38, %v3777_v27 }
 0x2d2   :  { %v749_v8 = vmul.f32 %v3548_v59, %v741_v18  ;;  %v742_v56 = vmul.f32 %v735_v41, %v3791_v7  ;;  %v761_v37 = vmul.f32 %v3591_v26, %v3736_v17 }
 0x2d3   :  { %v685_v31 = vadd.f32 %v681_v39, %v657_v25  ;;  %v686_v19 = vadd.f32 %v682_v15, %v658_v4  ;;  %v747_v10 = vmul.f32 %v3548_v59, %v739_v23  ;;  %v768_v16 = vpop.permute.xlu1 %767  ;;  %v764_v62 = vadd.f32 %v3853_v24, %v752_v21 }
 0x2d4   :  { %v750_v35 = vmul.f32 %v3548_v59, %v742_v56  ;;  %v777_v43 = vsel %vm575_vm5, %v768_v16, %v770_v46  ;;  %v774_v34 = vpop.permute.xlu0 %773  ;;  %v762_v24 = vmul.f32 %v3591_v26, %v3743_v53 }
 0x2d5   :  { %v753_v20 = vadd.f32 %v749_v8, %v685_v31  ;;  %v751_v12 = vadd.f32 %v747_v10, %v683_v42  ;;  %v779_v6 = vmul.f32 %v777_v43, %v3822_v63  ;;  %v778_v14 = vsel %vm575_vm5, %v774_v34, %v768_v16 }
 0x2d6   :  { %v754_v55 = vadd.f32 %v750_v35, %v686_v19  ;;  %v782_v44 = vmul.f32 %v778_v14, %v3834_v5  ;;  %v839_v35 = vld [vmem:[%s5709_s1] ss:$8 sm:$0xf] }
 0x2d7   :  { %v763_v17 = vadd.f32 %v759_v60, %v751_v12  ;;  %v787_v59 = vmul.f32 %v3560_v61, %v779_v6  ;;  %v765_v32 = vadd.f32 %v761_v37, %v753_v20  ;;  %v772_v13 = vpop.permute.xlu1 %771  ;;  %v852_v43 = vrot.slane %v839_v35, %v3665_v30 }
 0x2d8   :  { %v766_v2 = vadd.f32 %v762_v24, %v754_v55  ;;  %v790_v0 = vmul.f32 %v3560_v61, %v782_v44  ;;  %v775_v33 = vsel %vm575_vm5, %v772_v13, %v774_v34  ;;  %v776_v39 = vsel %vm575_vm5, %v770_v46, %v772_v13 }
 0x2d9   :  { %v791_v9 = vadd.f32 %v787_v59, %v763_v17  ;;  %v780_v26 = vmul.f32 %v776_v39, %v3828_v28  ;;  %v781_v53 = vmul.f32 %v775_v33, %v3831_v47  ;;  %v844_v6 = vrot.slane %v839_v35, %v3652_v50 }
 0x2da   :  { %v794_v52 = vadd.f32 %v790_v0, %v766_v2  ;;  %v848_v17 = vrot.slane %v839_v35, %v3639_v36  ;;  %v856_v0 = vrot.slane %v839_v35, %v3650_v57 }
 0x2db   :  { %v795_v49 = vadd.f32 %v791_v9, %v3511_v1  ;;  %v788_v58 = vmul.f32 %v3560_v61, %v780_v26  ;;  %v789_v3 = vmul.f32 %v3560_v61, %v781_v53 }
 0x2dc   :  { %v798_v22 = vadd.f32 %v794_v52, %v3531_v54 }
 0x2dd   :  { %v803_v29 = vmul.f32 0.70710677, %v795_v49  ;;  %v792_v15 = vadd.f32 %v788_v58, %v764_v62  ;;  %v793_v18 = vadd.f32 %v789_v3, %v765_v32  ;;  %v799_v4 = vmul.f32 0.5, %v795_v49  ;;  %v2986_v58 = vld [vmem:[%s5709_s1 + $0x1] ss:$8 sm:$0xf] }
 0x2de   :  { %v806_v41 = vmul.f32 0.70710677, %v798_v22  ;;  %v802_v62 = vmul.f32 0.5, %v798_v22 }
 0x2df   :  { %3142 = verf.f32 %v803_v29  ;;  %v796_v38 = vadd.f32 %v792_v15, %v3521_v51  ;;  %v797_v46 = vadd.f32 %v793_v18, %v3515_v45  ;;  %v1168_v29 = vrot.slane %v2986_v58, %v3665_v30 }
 0x2e0   :  { %3144 = verf.f32 %v806_v41 }
 0x2e1   :  { %v804_v21 = vmul.f32 0.70710677, %v796_v38  ;;  %v805_v25 = vmul.f32 0.70710677, %v797_v46  ;;  %v800_v56 = vmul.f32 0.5, %v796_v38  ;;  %v801_v51 = vmul.f32 0.5, %v797_v46 }
 0x2e3   :  { %3146 = verf.f32 %v804_v21 }
 0x2e4   :  { %3148 = verf.f32 %v805_v25 }
 0x2ec   :  { %v3143_v1 = vpop.eup %3142 }
 0x2ed   :  { %v811_v23 = vadd.f32 1.0, %v3143_v1  ;;  %v3145_v61 = vpop.eup %3144  ;;  %v1164_v1 = vrot.slane %v2986_v58, %v3639_v36 }
 0x2ee   :  { %v814_v19 = vadd.f32 1.0, %v3145_v61 }
 0x2ef   :  { %v3950_v8 = vmul.f32 %v811_v23, %v799_v4 }
 0x2f0   :  { %v3147_v54 = vpop.eup %3146  ;;  %v3959_v60 = vmul.f32 %v814_v19, %v802_v62 }
 0x2f1   :  { %5940 = vst [vmem:[#allocation67_spill] sm:$0xff] %v3950_v8  ;;  %v3149_v42 = vpop.eup %3148  ;;  %v812_v31 = vadd.f32 1.0, %v3147_v54  ;;  %826 = vrot.lane.b32.xlu1 %v3950_v8, %s3236_s29  ;;  %v1172_v54 = vrot.slane %v2986_v58, %v3650_v57 }
 0x2f2   :  { %v813_v45 = vadd.f32 1.0, %v3149_v42  ;;  %5943 = vst [vmem:[#allocation70_spill] sm:$0xff] %v3959_v60 }
 0x2f3   :  { %v3953_v10 = vmul.f32 %v812_v31, %v800_v56 }
 0x2f4   :  { %v3955_v16 = vmul.f32 %v813_v45, %v801_v51  ;;  %v1160_v51 = vrot.slane %v2986_v58, %v3652_v50  ;;  %v5958_v58 = vld [vmem:[#allocation51_spill] sm:$0xff] }
 0x2f5   :  { %5941 = vst [vmem:[#allocation68_spill] sm:$0xff] %v3953_v10  ;;  %828 = vrot.lane.b32.xlu0 %v3953_v10, %s3236_s29 }
 0x2f6   :  { %5942 = vst [vmem:[#allocation69_spill] sm:$0xff] %v3955_v16  ;;  %830 = vrot.lane.b32.xlu1 %v3955_v16, %s3236_s29 }
 0x2f9   :  { %832 = vrot.lane.b32.xlu0 %v3959_v60, %s3236_s29 }
 0x2fa   :  { %1141 = vrot.lane.b32.xlu1 %v3950_v8, %s3237_s4 }
 0x2fd   :  { %1143 = vrot.lane.b32.xlu0 %v3953_v10, %s3237_s4 }
 0x2fe   :  { %1145 = vrot.lane.b32.xlu1 %v3955_v16, %s3237_s4 }
 0x301   :  { %1147 = vrot.lane.b32.xlu0 %v3959_v60, %s3237_s4 }
 0x302   :  { %1361 = vrot.lane.b32.xlu1 %v3950_v8, %s3232_s5 }
 0x305   :  { %1363 = vrot.lane.b32.xlu0 %v3953_v10, %s3232_s5 }
 0x306   :  { %1365 = vrot.lane.b32.xlu1 %v3955_v16, %s3232_s5 }
 0x309   :  { %1367 = vrot.lane.b32.xlu0 %v3959_v60, %s3232_s5  ;;  %s3242_s5 = smov 96  }
 0x30a   :  { %1737 = vrot.lane.b32.xlu1 %v3950_v8, %s3234_s18 }
 0x30d   :  { %1739 = vrot.lane.b32.xlu0 %v3953_v10, %s3234_s18 }
 0x30e   :  { %1741 = vrot.lane.b32.xlu1 %v3955_v16, %s3234_s18 }
 0x311   :  { %1743 = vrot.lane.b32.xlu0 %v3959_v60, %s3234_s18  ;;  %s3243_s18 = smov 80  }
 0x312   :  { %1935 = vrot.lane.b32.xlu1 %v3953_v10, %s3238_s0 }
 0x315   :  { %1933 = vrot.lane.b32.xlu0 %v3950_v8, %s3238_s0 }
 0x316   :  { %1939 = vrot.lane.b32.xlu1 %v3959_v60, %s3238_s0 }
 0x319   :  { %1937 = vrot.lane.b32.xlu0 %v3955_v16, %s3238_s0 }
 0x31a   :  { %2155 = vrot.lane.b32.xlu1 %v3953_v10, %s3239_s30 }
 0x31d   :  { %2153 = vrot.lane.b32.xlu0 %v3950_v8, %s3239_s30 }
 0x31e   :  { %2159 = vrot.lane.b32.xlu1 %v3959_v60, %s3239_s30 }
 0x321   :  { %2157 = vrot.lane.b32.xlu0 %v3955_v16, %s3239_s30 }
 0x322   :  { %1557 = vrot.lane.b32.xlu1 %v3950_v8, %s3240_s6 }
 0x325   :  { %1561 = vrot.lane.b32.xlu0 %v3955_v16, %s3240_s6 }
 0x326   :  { %1559 = vrot.lane.b32.xlu1 %v3953_v10, %s3240_s6 }
 0x329   :  { %1589 = vrot.lane.b32.xlu0 %v3955_v16, %s3241_s7 }
 0x32a   :  { %1563 = vrot.lane.b32.xlu1 %v3959_v60, %s3240_s6 }
 0x32d   :  { %1617 = vrot.lane.b32.xlu0 %v3955_v16, %s3233_s9 }
 0x32e   :  { %1585 = vrot.lane.b32.xlu1 %v3950_v8, %s3241_s7 }
 0x331   :  { %1655 = vrot.lane.b32.xlu0 %v3953_v10, %s3235_s20 }
 0x332   :  { %1587 = vrot.lane.b32.xlu1 %v3953_v10, %s3241_s7 }
 0x335   :  { %1659 = vrot.lane.b32.xlu0 %v3959_v60, %s3235_s20 }
 0x336   :  { %1591 = vrot.lane.b32.xlu1 %v3959_v60, %s3241_s7 }
 0x339   :  { %1681 = vrot.lane.b32.xlu0 %v3950_v8, %s3242_s5 }
 0x33a   :  { %1613 = vrot.lane.b32.xlu1 %v3950_v8, %s3233_s9 }
 0x33d   :  { %1685 = vrot.lane.b32.xlu0 %v3955_v16, %s3242_s5 }
 0x33e   :  { %1615 = vrot.lane.b32.xlu1 %v3953_v10, %s3233_s9 }
 0x341   :  { %1713 = vrot.lane.b32.xlu0 %v3955_v16, %s3243_s18 }
 0x342   :  { %1619 = vrot.lane.b32.xlu1 %v3959_v60, %s3233_s9 }
 0x346   :  { %1653 = vrot.lane.b32.xlu1 %v3950_v8, %s3235_s20 }
 0x34a   :  { %1657 = vrot.lane.b32.xlu1 %v3955_v16, %s3235_s20 }
 0x34e   :  { %1683 = vrot.lane.b32.xlu1 %v3953_v10, %s3242_s5 }
 0x352   :  { %1687 = vrot.lane.b32.xlu1 %v3959_v60, %s3242_s5 }
 0x356   :  { %1709 = vrot.lane.b32.xlu1 %v3950_v8, %s3243_s18 }
 0x35a   :  { %1711 = vrot.lane.b32.xlu1 %v3953_v10, %s3243_s18 }
 0x35e   :  { %1715 = vrot.lane.b32.xlu1 %v3959_v60, %s3243_s18 }
 0x363   :  { %v827_v37 = vpop.permute.xlu1 %826 }
 0x367   :  { %v829_v34 = vpop.permute.xlu0 %828 }
 0x368   :  { %v831_v20 = vpop.permute.xlu1 %830  ;;  %v837_v32 = vsel %vm834_vm6, %v827_v37, %v829_v34 }
 0x369   :  { %v836_v12 = vsel %vm834_vm6, %v829_v34, %v831_v20  ;;  %v4061_v2 = vmul.f32 %v848_v17, %v837_v32 }
 0x36a   :  { %v4046_v14 = vmul.f32 %v852_v43, %v836_v12 }
 0x36b   :  { %v833_v24 = vpop.permute.xlu0 %832 }
 0x36c   :  { %v838_v55 = vsel %vm834_vm6, %v833_v24, %v827_v37  ;;  %869 = vrot.lane.b32.xlu0 %v4046_v14, %s3240_s6  ;;  %v1142_v44 = vpop.permute.xlu1 %1141  ;;  %v835_v33 = vsel %vm834_vm6, %v831_v20, %v833_v24 }
 0x36d   :  { %v4053_v59 = vmul.f32 %v844_v6, %v838_v55  ;;  %v4072_v9 = vmul.f32 %v856_v0, %v835_v33  ;;  %v5954_v55 = vld [vmem:[#allocation54_spill] sm:$0xff] }
 0x36f   :  { %865 = vrot.lane.b32.xlu1 %v4053_v59, %s3240_s6  ;;  %v1144_v52 = vpop.permute.xlu0 %1143 }
 0x370   :  { %921 = vrot.lane.b32.xlu0 %v4046_v14, %s3241_s7  ;;  %v1146_v13 = vpop.permute.xlu1 %1145  ;;  %v1152_v4 = vsel %vm1149_vm7, %v1142_v44, %v1144_v52 }
 0x371   :  { %v1151_v15 = vsel %vm1149_vm7, %v1144_v52, %v1146_v13  ;;  %v4134_v61 = vmul.f32 %v1164_v1, %v1152_v4 }
 0x372   :  { %v4111_v41 = vmul.f32 %v1168_v29, %v1151_v15 }
 0x373   :  { %867 = vrot.lane.b32.xlu1 %v4061_v2, %s3240_s6  ;;  %v1148_v22 = vpop.permute.xlu0 %1147  ;;  %5946 = vst [vmem:[#allocation73_spill] sm:$0xff] %v4134_v61 }
 0x374   :  { %973 = vrot.lane.b32.xlu0 %v4046_v14, %s3233_s9  ;;  %v4070_v39 = vpop.permute.xlu1 %1361  ;;  %5944 = vst [vmem:[#allocation71_spill] sm:$0xff] %v4111_v41  ;;  %v1150_v42 = vsel %vm1149_vm7, %v1146_v13, %v1148_v22  ;;  %v1153_v19 = vsel %vm1149_vm7, %v1148_v22, %v1142_v44 }
 0x375   :  { %v4148_v45 = vmul.f32 %v1172_v54, %v1150_v42  ;;  %v4160_v35 = vmul.f32 %v1160_v51, %v1153_v19 }
 0x377   :  { %871 = vrot.lane.b32.xlu1 %v4072_v9, %s3240_s6  ;;  %v1364_v38 = vpop.permute.xlu0 %1363  ;;  %5948 = vst [vmem:[#allocation75_spill] sm:$0xff] %v4148_v45  ;;  %5950 = vst [vmem:[#allocation77_spill] sm:$0xff] %v4160_v35 }
 0x378   :  { %1011 = vrot.lane.b32.xlu0 %v4061_v2, %s3235_s20  ;;  %v4078_v26 = vpop.permute.xlu1 %1365  ;;  %v1371_v0 = vsel %vm470_vm2, %v4070_v39, %v1364_v38 }
 0x379   :  { %v1370_v12 = vsel %vm470_vm2, %v1364_v38, %v4078_v26  ;;  %v4216_v22 = vmul.f32 %v1371_v0, %v5958_v58  ;;  %v5960_v38 = vld [vmem:[#allocation52_spill] sm:$0xff] }
 0x37a   :  { %v4188_v44 = vmul.f32 %v1370_v12, %v5954_v55  ;;  %v5967_v55 = vld [vmem:[#allocation57_spill] sm:$0xff] }
 0x37b   :  { %917 = vrot.lane.b32.xlu1 %v4053_v59, %s3241_s7  ;;  %v1368_v25 = vpop.permute.xlu0 %1367 }
 0x37c   :  { %1015 = vrot.lane.b32.xlu0 %v4072_v9, %s3235_s20  ;;  %v4084_v53 = vpop.permute.xlu1 %1737  ;;  %v1369_v29 = vsel %vm470_vm2, %v4078_v26, %v1368_v25  ;;  %v1372_v4 = vsel %vm470_vm2, %v1368_v25, %v4070_v39  ;;  %v5962_v26 = vld [vmem:[#allocation53_spill] sm:$0xff] }
 0x37d   :  { %v4228_v1 = vmul.f32 %v1369_v29, %v5960_v38  ;;  %v4240_v42 = vmul.f32 %v1372_v4, %v5962_v26 }
 0x37f   :  { %919 = vrot.lane.b32.xlu1 %v4061_v2, %s3241_s7  ;;  %v4139_v56 = vpop.permute.xlu0 %1739 }
 0x380   :  { %1037 = vrot.lane.b32.xlu0 %v4053_v59, %s3242_s5  ;;  %v4090_v49 = vpop.permute.xlu1 %1741 }
 0x381   :  { %v1746_v4 = vsel %vm695_vm3, %v4139_v56, %v4090_v49 }
 0x383   :  { %923 = vrot.lane.b32.xlu1 %v4072_v9, %s3241_s7  ;;  %v4158_v37 = vpop.permute.xlu0 %1743 }
 0x384   :  { %1041 = vrot.lane.b32.xlu0 %v4046_v14, %s3242_s5  ;;  %v4100_v3 = vpop.permute.xlu1 %1935  ;;  %v1745_v19 = vsel %vm695_vm3, %v4090_v49, %v4158_v37 }
 0x385   :  { %v4267_v0 = vmul.f32 %v1745_v19, %v5967_v55  ;;  %v5973_v19 = vld [vmem:[#allocation56_spill] sm:$0xff] }
 0x386   :  { %v4294_v55 = vmul.f32 %v1746_v4, %v5973_v19  ;;  %v1747_v4 = vsel %vm695_vm3, %v4084_v53, %v4139_v56  ;;  %v5980_v19 = vld [vmem:[#allocation55_spill] sm:$0xff] }
 0x387   :  { %969 = vrot.lane.b32.xlu1 %v4053_v59, %s3233_s9  ;;  %v4168_v34 = vpop.permute.xlu0 %1933  ;;  %5968 = vst [vmem:[#allocation57_spill] sm:$0xff] %v4267_v0  ;;  %v4337_v56 = vld [vmem:[%s5709_s1 + $0x5] ss:$8 sm:$0xf] }
 0x388   :  { %1093 = vrot.lane.b32.xlu0 %v4046_v14, %s3243_s18  ;;  %v4109_v18 = vpop.permute.xlu1 %1939  ;;  %5974 = vst [vmem:[#allocation56_spill] sm:$0xff] %v4294_v55 }
 0x389   :  { %v1945_v16 = vsel %vm1941_vm8, %v4109_v18, %v4168_v34 }
 0x38b   :  { %971 = vrot.lane.b32.xlu1 %v4061_v2, %s3233_s9  ;;  %v4185_v24 = vpop.permute.xlu0 %1937 }
 0x38c   :  { %1185 = vrot.lane.b32.xlu0 %v4111_v41, %s3240_s6  ;;  %v4117_v46 = vpop.permute.xlu1 %2155 }
 0x38f   :  { %975 = vrot.lane.b32.xlu1 %v4072_v9, %s3233_s9  ;;  %v4196_v32 = vpop.permute.xlu0 %2153 }
 0x390   :  { %1213 = vrot.lane.b32.xlu0 %v4111_v41, %s3241_s7  ;;  %v4123_v21 = vpop.permute.xlu1 %2159 }
 0x393   :  { %1009 = vrot.lane.b32.xlu1 %v4053_v59, %s3235_s20  ;;  %v4213_v52 = vpop.permute.xlu0 %2157 }
 0x394   :  { %1241 = vrot.lane.b32.xlu0 %v4111_v41, %s3233_s9  ;;  %v4132_v23 = vpop.permute.xlu1 %1557 }
 0x395   :  { %5945 = vst [vmem:[#allocation72_spill] sm:$0xff] %v4132_v23 }
 0x397   :  { %1013 = vrot.lane.b32.xlu1 %v4046_v14, %s3235_s20  ;;  %v4233_v54 = vpop.permute.xlu0 %1561 }
 0x398   :  { %1279 = vrot.lane.b32.xlu0 %v4134_v61, %s3235_s20  ;;  %v4145_v31 = vpop.permute.xlu1 %1559  ;;  %5961 = vst [vmem:[#allocation52_spill] sm:$0xff] %v4233_v54 }
 0x399   :  { %5947 = vst [vmem:[#allocation74_spill] sm:$0xff] %v4145_v31 }
 0x39b   :  { %1039 = vrot.lane.b32.xlu1 %v4061_v2, %s3242_s5  ;;  %v4248_v39 = vpop.permute.xlu0 %1589 }
 0x39c   :  { %1283 = vrot.lane.b32.xlu0 %v4148_v45, %s3235_s20  ;;  %v4156_v62 = vpop.permute.xlu1 %1563  ;;  %5964 = vst [vmem:[#allocation83_spill] sm:$0xff] %v4248_v39  ;;  %v1952_v39 = vrot.slane %v4337_v56, %v3652_v50 }
 0x39d   :  { %5949 = vst [vmem:[#allocation76_spill] sm:$0xff] %v4156_v62 }
 0x39f   :  { %1043 = vrot.lane.b32.xlu1 %v4072_v9, %s3242_s5  ;;  %v4260_v12 = vpop.permute.xlu0 %1617 }
 0x3a0   :  { %1305 = vrot.lane.b32.xlu0 %v4160_v35, %s3242_s5  ;;  %v4166_v43 = vpop.permute.xlu1 %1585  ;;  %5966 = vst [vmem:[#allocation85_spill] sm:$0xff] %v4260_v12 }
 0x3a1   :  { %5951 = vst [vmem:[#allocation78_spill] sm:$0xff] %v4166_v43  ;;  %v1964_v43 = vrot.slane %v4337_v56, %v3650_v57 }
 0x3a3   :  { %1089 = vrot.lane.b32.xlu1 %v4053_v59, %s3243_s18  ;;  %v4275_v29 = vpop.permute.xlu0 %1655 }
 0x3a4   :  { %1309 = vrot.lane.b32.xlu0 %v4111_v41, %s3242_s5  ;;  %v4174_v20 = vpop.permute.xlu1 %1587  ;;  %5970 = vst [vmem:[#allocation87_spill] sm:$0xff] %v4275_v29 }
 0x3a5   :  { %5952 = vst [vmem:[#allocation79_spill] sm:$0xff] %v4174_v20 }
 0x3a7   :  { %1091 = vrot.lane.b32.xlu1 %v4061_v2, %s3243_s18  ;;  %v4287_v26 = vpop.permute.xlu0 %1659 }
 0x3a8   :  { %1337 = vrot.lane.b32.xlu0 %v4111_v41, %s3243_s18  ;;  %v4183_v6 = vpop.permute.xlu1 %1591  ;;  %5972 = vst [vmem:[#allocation89_spill] sm:$0xff] %v4287_v26 }
 0x3a9   :  { %5953 = vst [vmem:[#allocation80_spill] sm:$0xff] %v4183_v6 }
 0x3ab   :  { %1095 = vrot.lane.b32.xlu1 %v4072_v9, %s3243_s18  ;;  %v4306_v49 = vpop.permute.xlu0 %1681 }
 0x3ac   :  { %1381 = vrot.lane.b32.xlu0 %v4188_v44, %s3240_s6  ;;  %v4194_v17 = vpop.permute.xlu1 %1613  ;;  %5976 = vst [vmem:[#allocation91_spill] sm:$0xff] %v4306_v49 }
 0x3ad   :  { %5955 = vst [vmem:[#allocation54_spill] sm:$0xff] %v4194_v17  ;;  %v2983_v17 = vld [vmem:[%s5710_s2 + $0x1] ss:$8 sm:$0xf] }
 0x3ae   :  { %v4400_v10 = vrot.slane %v2983_v17, %v3665_v30 }
 0x3af   :  { %1181 = vrot.lane.b32.xlu1 %v4160_v35, %s3240_s6  ;;  %v4324_v49 = vpop.permute.xlu0 %1685 }
 0x3b0   :  { %1409 = vrot.lane.b32.xlu0 %v4188_v44, %s3241_s7  ;;  %v4202_v13 = vpop.permute.xlu1 %1615  ;;  %5982 = vst [vmem:[#allocation93_spill] sm:$0xff] %v4324_v49 }
 0x3b1   :  { %5956 = vst [vmem:[#allocation81_spill] sm:$0xff] %v4202_v13 }
 0x3b3   :  { %1183 = vrot.lane.b32.xlu1 %v4134_v61, %s3240_s6 }
 0x3b4   :  { %1437 = vrot.lane.b32.xlu0 %v4188_v44, %s3233_s9  ;;  %v4211_v33 = vpop.permute.xlu1 %1619 }
 0x3b5   :  { %5957 = vst [vmem:[#allocation82_spill] sm:$0xff] %v4211_v33  ;;  %v1956_v33 = vrot.slane %v4337_v56, %v3639_v36 }
 0x3b7   :  { %1187 = vrot.lane.b32.xlu1 %v4148_v45, %s3240_s6 }
 0x3b8   :  { %1475 = vrot.lane.b32.xlu0 %v4216_v22, %s3235_s20  ;;  %v4225_v15 = vpop.permute.xlu1 %1653 }
 0x3b9   :  { %5959 = vst [vmem:[#allocation51_spill] sm:$0xff] %v4225_v15 }
 0x3bb   :  { %1209 = vrot.lane.b32.xlu1 %v4160_v35, %s3241_s7 }
 0x3bc   :  { %1479 = vrot.lane.b32.xlu0 %v4228_v1, %s3235_s20  ;;  %v4242_v51 = vpop.permute.xlu1 %1657 }
 0x3bd   :  { %5963 = vst [vmem:[#allocation53_spill] sm:$0xff] %v4242_v51 }
 0x3bf   :  { %1211 = vrot.lane.b32.xlu1 %v4134_v61, %s3241_s7 }
 0x3c0   :  { %1501 = vrot.lane.b32.xlu0 %v4240_v42, %s3242_s5  ;;  %v4254_v25 = vpop.permute.xlu1 %1683 }
 0x3c1   :  { %5965 = vst [vmem:[#allocation84_spill] sm:$0xff] %v4254_v25  ;;  %v5977_v25 = vld [vmem:[#allocation58_spill] sm:$0xff] }
 0x3c3   :  { %1215 = vrot.lane.b32.xlu1 %v4148_v45, %s3241_s7 }
 0x3c4   :  { %1505 = vrot.lane.b32.xlu0 %v4188_v44, %s3242_s5  ;;  %v4269_v58 = vpop.permute.xlu1 %1687 }
 0x3c5   :  { %5969 = vst [vmem:[#allocation86_spill] sm:$0xff] %v4269_v58 }
 0x3c7   :  { %1237 = vrot.lane.b32.xlu1 %v4160_v35, %s3233_s9 }
 0x3c8   :  { %1533 = vrot.lane.b32.xlu0 %v4188_v44, %s3243_s18  ;;  %v4281_v38 = vpop.permute.xlu1 %1709 }
 0x3c9   :  { %5971 = vst [vmem:[#allocation88_spill] sm:$0xff] %v4281_v38  ;;  %v1748_v38 = vsel %vm695_vm3, %v4158_v37, %v4084_v53 }
 0x3ca   :  { %v4309_v51 = vmul.f32 %v1748_v38, %v5977_v25  ;;  %v4339_v25 = vpop.permute.xlu0 %1713 }
 0x3cb   :  { %1239 = vrot.lane.b32.xlu1 %v4134_v61, %s3233_s9  ;;  %5983 = vst [vmem:[#allocation94_spill] sm:$0xff] %v4339_v25 }
 0x3cc   :  { %1757 = vrot.lane.b32.xlu0 %v4267_v0, %s3240_s6  ;;  %v4300_v58 = vpop.permute.xlu1 %1711  ;;  %5978 = vst [vmem:[#allocation58_spill] sm:$0xff] %v4309_v51 }
 0x3cd   :  { %5975 = vst [vmem:[#allocation90_spill] sm:$0xff] %v4300_v58  ;;  %v4322_v58 = vmul.f32 %v1747_v4, %v5980_v19  ;;  %v1960_v4 = vrot.slane %v4337_v56, %v3665_v30  ;;  %v1942_v19 = vsel %vm1941_vm8, %v4185_v24, %v4109_v18 }
 0x3cf   :  { %1243 = vrot.lane.b32.xlu1 %v4148_v45, %s3233_s9  ;;  %5981 = vst [vmem:[#allocation55_spill] sm:$0xff] %v4322_v58  ;;  %v4352_v25 = vmul.f32 %v1960_v4, %v1942_v19  ;;  %v878_v4 = vld [vmem:[%s5710_s2] ss:$8 sm:$0xf]  ;;  %v1943_v19 = vsel %vm1941_vm8, %v4100_v3, %v4185_v24 }
 0x3d0   :  { %1785 = vrot.lane.b32.xlu0 %v4267_v0, %s3241_s7  ;;  %v4319_v37 = vpop.permute.xlu1 %1715  ;;  %v4382_v12 = vrot.slane %v878_v4, %v3665_v30  ;;  %v4391_v20 = vmul.f32 %v1956_v33, %v1943_v19  ;;  %v4408_v33 = vrot.slane %v878_v4, %v3639_v36  ;;  %v4411_v56 = vrot.slane %v878_v4, %v3652_v50 }
 0x3d1   :  { %5979 = vst [vmem:[#allocation92_spill] sm:$0xff] %v4319_v37  ;;  %5984 = vst [vmem:[#allocation95_spill] sm:$0xff] %v4352_v25  ;;  %v4414_v19 = vrot.slane %v878_v4, %v3650_v57 }
 0x3d2   :  { %5985 = vst [vmem:[#allocation96_spill] sm:$0xff] %v4391_v20  ;;  %5986 = vst [vmem:[#allocation97_spill] sm:$0xff] %v4408_v33 }
 0x3d3   :  { %1277 = vrot.lane.b32.xlu1 %v4160_v35, %s3235_s20 }
 0x3d4   :  { %1813 = vrot.lane.b32.xlu0 %v4267_v0, %s3233_s9 }
 0x3d7   :  { %1281 = vrot.lane.b32.xlu1 %v4111_v41, %s3235_s20 }
 0x3d8   :  { %1851 = vrot.lane.b32.xlu0 %v4294_v55, %s3235_s20 }
 0x3db   :  { %1307 = vrot.lane.b32.xlu1 %v4134_v61, %s3242_s5 }
 0x3dc   :  { %1855 = vrot.lane.b32.xlu0 %v4309_v51, %s3235_s20 }
 0x3de   :  { %v870_v37 = vpop.permute.xlu0 %869 }
 0x3df   :  { %1311 = vrot.lane.b32.xlu1 %v4148_v45, %s3242_s5 }
 0x3e0   :  { %1877 = vrot.lane.b32.xlu0 %v4322_v58, %s3242_s5 }
 0x3e1   :  { %v866_v53 = vpop.permute.xlu1 %865 }
 0x3e2   :  { %v922_v15 = vpop.permute.xlu0 %921 }
 0x3e3   :  { %1333 = vrot.lane.b32.xlu1 %v4160_v35, %s3243_s18 }
 0x3e4   :  { %1881 = vrot.lane.b32.xlu0 %v4267_v0, %s3242_s5 }
 0x3e5   :  { %v868_v38 = vpop.permute.xlu1 %867 }
 0x3e6   :  { %v875_v13 = vsel %vm873_vm9, %v868_v38, %v870_v37  ;;  %v4385_v24 = vpop.permute.xlu0 %973  ;;  %v876_v54 = vsel %vm873_vm9, %v866_v53, %v868_v38 }
 0x3e7   :  { %1335 = vrot.lane.b32.xlu1 %v4134_v61, %s3243_s18  ;;  %v902_v8 = vmul.f32 %v4382_v12, %v875_v13  ;;  %v4421_v13 = vrot.slane %v2983_v17, %v3652_v50 }
 0x3e8   :  { %1909 = vrot.lane.b32.xlu0 %v4267_v0, %s3243_s18 }
 0x3e9   :  { %v872_v49 = vpop.permute.xlu1 %871  ;;  %5987 = vst [vmem:[#allocation98_spill] sm:$0xff] %v4421_v13 }
 0x3ea   :  { %v877_v62 = vsel %vm873_vm9, %v872_v49, %v866_v53  ;;  %v874_v18 = vsel %vm873_vm9, %v870_v37, %v872_v49  ;;  %v1944_v49 = vsel %vm1941_vm8, %v4168_v34, %v4100_v3  ;;  %v4432_v37 = vmul.f32 %v1964_v43, %v1945_v16  ;;  %v4441_v41 = vpop.permute.xlu0 %1011  ;;  %v5991_v43 = vld [vmem:[#allocation2_spill] sm:$0xff] }
 0x3eb   :  { %1339 = vrot.lane.b32.xlu1 %v4148_v45, %s3243_s18  ;;  %v900_v4 = vmul.f32 %v4411_v56, %v877_v62  ;;  %v4438_v53 = vrot.slane %v2983_v17, %v3650_v57  ;;  %v903_v61 = vmul.f32 %v4414_v19, %v874_v18  ;;  %v4449_v16 = vrot.slane %v2983_v17, %v3639_v36  ;;  %v4463_v17 = vld [vmem:[%s5709_s1 + $0x6] ss:$8 sm:$0xf] }
 0x3ec   :  { %1977 = vrot.lane.b32.xlu0 %v4352_v25, %s3240_s6  ;;  %5988 = vst [vmem:[#allocation99_spill] sm:$0xff] %v4432_v37  ;;  %v901_v3 = vmul.f32 %v4408_v33, %v876_v54 }
 0x3ed   :  { %v918_v26 = vpop.permute.xlu1 %917 }
 0x3ef   :  { %1377 = vrot.lane.b32.xlu1 %v4240_v42, %s3240_s6 }
 0x3f0   :  { %2005 = vrot.lane.b32.xlu0 %v4352_v25, %s3241_s7 }
 0x3f1   :  { %v920_v29 = vpop.permute.xlu1 %919 }
 0x3f2   :  { %v927_v60 = vsel %vm925_vm10, %v920_v29, %v922_v15  ;;  %v928_v45 = vsel %vm925_vm10, %v918_v26, %v920_v29 }
 0x3f3   :  { %1379 = vrot.lane.b32.xlu1 %v4216_v22, %s3240_s6  ;;  %v955_v23 = vmul.f32 %v4400_v10, %v927_v60  ;;  %v5989_v60 = vld [vmem:[#allocation23_spill] sm:$0xff] }
 0x3f4   :  { %2033 = vrot.lane.b32.xlu0 %v4352_v25, %s3233_s9  ;;  %v911_v38 = vmul.f32 %v5989_v60, %v902_v8  ;;  %5990 = vst [vmem:[#allocation23_spill] sm:$0xff] %v4449_v16  ;;  %v4455_v8 = vmul.f32 %v1952_v39, %v1944_v49  ;;  %v909_v54 = vmul.f32 %v5989_v60, %v900_v4 }
 0x3f5   :  { %v924_v6 = vpop.permute.xlu1 %923  ;;  %v963_v34 = vmul.f32 %v5991_v43, %v955_v23  ;;  %v2180_v23 = vrot.slane %v4463_v17, %v3665_v30  ;;  %v912_v18 = vmul.f32 %v5989_v60, %v903_v61 }
 0x3f6   :  { %v929_v31 = vsel %vm925_vm10, %v924_v6, %v918_v26 }
 0x3f7   :  { %1383 = vrot.lane.b32.xlu1 %v4228_v1, %s3240_s6  ;;  %v953_v62 = vmul.f32 %v4421_v13, %v929_v31  ;;  %v954_v31 = vmul.f32 %v4449_v16, %v928_v45  ;;  %v910_v45 = vmul.f32 %v5989_v60, %v901_v3 }
 0x3f8   :  { %2071 = vrot.lane.b32.xlu0 %v4391_v20, %s3235_s20  ;;  %v926_v20 = vsel %vm925_vm10, %v922_v15, %v924_v6 }
 0x3f9   :  { %v970_v0 = vpop.permute.xlu1 %969  ;;  %v956_v6 = vmul.f32 %v4438_v53, %v926_v20  ;;  %v5992_v20 = vld [vmem:[#allocation59_spill] sm:$0xff]  ;;  %v961_v4 = vmul.f32 %v5991_v43, %v953_v62  ;;  %v962_v62 = vmul.f32 %v5991_v43, %v954_v31 }
 0x3fa   :  { %v915_v26 = vadd.f32 %v911_v38, %v5992_v20  ;;  %v1016_v38 = vpop.permute.xlu0 %1015  ;;  %v913_v3 = vadd.f32 %v909_v54, %v5992_v20 }
 0x3fb   :  { %1405 = vrot.lane.b32.xlu1 %v4240_v42, %s3241_s7  ;;  %v964_v61 = vmul.f32 %v5991_v43, %v956_v6 }
 0x3fc   :  { %2075 = vrot.lane.b32.xlu0 %v4432_v37, %s3235_s20  ;;  %v5993_v37 = vld [vmem:[#allocation4_spill] sm:$0xff]  ;;  %v967_v16 = vadd.f32 %v963_v34, %v915_v26  ;;  %v916_v34 = vadd.f32 %v912_v18, %v5992_v20  ;;  %v965_v43 = vadd.f32 %v961_v4, %v913_v3 }
 0x3fd   :  { %v972_v15 = vpop.permute.xlu1 %971  ;;  %v1003_v35 = vmul.f32 %v5993_v37, %v4046_v14  ;;  %v1001_v13 = vmul.f32 %v5993_v37, %v4053_v59  ;;  %v914_v59 = vadd.f32 %v910_v45, %v5992_v20  ;;  %v2162_v20 = vsel %vm2161_vm11, %v4213_v52, %v4123_v21 }
 0x3fe   :  { %v978_v39 = vsel %vm510_vm4, %v972_v15, %v4385_v24  ;;  %v979_v29 = vsel %vm510_vm4, %v970_v0, %v972_v15 }
 0x3ff   :  { %v983_v49 = vmul.f32 %v978_v39, %v3784_v11  ;;  %1407 = vrot.lane.b32.xlu1 %v4216_v22, %s3241_s7  ;;  %v982_v15 = vmul.f32 %v979_v29, %v3774_v48  ;;  %v5994_v39 = vld [vmem:[#allocation3_spill] sm:$0xff]  ;;  %v966_v45 = vadd.f32 %v962_v62, %v914_v59  ;;  %v4530_v59 = vmul.f32 %v2180_v23, %v2162_v20 }
 0x400   :  { %2097 = vrot.lane.b32.xlu0 %v4455_v8, %s3242_s5  ;;  %v2984_v62 = vld [vmem:[%s5710_s2 + $0x5] ss:$8 sm:$0xf] }
 0x401   :  { %v991_v11 = vmul.f32 %v5994_v39, %v983_v49  ;;  %v976_v60 = vpop.permute.xlu1 %975  ;;  %v990_v54 = vmul.f32 %v5994_v39, %v982_v15  ;;  %v1038_v15 = vpop.permute.xlu0 %1037  ;;  %5996 = vst [vmem:[#allocation2_spill] sm:$0xff] %v4530_v59 }
 0x402   :  { %v977_v14 = vsel %vm510_vm4, %v4385_v24, %v976_v60  ;;  %v980_v29 = vsel %vm510_vm4, %v976_v60, %v970_v0  ;;  %v1004_v24 = vmul.f32 %v5993_v37, %v4072_v9  ;;  %v968_v0 = vadd.f32 %v964_v61, %v916_v34  ;;  %v5995_v34 = vld [vmem:[#allocation25_spill] sm:$0xff] }
 0x403   :  { %v995_v6 = vadd.f32 %v991_v11, %v967_v16  ;;  %v981_v26 = vmul.f32 %v980_v29, %v3777_v27  ;;  %v984_v49 = vmul.f32 %v977_v14, %v3791_v7  ;;  %1411 = vrot.lane.b32.xlu1 %v4228_v1, %s3241_s7  ;;  %v994_v3 = vadd.f32 %v990_v54, %v966_v45 }
 0x404   :  { %2101 = vrot.lane.b32.xlu0 %v4352_v25, %s3242_s5 }
 0x405   :  { %v1007_v11 = vadd.f32 %v1003_v35, %v995_v6  ;;  %v989_v16 = vmul.f32 %v5994_v39, %v981_v26  ;;  %v992_v31 = vmul.f32 %v5994_v39, %v984_v49  ;;  %v1010_v18 = vpop.permute.xlu1 %1009 }
 0x406   :  { %v1019_v9 = vsel %vm575_vm5, %v1010_v18, %v4441_v41  ;;  %v1020_v4 = vsel %vm575_vm5, %v1016_v38, %v1010_v18 }
 0x407   :  { %v993_v35 = vadd.f32 %v989_v16, %v965_v43  ;;  %v996_v61 = vadd.f32 %v992_v31, %v968_v0  ;;  %v1021_v60 = vmul.f32 %v1019_v9, %v3822_v63  ;;  %v1024_v39 = vmul.f32 %v1020_v4, %v3834_v5  ;;  %1433 = vrot.lane.b32.xlu1 %v4240_v42, %s3233_s9 }
 0x408   :  { %2129 = vrot.lane.b32.xlu0 %v4352_v25, %s3243_s18  ;;  %v1002_v43 = vmul.f32 %v5993_v37, %v4061_v2  ;;  %v4545_v2 = vrot.slane %v2984_v62, %v3652_v50  ;;  %v4550_v37 = vrot.slane %v2984_v62, %v3639_v36  ;;  %v6038_v25 = vld [vmem:[#allocation78_spill] sm:$0xff] }
 0x409   :  { %v1005_v14 = vadd.f32 %v1001_v13, %v993_v35  ;;  %v1008_v29 = vadd.f32 %v1004_v24, %v996_v61  ;;  %v1029_v6 = vmul.f32 %v5995_v34, %v1021_v60  ;;  %v1032_v26 = vmul.f32 %v5995_v34, %v1024_v39  ;;  %v1014_v49 = vpop.permute.xlu1 %1013 }
 0x40a   :  { %v1017_v54 = vsel %vm575_vm5, %v1014_v49, %v1016_v38  ;;  %v1018_v0 = vsel %vm575_vm5, %v4441_v41, %v1014_v49  ;;  %5997 = vst [vmem:[#allocation59_spill] sm:$0xff] %v4545_v2  ;;  %5998 = vst [vmem:[#allocation4_spill] sm:$0xff] %v4550_v37  ;;  %v1042_v41 = vpop.permute.xlu0 %1041  ;;  %v1006_v23 = vadd.f32 %v1002_v43, %v994_v3 }
 0x40b   :  { %v1033_v16 = vadd.f32 %v1029_v6, %v1005_v14  ;;  %v1036_v13 = vadd.f32 %v1032_v26, %v1008_v29  ;;  %v1022_v24 = vmul.f32 %v1018_v0, %v3828_v28  ;;  %v1023_v31 = vmul.f32 %v1017_v54, %v3831_v47  ;;  %1435 = vrot.lane.b32.xlu1 %v4216_v22, %s3233_s9  ;;  %v6001_v14 = vld [vmem:[#allocation27_spill] sm:$0xff] }
 0x40c   :  { %2197 = vrot.lane.b32.xlu0 %v4530_v59, %s3240_s6  ;;  %v4565_v39 = vrot.slane %v2984_v62, %v3665_v30  ;;  %v4568_v3 = vrot.slane %v2984_v62, %v3650_v57  ;;  %v2176_v6 = vrot.slane %v4463_v17, %v3639_v36  ;;  %v2163_v26 = vsel %vm2161_vm11, %v4117_v46, %v4213_v52 }
 0x40d   :  { %v1030_v38 = vmul.f32 %v5995_v34, %v1022_v24  ;;  %v1031_v18 = vmul.f32 %v5995_v34, %v1023_v31  ;;  %v1040_v20 = vpop.permute.xlu1 %1039 }
 0x40e   :  { %v1047_v45 = vsel %vm1045_vm12, %v1040_v20, %v1042_v41  ;;  %v1048_v9 = vsel %vm1045_vm12, %v1038_v15, %v1040_v20  ;;  %5999 = vst [vmem:[#allocation3_spill] sm:$0xff] %v4565_v39  ;;  %6000 = vst [vmem:[#allocation25_spill] sm:$0xff] %v4568_v3 }
 0x40f   :  { %v1034_v4 = vadd.f32 %v1030_v38, %v1006_v23  ;;  %v1035_v35 = vadd.f32 %v1031_v18, %v1007_v11  ;;  %v1073_v61 = vmul.f32 %v4545_v2, %v1048_v9  ;;  %v1074_v60 = vmul.f32 %v4550_v37, %v1047_v45  ;;  %1439 = vrot.lane.b32.xlu1 %v4228_v1, %s3233_s9  ;;  %v4601_v23 = vld [vmem:[%s5710_s2 + $0x6] ss:$8 sm:$0xf]  ;;  %v1094_v9 = vpop.permute.xlu0 %1093 }
 0x410   :  { %2225 = vrot.lane.b32.xlu0 %v4530_v59, %s3241_s7  ;;  %v2165_v38 = vsel %vm2161_vm11, %v4123_v21, %v4196_v32  ;;  %v4614_v45 = vrot.slane %v4601_v23, %v3639_v36  ;;  %v4633_v36 = vrot.slane %v4601_v23, %v3665_v30 }
 0x411   :  { %v1081_v29 = vmul.f32 %v6001_v14, %v1073_v61  ;;  %v1082_v11 = vmul.f32 %v6001_v14, %v1074_v60  ;;  %v1044_v34 = vpop.permute.xlu1 %1043  ;;  %v2172_v61 = vrot.slane %v4463_v17, %v3652_v50 }
 0x412   :  { %v1046_v49 = vsel %vm1045_vm12, %v1042_v41, %v1044_v34  ;;  %v1049_v62 = vsel %vm1045_vm12, %v1044_v34, %v1038_v15  ;;  %v2184_v15 = vrot.slane %v4463_v17, %v3650_v57  ;;  %v6004_v17 = vld [vmem:[#allocation5_spill] sm:$0xff] }
 0x413   :  { %v4582_v43 = vadd.f32 %v1081_v29, %v1033_v16  ;;  %v1086_v54 = vadd.f32 %v1082_v11, %v1034_v4  ;;  %v1075_v0 = vmul.f32 %v4565_v39, %v1046_v49  ;;  %v1076_v24 = vmul.f32 %v4568_v3, %v1049_v62  ;;  %1473 = vrot.lane.b32.xlu1 %v4240_v42, %s3235_s20 }
 0x414   :  { %2253 = vrot.lane.b32.xlu0 %v4530_v59, %s3233_s9  ;;  %v4596_v16 = vmul.f32 %v2176_v6, %v2163_v26  ;;  %v4618_v21 = vmul.f32 %v2184_v15, %v2165_v38  ;;  %v4653_v49 = vrot.slane %v4601_v23, %v3650_v57  ;;  %v6007_v15 = vld [vmem:[#allocation6_spill] sm:$0xff] }
 0x415   :  { %v1083_v52 = vmul.f32 %v6001_v14, %v1075_v0  ;;  %v1084_v31 = vmul.f32 %v6001_v14, %v1076_v24  ;;  %v4592_v41 = vpop.permute.xlu1 %1089 }
 0x416   :  { %6002 = vst [vmem:[#allocation27_spill] sm:$0xff] %v4596_v16  ;;  %6003 = vst [vmem:[#allocation100_spill] sm:$0xff] %v4618_v21 }
 0x417   :  { %v1087_v18 = vadd.f32 %v1083_v52, %v1035_v35  ;;  %v1088_v20 = vadd.f32 %v1084_v31, %v1036_v13  ;;  %1477 = vrot.lane.b32.xlu1 %v4188_v44, %s3235_s20  ;;  %v2164_v35 = vsel %vm2161_vm11, %v4196_v32, %v4117_v46  ;;  %6006 = vst [vmem:[#allocation101_spill] sm:$0xff] %v4653_v49 }
 0x418   :  { %2291 = vrot.lane.b32.xlu0 %v4596_v16, %s3235_s20  ;;  %v4636_v11 = vmul.f32 %v2172_v61, %v2164_v35 }
 0x419   :  { %v1092_v4 = vpop.permute.xlu1 %1091 }
 0x41a   :  { %v1099_v13 = vsel %vm1097_vm13, %v1092_v4, %v1094_v9  ;;  %6005 = vst [vmem:[#allocation5_spill] sm:$0xff] %v4636_v11 }
 0x41b   :  { %v1126_v60 = vmul.f32 %v4614_v45, %v1099_v13  ;;  %1503 = vrot.lane.b32.xlu1 %v4216_v22, %s3242_s5 }
 0x41c   :  { %2295 = vrot.lane.b32.xlu0 %v4618_v21, %s3235_s20 }
 0x41d   :  { %v1134_v14 = vmul.f32 %v6004_v17, %v1126_v60  ;;  %v1096_v29 = vpop.permute.xlu1 %1095 }
 0x41e   :  { %v1098_v46 = vsel %vm1097_vm13, %v1094_v9, %v1096_v29  ;;  %v1101_v26 = vsel %vm1097_vm13, %v1096_v29, %v4592_v41  ;;  %v2398_v9 = vld [vmem:[%s5711_s12] sm:$0xff] }
 0x41f   :  { %v4640_v32 = vadd.f32 %v1134_v14, %v1086_v54  ;;  %v1127_v34 = vmul.f32 %v4633_v36, %v1098_v46  ;;  %1507 = vrot.lane.b32.xlu1 %v4228_v1, %s3242_s5  ;;  %v1186_v54 = vpop.permute.xlu0 %1185  ;;  %v1128_v0 = vmul.f32 %v4653_v49, %v1101_v26  ;;  %v2789_v46 = vld [vmem:[%s5712_s16] sm:$0xff] }
 0x420   :  { %2317 = vrot.lane.b32.xlu0 %v4636_v11, %s3242_s5  ;;  %v6031_v11 = vld [vmem:[#allocation68_spill] sm:$0xff] }
 0x421   :  { %v1135_v30 = vmul.f32 %v6004_v17, %v1127_v34  ;;  %v1182_v6 = vpop.permute.xlu1 %1181  ;;  %v1136_v57 = vmul.f32 %v6004_v17, %v1128_v0 }
 0x423   :  { %v1139_v62 = vadd.f32 %v1135_v30, %v1087_v18  ;;  %1529 = vrot.lane.b32.xlu1 %v4240_v42, %s3243_s18  ;;  %v1140_v60 = vadd.f32 %v1136_v57, %v1088_v20  ;;  %v1214_v30 = vpop.permute.xlu0 %1213  ;;  %v6008_v20 = vld [vmem:[#allocation7_spill] sm:$0xff] }
 0x424   :  { %2321 = vrot.lane.b32.xlu0 %v4530_v59, %s3242_s5 }
 0x425   :  { %v1184_v24 = vpop.permute.xlu1 %1183 }
 0x426   :  { %v1190_v52 = vsel %vm873_vm9, %v1184_v24, %v1186_v54 }
 0x427   :  { %v1195_v31 = vmul.f32 %v1190_v52, %v4382_v12  ;;  %1531 = vrot.lane.b32.xlu1 %v4216_v22, %s3243_s18 }
 0x428   :  { %2349 = vrot.lane.b32.xlu0 %v4530_v59, %s3243_s18 }
 0x429   :  { %v1203_v38 = vmul.f32 %v6007_v15, %v1195_v31  ;;  %v1188_v18 = vpop.permute.xlu1 %1187  ;;  %v1100_v31 = vsel %vm1097_vm13, %v4592_v41, %v1092_v4  ;;  %v1191_v41 = vsel %vm873_vm9, %v1182_v6, %v1184_v24 }
 0x42a   :  { %v1189_v61 = vsel %vm873_vm9, %v1186_v54, %v1188_v18 }
 0x42b   :  { %v1207_v13 = vadd.f32 %v1203_v38, %v1139_v62  ;;  %v1196_v35 = vmul.f32 %v1189_v61, %v4414_v19  ;;  %1535 = vrot.lane.b32.xlu1 %v4228_v1, %s3243_s18  ;;  %v4696_v38 = vrot.slane %v4601_v23, %v3652_v50 }
 0x42c   :  { %2401 = vperm.xlu0 %3116, %v2398_v9  }
 0x42d   :  { %v1204_v14 = vmul.f32 %v6007_v15, %v1196_v35  ;;  %v1210_v29 = vpop.permute.xlu1 %1209  ;;  %v1192_v35 = vsel %vm873_vm9, %v1188_v18, %v1182_v6  ;;  %v1194_v18 = vmul.f32 %v1191_v41, %v4408_v33  ;;  %v6009_v6 = vld [vmem:[#allocation98_spill] sm:$0xff] }
 0x42e   :  { %v1193_v23 = vmul.f32 %v1192_v35, %v4411_v56 }
 0x42f   :  { %v1208_v34 = vadd.f32 %v1204_v14, %v1140_v60  ;;  %1753 = vrot.lane.b32.xlu1 %v4322_v58, %s3240_s6  ;;  %v1242_v60 = vpop.permute.xlu0 %1241  ;;  %v1125_v14 = vmul.f32 %v4696_v38, %v1100_v31 }
 0x430   :  { %2793 = vperm.xlu0 %3116, %v2789_v46  }
 0x431   :  { %v1212_v26 = vpop.permute.xlu1 %1211 }
 0x432   :  { %v1218_v62 = vsel %vm925_vm10, %v1212_v26, %v1214_v30 }
 0x433   :  { %v1223_v54 = vmul.f32 %v1218_v62, %v4400_v10  ;;  %1755 = vrot.lane.b32.xlu1 %v4294_v55, %s3240_s6  ;;  %v1133_v62 = vmul.f32 %v6004_v17, %v1125_v14  ;;  %v1202_v17 = vmul.f32 %v6007_v15, %v1194_v18 }
 0x435   :  { %v1231_v0 = vmul.f32 %v6008_v20, %v1223_v54  ;;  %v1216_v52 = vpop.permute.xlu1 %1215  ;;  %v1137_v14 = vadd.f32 %v1133_v62, %v4582_v43  ;;  %v1206_v43 = vadd.f32 %v1202_v17, %v4640_v32 }
 0x436   :  { %v1217_v57 = vsel %vm925_vm10, %v1214_v30, %v1216_v52  ;;  %v1220_v50 = vsel %vm925_vm10, %v1216_v52, %v1210_v29 }
 0x437   :  { %v1235_v9 = vadd.f32 %v1231_v0, %v1207_v13  ;;  %v1224_v61 = vmul.f32 %v1217_v57, %v4438_v53  ;;  %1759 = vrot.lane.b32.xlu1 %v4309_v51, %s3240_s6  ;;  %v1219_v13 = vsel %vm925_vm10, %v1210_v29, %v1212_v26  ;;  %v1221_v24 = vmul.f32 %v1220_v50, %v6009_v6  ;;  %v6010_v0 = vld [vmem:[#allocation23_spill] sm:$0xff]  ;;  %v1280_v29 = vpop.permute.xlu0 %1279  ;;  %v6011_v26 = vld [vmem:[#allocation61_spill] sm:$0xff] }
 0x438   :  { %v1222_v31 = vmul.f32 %v1219_v13, %v6010_v0 }
 0x439   :  { %v1232_v4 = vmul.f32 %v6008_v20, %v1224_v61  ;;  %v1238_v46 = vpop.permute.xlu1 %1237  ;;  %v1229_v41 = vmul.f32 %v6008_v20, %v1221_v24 }
 0x43b   :  { %v1236_v30 = vadd.f32 %v1232_v4, %v1208_v34  ;;  %1781 = vrot.lane.b32.xlu1 %v4322_v58, %s3241_s7  ;;  %v1201_v34 = vmul.f32 %v6007_v15, %v1193_v23  ;;  %v6012_v4 = vld [vmem:[#allocation8_spill] sm:$0xff] }
 0x43d   :  { %v1240_v54 = vpop.permute.xlu1 %1239  ;;  %v1205_v59 = vadd.f32 %v1201_v34, %v1137_v14  ;;  %v6015_v14 = vld [vmem:[#allocation75_spill] sm:$0xff] }
 0x43e   :  { %v1246_v52 = vsel %vm510_vm4, %v1240_v54, %v1242_v60  ;;  %v1247_v57 = vsel %vm510_vm4, %v1238_v46, %v1240_v54  ;;  %v1230_v54 = vmul.f32 %v6008_v20, %v1222_v31  ;;  %v1284_v20 = vpop.permute.xlu0 %1283 }
 0x43f   :  { %v1251_v61 = vmul.f32 %v1246_v52, %v6011_v26  ;;  %1783 = vrot.lane.b32.xlu1 %v4294_v55, %s3241_s7  ;;  %v1250_v35 = vmul.f32 %v1247_v57, %v3774_v48  ;;  %v1233_v24 = vadd.f32 %v1229_v41, %v1205_v59  ;;  %v6014_v57 = vld [vmem:[#allocation9_spill] sm:$0xff] }
 0x441   :  { %v1259_v50 = vmul.f32 %v6012_v4, %v1251_v61  ;;  %v1244_v13 = vpop.permute.xlu1 %1243  ;;  %v1258_v62 = vmul.f32 %v6012_v4, %v1250_v35  ;;  %v1234_v61 = vadd.f32 %v1230_v54, %v1206_v43 }
 0x442   :  { %v1245_v23 = vsel %vm510_vm4, %v1242_v60, %v1244_v13  ;;  %v1248_v52 = vsel %vm510_vm4, %v1244_v13, %v1238_v46  ;;  %v6013_v46 = vld [vmem:[#allocation77_spill] sm:$0xff] }
 0x443   :  { %v1263_v21 = vadd.f32 %v1259_v50, %v1235_v9  ;;  %v1249_v15 = vmul.f32 %v1248_v52, %v3777_v27  ;;  %v1252_v18 = vmul.f32 %v1245_v23, %v3791_v7  ;;  %1787 = vrot.lane.b32.xlu1 %v4309_v51, %s3241_s7  ;;  %v1269_v9 = vmul.f32 %v6014_v57, %v6013_v46  ;;  %v6016_v52 = vld [vmem:[#allocation29_spill] sm:$0xff] }
 0x444   :  { %v1272_v50 = vmul.f32 %v6014_v57, %v6015_v14  ;;  %v6017_v46 = vld [vmem:[#allocation73_spill] sm:$0xff] }
 0x445   :  { %v1257_v60 = vmul.f32 %v6012_v4, %v1249_v15  ;;  %v1260_v31 = vmul.f32 %v6012_v4, %v1252_v18  ;;  %v1278_v34 = vpop.permute.xlu1 %1277  ;;  %v1262_v4 = vadd.f32 %v1258_v62, %v1234_v61  ;;  %v1306_v62 = vpop.permute.xlu0 %1305 }
 0x446   :  { %v1287_v13 = vsel %vm575_vm5, %v1278_v34, %v1280_v29  ;;  %v1288_v32 = vsel %vm575_vm5, %v1284_v20, %v1278_v34  ;;  %v1270_v34 = vmul.f32 %v6014_v57, %v6017_v46 }
 0x447   :  { %v1261_v17 = vadd.f32 %v1257_v60, %v1233_v24  ;;  %v1264_v59 = vadd.f32 %v1260_v31, %v1236_v30  ;;  %v1289_v35 = vmul.f32 %v1287_v13, %v3822_v63  ;;  %v1292_v41 = vmul.f32 %v1288_v32, %v3834_v5  ;;  %1809 = vrot.lane.b32.xlu1 %v4322_v58, %s3233_s9  ;;  %v6018_v24 = vld [vmem:[#allocation71_spill] sm:$0xff] }
 0x448   :  { %v1271_v30 = vmul.f32 %v6014_v57, %v6018_v24  ;;  %v1274_v13 = vadd.f32 %v1270_v34, %v1262_v4 }
 0x449   :  { %v1273_v54 = vadd.f32 %v1269_v9, %v1261_v17  ;;  %v1276_v23 = vadd.f32 %v1272_v50, %v1264_v59  ;;  %v1297_v15 = vmul.f32 %v6016_v52, %v1289_v35  ;;  %v1300_v18 = vmul.f32 %v6016_v52, %v1292_v41  ;;  %v1282_v43 = vpop.permute.xlu1 %1281  ;;  %v1310_v4 = vpop.permute.xlu0 %1309 }
 0x44a   :  { %v1285_v60 = vsel %vm575_vm5, %v1282_v43, %v1284_v20  ;;  %v1286_v31 = vsel %vm575_vm5, %v1280_v29, %v1282_v43  ;;  %v1275_v32 = vadd.f32 %v1271_v30, %v1263_v21  ;;  %v6019_v21 = vld [vmem:[#allocation30_spill] sm:$0xff] }
 0x44b   :  { %v1301_v9 = vadd.f32 %v1297_v15, %v1273_v54  ;;  %v1304_v61 = vadd.f32 %v1300_v18, %v1276_v23  ;;  %v1290_v14 = vmul.f32 %v1286_v31, %v3828_v28  ;;  %v1291_v50 = vmul.f32 %v1285_v60, %v3831_v47  ;;  %1811 = vrot.lane.b32.xlu1 %v4294_v55, %s3233_s9 }
 0x44d   :  { %v1298_v57 = vmul.f32 %v6016_v52, %v1290_v14  ;;  %v1299_v17 = vmul.f32 %v6016_v52, %v1291_v50  ;;  %v4772_v20 = vpop.permute.xlu1 %1307 }
 0x44e   :  { %v1315_v29 = vsel %vm1045_vm12, %v1306_v62, %v4772_v20 }
 0x44f   :  { %v4777_v59 = vadd.f32 %v1298_v57, %v1274_v13  ;;  %v1303_v35 = vadd.f32 %v1299_v17, %v1275_v32  ;;  %v1317_v41 = vmul.f32 %v1315_v29, %v4545_v2  ;;  %1815 = vrot.lane.b32.xlu1 %v4309_v51, %s3233_s9  ;;  %v4817_v13 = vpop.permute.xlu0 %1337 }
 0x451   :  { %v1325_v54 = vmul.f32 %v6019_v21, %v1317_v41  ;;  %v1312_v23 = vpop.permute.xlu1 %1311  ;;  %v6023_v41 = vld [vmem:[#allocation72_spill] sm:$0xff] }
 0x452   :  { %v1313_v52 = vsel %vm1045_vm12, %v1310_v4, %v1312_v23  ;;  %v1316_v15 = vsel %vm1045_vm12, %v1312_v23, %v1306_v62  ;;  %v6021_v62 = vld [vmem:[#allocation57_spill] sm:$0xff]  ;;  %v6024_v23 = vld [vmem:[#allocation52_spill] sm:$0xff] }
 0x453   :  { %v4787_v18 = vadd.f32 %v1325_v54, %v1301_v9  ;;  %v1319_v43 = vmul.f32 %v1313_v52, %v4565_v39  ;;  %v1320_v46 = vmul.f32 %v1316_v15, %v4568_v3  ;;  %1849 = vrot.lane.b32.xlu1 %v4322_v58, %s3235_s20  ;;  %v4825_v57 = vpop.permute.xlu0 %1381  ;;  %v6033_v3 = vld [vmem:[#allocation69_spill] sm:$0xff] }
 0x455   :  { %v1327_v34 = vmul.f32 %v6019_v21, %v1319_v43  ;;  %v1328_v24 = vmul.f32 %v6019_v21, %v1320_v46  ;;  %v4795_v30 = vpop.permute.xlu1 %1333  ;;  %v6025_v43 = vld [vmem:[#allocation96_spill] sm:$0xff] }
 0x457   :  { %v4797_v60 = vadd.f32 %v1327_v34, %v1303_v35  ;;  %v4799_v31 = vadd.f32 %v1328_v24, %v1304_v61  ;;  %1853 = vrot.lane.b32.xlu1 %v6021_v62, %s3235_s20  ;;  %v6022_v35 = vld [vmem:[#allocation74_spill] sm:$0xff]  ;;  %v4841_v15 = vpop.permute.xlu0 %1409  ;;  %v6026_v62 = vld [vmem:[#allocation76_spill] sm:$0xff] }
 0x458   :  { %v1567_v54 = vsel %vm873_vm9, %v6023_v41, %v6022_v35  ;;  %v1566_v52 = vsel %vm873_vm9, %v6022_v35, %v6024_v23  ;;  %v1565_v35 = vsel %vm873_vm9, %v6024_v23, %v6026_v62  ;;  %v6039_v23 = vld [vmem:[#allocation14_spill] sm:$0xff] }
 0x459   :  { %6020 = vst [vmem:[#allocation6_spill] sm:$0xff] %v4797_v60  ;;  %v4803_v9 = vpop.permute.xlu1 %1335  ;;  %v1570_v46 = vmul.f32 %v1567_v54, %v4408_v33  ;;  %v1571_v24 = vmul.f32 %v1566_v52, %v4382_v12  ;;  %v6030_v54 = vld [vmem:[#allocation99_spill] sm:$0xff]  ;;  %v4881_v47 = vmul.f32 %v6039_v23, %v4240_v42 }
 0x45b   :  { %1879 = vrot.lane.b32.xlu1 %v4294_v55, %s3242_s5  ;;  %6040 = vst [vmem:[#allocation75_spill] sm:$0xff] %v4881_v47  ;;  %v4899_v42 = vpop.permute.xlu0 %1437 }
 0x45d   :  { %v4807_v14 = vpop.permute.xlu1 %1339 }
 0x45f   :  { %1883 = vrot.lane.b32.xlu1 %v4309_v51, %s3242_s5 }
 0x461   :  { %v4811_v50 = vpop.permute.xlu1 %1377 }
 0x463   :  { %1905 = vrot.lane.b32.xlu1 %v4322_v58, %s3243_s18  ;;  %v6028_v58 = vld [vmem:[#allocation19_spill] sm:$0xff] }
 0x464   :  { %v4865_v52 = vmul.f32 %v6028_v58, %v6031_v11  ;;  %v4869_v39 = vmul.f32 %v6028_v58, %v6033_v3  ;;  %v4885_v11 = vmul.f32 %v6039_v23, %v4216_v22  ;;  %v4889_v3 = vmul.f32 %v6039_v23, %v4188_v44 }
 0x465   :  { %v4815_v61 = vpop.permute.xlu1 %1379  ;;  %v4905_v22 = vmul.f32 %v6039_v23, %v4228_v1  ;;  %v6050_v23 = vld [vmem:[#allocation81_spill] sm:$0xff] }
 0x466   :  { %6032 = vst [vmem:[#allocation8_spill] sm:$0xff] %v4865_v52  ;;  %6034 = vst [vmem:[#allocation77_spill] sm:$0xff] %v4869_v39  ;;  %v6043_v39 = vld [vmem:[#allocation16_spill] sm:$0xff] }
 0x467   :  { %1907 = vrot.lane.b32.xlu1 %v4294_v55, %s3243_s18  ;;  %v1568_v55 = vsel %vm873_vm9, %v6026_v62, %v6023_v41  ;;  %v6035_v41 = vld [vmem:[#allocation70_spill] sm:$0xff]  ;;  %6041 = vst [vmem:[#allocation29_spill] sm:$0xff] %v4885_v11  ;;  %6042 = vst [vmem:[#allocation73_spill] sm:$0xff] %v4889_v3  ;;  %v4908_v44 = vmul.f32 %v6043_v39, %v1571_v24  ;;  %v6049_v24 = vld [vmem:[#allocation85_spill] sm:$0xff] }
 0x468   :  { %6046 = vst [vmem:[#allocation30_spill] sm:$0xff] %v4905_v22  ;;  %v6054_v11 = vld [vmem:[#allocation51_spill] sm:$0xff] }
 0x469   :  { %v4821_v32 = vpop.permute.xlu1 %1383  ;;  %6047 = vst [vmem:[#allocation74_spill] sm:$0xff] %v4908_v44  ;;  %v6051_v44 = vld [vmem:[#allocation54_spill] sm:$0xff] }
 0x46b   :  { %1911 = vrot.lane.b32.xlu1 %v4309_v51, %s3243_s18  ;;  %v6027_v51 = vld [vmem:[#allocation67_spill] sm:$0xff] }
 0x46c   :  { %v4855_v16 = vmul.f32 %v6028_v58, %v6027_v51  ;;  %v4873_v51 = vmul.f32 %v6028_v58, %v6035_v41  ;;  %v4892_v58 = vmul.f32 %v6043_v39, %v1570_v46  ;;  %v1569_v41 = vmul.f32 %v1568_v55, %v4411_v56  ;;  %v6048_v55 = vld [vmem:[#allocation80_spill] sm:$0xff] }
 0x46d   :  { %v4827_v17 = vpop.permute.xlu1 %1405  ;;  %v1572_v46 = vmul.f32 %v1565_v35, %v4414_v19  ;;  %v1622_v35 = vsel %vm510_vm4, %v6050_v23, %v6049_v24 }
 0x46e   :  { %6029 = vst [vmem:[#allocation7_spill] sm:$0xff] %v4855_v16  ;;  %6036 = vst [vmem:[#allocation9_spill] sm:$0xff] %v4873_v51  ;;  %v6037_v16 = vld [vmem:[#allocation79_spill] sm:$0xff]  ;;  %v4947_v22 = vmul.f32 %v6043_v39, %v1569_v41  ;;  %v1627_v60 = vmul.f32 %v1622_v35, %v6011_v26  ;;  %v6056_v41 = vld [vmem:[#allocation89_spill] sm:$0xff] }
 0x46f   :  { %1973 = vrot.lane.b32.xlu1 %v4455_v8, %s3240_s6  ;;  %v1595_v62 = vsel %vm925_vm10, %v6038_v25, %v6037_v16  ;;  %6044 = vst [vmem:[#allocation71_spill] sm:$0xff] %v4892_v58  ;;  %v6045_v51 = vld [vmem:[#allocation83_spill] sm:$0xff]  ;;  %v1596_v58 = vsel %vm925_vm10, %v6048_v55, %v6038_v25  ;;  %v1623_v25 = vsel %vm510_vm4, %v6051_v44, %v6050_v23 }
 0x470   :  { %v1594_v52 = vsel %vm925_vm10, %v6037_v16, %v6045_v51  ;;  %v1314_v16 = vsel %vm1045_vm12, %v4772_v20, %v1310_v4  ;;  %v1598_v3 = vmul.f32 %v1595_v62, %v6010_v0  ;;  %v1593_v1 = vsel %vm925_vm10, %v6045_v51, %v6048_v55  ;;  %v6052_v4 = vld [vmem:[#allocation82_spill] sm:$0xff]  ;;  %v6053_v55 = vld [vmem:[#allocation87_spill] sm:$0xff]  ;;  %6055 = vst [vmem:[#allocation72_spill] sm:$0xff] %v4947_v22 }
 0x471   :  { %v4831_v29 = vpop.permute.xlu1 %1407  ;;  %v1599_v20 = vmul.f32 %v1594_v52, %v4400_v10  ;;  %v1621_v51 = vsel %vm510_vm4, %v6049_v24, %v6052_v4  ;;  %v1624_v62 = vsel %vm510_vm4, %v6052_v4, %v6051_v44  ;;  %v1663_v23 = vsel %vm575_vm5, %v6054_v11, %v6053_v55  ;;  %v4967_v55 = vpop.permute.xlu0 %1475 }
 0x472   :  { %v1597_v52 = vmul.f32 %v1596_v58, %v6009_v6  ;;  %v1318_v2 = vmul.f32 %v1314_v16, %v4550_v37  ;;  %v1343_v24 = vsel %vm1097_vm13, %v4795_v30, %v4803_v9  ;;  %v1600_v44 = vmul.f32 %v1593_v1, %v4438_v53 }
 0x473   :  { %1975 = vrot.lane.b32.xlu1 %v6025_v43, %s3240_s6  ;;  %v1626_v4 = vmul.f32 %v1623_v25, %v3774_v48  ;;  %v1664_v58 = vsel %vm575_vm5, %v6056_v41, %v6054_v11  ;;  %v1625_v16 = vmul.f32 %v1624_v62, %v3777_v27  ;;  %v1628_v22 = vmul.f32 %v1621_v51, %v3791_v7  ;;  %v6057_v11 = vld [vmem:[#allocation17_spill] sm:$0xff] }
 0x474   :  { %v1665_v37 = vmul.f32 %v1663_v23, %v3822_v63  ;;  %v1342_v1 = vsel %vm1097_vm13, %v4803_v9, %v4817_v13  ;;  %v4976_v35 = vmul.f32 %v6043_v39, %v1572_v46  ;;  %v4979_v25 = vmul.f32 %v6057_v11, %v1598_v3 }
 0x475   :  { %v4846_v34 = vpop.permute.xlu1 %1411  ;;  %v4982_v51 = vmul.f32 %v6057_v11, %v1599_v20  ;;  %v1345_v62 = vmul.f32 %v1343_v24, %v4696_v38  ;;  %v4986_v23 = vmul.f32 %v6057_v11, %v1597_v52  ;;  %v1668_v63 = vmul.f32 %v1664_v58, %v3834_v5  ;;  %v6059_v20 = vld [vmem:[#allocation18_spill] sm:$0xff] }
 0x476   :  { %v1326_v9 = vmul.f32 %v6019_v21, %v1318_v2  ;;  %v1344_v39 = vsel %vm1097_vm13, %v4807_v14, %v4795_v30  ;;  %v4995_v3 = vmul.f32 %v6057_v11, %v1600_v44  ;;  %v5001_v24 = vmul.f32 %v6059_v20, %v1627_v60  ;;  %v6061_v21 = vld [vmem:[#allocation37_spill] sm:$0xff]  ;;  %v6063_v60 = vld [vmem:[#allocation10_spill] sm:$0xff] }
 0x477   :  { %1979 = vrot.lane.b32.xlu1 %v6030_v54, %s3240_s6  ;;  %6058 = vst [vmem:[#allocation52_spill] sm:$0xff] %v4982_v51  ;;  %v4998_v51 = vmul.f32 %v6059_v20, %v1626_v4  ;;  %v1346_v52 = vmul.f32 %v1342_v1, %v4614_v45  ;;  %v5005_v58 = vmul.f32 %v6059_v20, %v1625_v16  ;;  %v6064_v11 = vld [vmem:[#allocation53_spill] sm:$0xff] }
 0x478   :  { %v5008_v2 = vmul.f32 %v6059_v20, %v1628_v22  ;;  %v5011_v30 = vmul.f32 %v6061_v21, %v1665_v37  ;;  %v1387_v44 = vsel %vm873_vm9, %v4811_v50, %v4815_v61  ;;  %v1353_v4 = vmul.f32 %v6063_v60, %v1345_v62 }
 0x479   :  { %v4901_v47 = vpop.permute.xlu1 %1433  ;;  %v1348_v1 = vmul.f32 %v1344_v39, %v4653_v49  ;;  %v1385_v22 = vsel %vm873_vm9, %v4825_v57, %v4821_v32  ;;  %v1388_v37 = vsel %vm873_vm9, %v4821_v32, %v4811_v50  ;;  %v5030_v16 = vmul.f32 %v6061_v21, %v1668_v63  ;;  %v5038_v39 = vpop.permute.xlu0 %1479 }
 0x47a   :  { %6060 = vst [vmem:[#allocation96_spill] sm:$0xff] %v5008_v2  ;;  %6062 = vst [vmem:[#allocation76_spill] sm:$0xff] %v5011_v30  ;;  %v5036_v62 = vsel %vm575_vm5, %v6064_v11, %v6056_v41  ;;  %v1330_v20 = vadd.f32 %v1326_v9, %v4777_v59  ;;  %v1341_v30 = vsel %vm1097_vm13, %v4817_v13, %v4807_v14 }
 0x47b   :  { %2001 = vrot.lane.b32.xlu1 %v4455_v8, %s3241_s7  ;;  %v1354_v50 = vmul.f32 %v6063_v60, %v1346_v52  ;;  %v1390_v63 = vmul.f32 %v1387_v44, %v4408_v33  ;;  %v1415_v32 = vsel %vm925_vm10, %v4827_v17, %v4831_v29  ;;  %v1416_v59 = vsel %vm925_vm10, %v4846_v34, %v4827_v17 }
 0x47c   :  { %v1386_v14 = vsel %vm873_vm9, %v4815_v61, %v4825_v57  ;;  %v1389_v13 = vmul.f32 %v1388_v37, %v4411_v56  ;;  %v1392_v41 = vmul.f32 %v1385_v22, %v4414_v19  ;;  %v1413_v9 = vsel %vm925_vm10, %v4841_v15, %v4846_v34 }
 0x47d   :  { %v4955_v28 = vpop.permute.xlu1 %1435  ;;  %v1357_v52 = vadd.f32 %v1353_v4, %v4787_v18  ;;  %v1347_v17 = vmul.f32 %v1341_v30, %v4633_v36  ;;  %v1356_v44 = vmul.f32 %v6063_v60, %v1348_v1  ;;  %v1418_v57 = vmul.f32 %v1415_v32, %v6010_v0  ;;  %v6065_v1 = vld [vmem:[#allocation11_spill] sm:$0xff] }
 0x47e   :  { %v1417_v22 = vmul.f32 %v1416_v59, %v6009_v6  ;;  %v1443_v34 = vsel %vm510_vm4, %v4901_v47, %v4955_v28  ;;  %v1391_v4 = vmul.f32 %v1386_v14, %v4382_v12  ;;  %v1398_v37 = vmul.f32 %v6065_v1, %v1390_v63  ;;  %v1502_v6 = vpop.permute.xlu0 %1501 }
 0x47f   :  { %2003 = vrot.lane.b32.xlu1 %v6025_v43, %s3241_s7  ;;  %v1414_v32 = vsel %vm925_vm10, %v4831_v29, %v4841_v15  ;;  %v1420_v59 = vmul.f32 %v1413_v9, %v4438_v53  ;;  %v1358_v0 = vadd.f32 %v1354_v50, %v1330_v20  ;;  %v1400_v33 = vmul.f32 %v6065_v1, %v1392_v41 }
 0x480   :  { %v1355_v63 = vmul.f32 %v6063_v60, %v1347_v17  ;;  %v1442_v29 = vsel %vm510_vm4, %v4955_v28, %v4899_v42  ;;  %v1446_v15 = vmul.f32 %v1443_v34, %v3774_v48  ;;  %v1360_v50 = vadd.f32 %v1356_v44, %v4799_v31  ;;  %v6067_v60 = vld [vmem:[#allocation87_spill] sm:$0xff]  ;;  %v6068_v44 = vld [vmem:[#allocation13_spill] sm:$0xff] }
 0x481   :  { %v1440_v46 = vpop.permute.xlu1 %1439  ;;  %v1419_v14 = vmul.f32 %v1414_v32, %v4400_v10  ;;  %v1662_v17 = vsel %vm575_vm5, %v6067_v60, %v6064_v11  ;;  %v1399_v28 = vmul.f32 %v6065_v1, %v1391_v4  ;;  %v1447_v31 = vmul.f32 %v1442_v29, %v6011_v26 }
 0x482   :  { %v1444_v61 = vsel %vm510_vm4, %v1440_v46, %v4901_v47  ;;  %v1441_v18 = vsel %vm510_vm4, %v4899_v42, %v1440_v46  ;;  %v1397_v47 = vmul.f32 %v6065_v1, %v1389_v13  ;;  %v6066_v13 = vld [vmem:[#allocation12_spill] sm:$0xff]  ;;  %v1402_v42 = vadd.f32 %v1398_v37, %v1358_v0 }
 0x483   :  { %2007 = vrot.lane.b32.xlu1 %v6030_v54, %s3241_s7  ;;  %v1445_v46 = vmul.f32 %v1444_v61, %v3777_v27  ;;  %v1448_v20 = vmul.f32 %v1441_v18, %v3791_v7  ;;  %v1426_v41 = vmul.f32 %v6066_v13, %v1418_v57  ;;  %v1425_v9 = vmul.f32 %v6066_v13, %v1417_v22 }
 0x484   :  { %v1428_v34 = vmul.f32 %v6066_v13, %v1420_v59  ;;  %v1401_v18 = vadd.f32 %v1397_v47, %v1357_v52  ;;  %v1404_v7 = vadd.f32 %v1400_v33, %v1360_v50  ;;  %v1454_v57 = vmul.f32 %v6068_v44, %v1446_v15  ;;  %v1506_v33 = vpop.permute.xlu0 %1505  ;;  %v6069_v52 = vld [vmem:[#allocation6_spill] sm:$0xff]  ;;  %v6070_v50 = vld [vmem:[#allocation63_spill] sm:$0xff] }
 0x485   :  { %v1474_v2 = vpop.permute.xlu1 %1473  ;;  %v1453_v32 = vmul.f32 %v6068_v44, %v1445_v46  ;;  %v1456_v22 = vmul.f32 %v6068_v44, %v1448_v20  ;;  %v1359_v4 = vadd.f32 %v1355_v63, %v6069_v52  ;;  %v1427_v1 = vmul.f32 %v6066_v13, %v1419_v14  ;;  %v6071_v14 = vld [vmem:[#allocation64_spill] sm:$0xff]  ;;  %v6074_v52 = vld [vmem:[#allocation65_spill] sm:$0xff] }
 0x486   :  { %v1483_v11 = vsel %vm575_vm5, %v1474_v2, %v4967_v55  ;;  %v1430_v37 = vadd.f32 %v1426_v41, %v1402_v42  ;;  %v1429_v59 = vadd.f32 %v1425_v9, %v1401_v18  ;;  %v1432_v46 = vadd.f32 %v1428_v34, %v1404_v7  ;;  %v6072_v42 = vld [vmem:[#allocation59_spill] sm:$0xff] }
 0x487   :  { %2029 = vrot.lane.b32.xlu1 %v4455_v8, %s3233_s9  ;;  %v1484_v29 = vsel %vm575_vm5, %v5038_v39, %v1474_v2  ;;  %v1485_v60 = vmul.f32 %v1483_v11, %v6070_v50  ;;  %v1403_v7 = vadd.f32 %v1399_v28, %v1359_v4  ;;  %v1455_v2 = vmul.f32 %v6068_v44, %v1447_v31  ;;  %v6075_v44 = vld [vmem:[#allocation93_spill] sm:$0xff]  ;;  %v6077_v4 = vld [vmem:[#allocation75_spill] sm:$0xff] }
 0x488   :  { %v1458_v41 = vadd.f32 %v1454_v57, %v1430_v37  ;;  %v1460_v9 = vadd.f32 %v1456_v22, %v1432_v46  ;;  %v1666_v11 = vmul.f32 %v1662_v17, %v6071_v14  ;;  %v1488_v28 = vmul.f32 %v1484_v29, %v3834_v5  ;;  %v6076_v57 = vld [vmem:[#allocation84_spill] sm:$0xff]  ;;  %v6080_v17 = vld [vmem:[#allocation91_spill] sm:$0xff] }
 0x489   :  { %v1478_v30 = vpop.permute.xlu1 %1477  ;;  %v1690_v22 = vsel %vm1045_vm12, %v6076_v57, %v6075_v44  ;;  %v6081_v29 = vld [vmem:[#allocation3_spill] sm:$0xff] }
 0x48a   :  { %v1482_v0 = vsel %vm575_vm5, %v4967_v55, %v1478_v30  ;;  %v1457_v55 = vadd.f32 %v1453_v32, %v1429_v59  ;;  %v1481_v63 = vsel %vm575_vm5, %v1478_v30, %v5038_v39  ;;  %v6078_v59 = vld [vmem:[#allocation33_spill] sm:$0xff]  ;;  %v6085_v5 = vld [vmem:[#allocation35_spill] sm:$0xff] }
 0x48b   :  { %2031 = vrot.lane.b32.xlu1 %v6025_v43, %s3233_s9  ;;  %v1486_v13 = vmul.f32 %v1482_v0, %v6071_v14  ;;  %v1431_v0 = vadd.f32 %v1427_v1, %v1403_v7  ;;  %v1487_v31 = vmul.f32 %v1481_v63, %v6074_v52  ;;  %v1691_v1 = vsel %vm1045_vm12, %v6080_v17, %v6076_v57  ;;  %v1534_v7 = vpop.permute.xlu0 %1533  ;;  %v6083_v14 = vld [vmem:[#allocation30_spill] sm:$0xff] }
 0x48c   :  { %v1469_v37 = vadd.f32 %v6077_v4, %v1457_v55  ;;  %v1472_v55 = vadd.f32 %v6083_v14, %v1460_v9  ;;  %v6084_v4 = vld [vmem:[#allocation29_spill] sm:$0xff]  ;;  %v1496_v27 = vmul.f32 %v6078_v59, %v1488_v28  ;;  %v6086_v9 = vld [vmem:[#allocation86_spill] sm:$0xff] }
 0x48d   :  { %v1504_v61 = vpop.permute.xlu1 %1503  ;;  %v1494_v46 = vmul.f32 %v6078_v59, %v1486_v13  ;;  %v1495_v26 = vmul.f32 %v6078_v59, %v1487_v31 }
 0x48e   :  { %v1510_v15 = vsel %vm1045_vm12, %v1504_v61, %v1506_v33  ;;  %v1511_v20 = vsel %vm1045_vm12, %v1502_v6, %v1504_v61  ;;  %v6073_v61 = vld [vmem:[#allocation4_spill] sm:$0xff] }
 0x48f   :  { %2035 = vrot.lane.b32.xlu1 %v6030_v54, %s3233_s9  ;;  %v1513_v34 = vmul.f32 %v1511_v20, %v6072_v42  ;;  %v1514_v18 = vmul.f32 %v1510_v15, %v6073_v61  ;;  %v6082_v20 = vld [vmem:[#allocation25_spill] sm:$0xff] }
 0x491   :  { %v1508_v47 = vpop.permute.xlu1 %1507  ;;  %v1521_v13 = vmul.f32 %v6085_v5, %v1513_v34  ;;  %v1522_v50 = vmul.f32 %v6085_v5, %v1514_v18  ;;  %v1689_v34 = vsel %vm1045_vm12, %v6075_v44, %v6086_v9  ;;  %v6087_v18 = vld [vmem:[#allocation73_spill] sm:$0xff] }
 0x492   :  { %v1509_v32 = vsel %vm1045_vm12, %v1506_v33, %v1508_v47  ;;  %v1512_v39 = vsel %vm1045_vm12, %v1508_v47, %v1502_v6  ;;  %v1493_v33 = vmul.f32 %v6078_v59, %v1485_v60  ;;  %v6079_v6 = vld [vmem:[#allocation95_spill] sm:$0xff]  ;;  %v1459_v47 = vadd.f32 %v1455_v2, %v1431_v0 }
 0x493   :  { %2069 = vrot.lane.b32.xlu1 %v4455_v8, %s3235_s20  ;;  %v1515_v15 = vmul.f32 %v1509_v32, %v6081_v29  ;;  %v1516_v63 = vmul.f32 %v1512_v39, %v6082_v20  ;;  %v1470_v60 = vadd.f32 %v6084_v4, %v1458_v41 }
 0x494   :  { %v1497_v39 = vadd.f32 %v1493_v33, %v1469_v37  ;;  %v1471_v28 = vadd.f32 %v6087_v18, %v1459_v47  ;;  %v6088_v33 = vld [vmem:[#allocation15_spill] sm:$0xff] }
 0x495   :  { %v1530_v30 = vpop.permute.xlu1 %1529  ;;  %v1498_v0 = vadd.f32 %v1494_v46, %v1470_v60  ;;  %v1523_v31 = vmul.f32 %v6085_v5, %v1515_v15  ;;  %v1524_v57 = vmul.f32 %v6085_v5, %v1516_v63  ;;  %v1500_v60 = vadd.f32 %v1496_v27, %v1472_v55  ;;  %v6090_v55 = vld [vmem:[#allocation71_spill] sm:$0xff] }
 0x496   :  { %v1525_v37 = vadd.f32 %v1521_v13, %v1497_v39  ;;  %v1692_v27 = vsel %vm1045_vm12, %v6086_v9, %v6080_v17 }
 0x497   :  { %2073 = vrot.lane.b32.xlu1 %v6079_v6, %s3235_s20  ;;  %v1526_v59 = vadd.f32 %v1522_v50, %v1498_v0  ;;  %v1667_v50 = vmul.f32 %v5036_v62, %v6074_v52  ;;  %v1528_v63 = vadd.f32 %v1524_v57, %v1500_v60  ;;  %v1693_v62 = vmul.f32 %v1691_v1, %v6072_v42  ;;  %v6093_v1 = vld [vmem:[#allocation88_spill] sm:$0xff] }
 0x499   :  { %v1532_v6 = vpop.permute.xlu1 %1531 }
 0x49a   :  { %v1538_v2 = vsel %vm1097_vm13, %v1532_v6, %v1534_v7  ;;  %v1539_v32 = vsel %vm1097_vm13, %v1530_v30, %v1532_v6 }
 0x49b   :  { %v1541_v14 = vmul.f32 %v1539_v32, %v4696_v38  ;;  %v1542_v41 = vmul.f32 %v1538_v2, %v4614_v45  ;;  %2099 = vrot.lane.b32.xlu1 %v6025_v43, %s3242_s5  ;;  %v1499_v2 = vadd.f32 %v1495_v26, %v1471_v28  ;;  %v1694_v28 = vmul.f32 %v1690_v22, %v6073_v61 }
 0x49d   :  { %v1549_v46 = vmul.f32 %v6088_v33, %v1541_v14  ;;  %v1550_v6 = vmul.f32 %v6088_v33, %v1542_v41  ;;  %v1536_v4 = vpop.permute.xlu1 %1535  ;;  %v1527_v26 = vadd.f32 %v1523_v31, %v1499_v2  ;;  %v1674_v41 = vmul.f32 %v6061_v21, %v1666_v11  ;;  %v6091_v11 = vld [vmem:[#allocation94_spill] sm:$0xff]  ;;  %v6095_v2 = vld [vmem:[#allocation39_spill] sm:$0xff] }
 0x49e   :  { %v1537_v32 = vsel %vm1097_vm13, %v1534_v7, %v1536_v4  ;;  %v1540_v44 = vsel %vm1097_vm13, %v1536_v4, %v1530_v30  ;;  %v6089_v30 = vld [vmem:[#allocation72_spill] sm:$0xff] }
 0x49f   :  { %v1553_v47 = vadd.f32 %v1549_v46, %v1525_v37  ;;  %v1554_v18 = vadd.f32 %v1550_v6, %v1526_v59  ;;  %v1543_v15 = vmul.f32 %v1537_v32, %v4633_v36  ;;  %v1544_v5 = vmul.f32 %v1540_v44, %v4653_v49  ;;  %2103 = vrot.lane.b32.xlu1 %v6030_v54, %s3242_s5  ;;  %v6092_v46 = vld [vmem:[#allocation90_spill] sm:$0xff] }
 0x4a0   :  { %v1695_v37 = vmul.f32 %v1689_v34, %v6081_v29  ;;  %v1675_v59 = vmul.f32 %v6061_v21, %v1667_v50  ;;  %v1718_v22 = vsel %vm1097_vm13, %v6092_v46, %v6091_v11  ;;  %v6094_v6 = vld [vmem:[#allocation74_spill] sm:$0xff]  ;;  %v1701_v32 = vmul.f32 %v6095_v2, %v1693_v62  ;;  %v6098_v50 = vld [vmem:[#allocation8_spill] sm:$0xff] }
 0x4a1   :  { %v1581_v7 = vadd.f32 %v6089_v30, %v1553_v47  ;;  %v1582_v13 = vadd.f32 %v6090_v55, %v1554_v18  ;;  %v1551_v39 = vmul.f32 %v6088_v33, %v1543_v15  ;;  %v1552_v0 = vmul.f32 %v6088_v33, %v1544_v5  ;;  %v1754_v14 = vpop.permute.xlu1 %1753  ;;  %v6096_v18 = vld [vmem:[#allocation92_spill] sm:$0xff] }
 0x4a2   :  { %v1696_v33 = vmul.f32 %v1692_v27, %v6082_v20  ;;  %v1702_v44 = vmul.f32 %v6095_v2, %v1694_v28  ;;  %v1703_v47 = vmul.f32 %v6095_v2, %v1695_v37  ;;  %v1717_v15 = vsel %vm1097_vm13, %v6091_v11, %v6096_v18  ;;  %v6100_v62 = vld [vmem:[#allocation96_spill] sm:$0xff]  ;;  %v6102_v11 = vld [vmem:[#allocation77_spill] sm:$0xff] }
 0x4a3   :  { %v1609_v17 = vadd.f32 %v4986_v23, %v1581_v7  ;;  %v1610_v9 = vadd.f32 %v4979_v25, %v1582_v13  ;;  %v1555_v31 = vadd.f32 %v1551_v39, %v1527_v26  ;;  %v1556_v57 = vadd.f32 %v1552_v0, %v1528_v63  ;;  %2125 = vrot.lane.b32.xlu1 %v4455_v8, %s3243_s18  ;;  %v6099_v7 = vld [vmem:[#allocation7_spill] sm:$0xff]  ;;  %v1758_v39 = vpop.permute.xlu0 %1757 }
 0x4a4   :  { %v1719_v23 = vsel %vm1097_vm13, %v6093_v1, %v6092_v46  ;;  %v1704_v26 = vmul.f32 %v6095_v2, %v1696_v33  ;;  %v1722_v30 = vmul.f32 %v1718_v22, %v4614_v45  ;;  %v1723_v13 = vmul.f32 %v1717_v15, %v4633_v36 }
 0x4a5   :  { %v1637_v25 = vadd.f32 %v5005_v58, %v1609_v17  ;;  %v1638_v34 = vadd.f32 %v4998_v51, %v1610_v9  ;;  %v1583_v4 = vadd.f32 %v6094_v6, %v1555_v31  ;;  %v1584_v21 = vadd.f32 %v4976_v35, %v1556_v57  ;;  %v1756_v60 = vpop.permute.xlu1 %1755  ;;  %v6097_v58 = vld [vmem:[#allocation52_spill] sm:$0xff] }
 0x4a6   :  { %v1720_v51 = vsel %vm1097_vm13, %v6096_v18, %v6093_v1  ;;  %v1721_v63 = vmul.f32 %v1719_v23, %v4696_v38  ;;  %v6101_v9 = vld [vmem:[#allocation76_spill] sm:$0xff]  ;;  %v1763_v22 = vsel %vm873_vm9, %v1754_v14, %v1756_v60  ;;  %v1762_v6 = vsel %vm873_vm9, %v1756_v60, %v1758_v39 }
 0x4a7   :  { %v1611_v5 = vadd.f32 %v6097_v58, %v1583_v4  ;;  %v1612_v35 = vadd.f32 %v4995_v3, %v1584_v21  ;;  %v1650_v27 = vadd.f32 %v6098_v50, %v1638_v34  ;;  %2127 = vrot.lane.b32.xlu1 %v6025_v43, %s3243_s18  ;;  %v1649_v55 = vadd.f32 %v6099_v7, %v1637_v25  ;;  %v6104_v23 = vld [vmem:[#allocation20_spill] sm:$0xff] }
 0x4a8   :  { %v1724_v17 = vmul.f32 %v1720_v51, %v4653_v49  ;;  %v1729_v25 = vmul.f32 %v6104_v23, %v1721_v63  ;;  %v1730_v58 = vmul.f32 %v6104_v23, %v1722_v30  ;;  %v1786_v63 = vpop.permute.xlu0 %1785 }
 0x4a9   :  { %v1639_v0 = vadd.f32 %v5001_v24, %v1611_v5  ;;  %v1640_v3 = vadd.f32 %v6100_v62, %v1612_v35  ;;  %v1678_v28 = vadd.f32 %v1674_v41, %v1650_v27  ;;  %v1760_v37 = vpop.permute.xlu1 %1759  ;;  %v1677_v31 = vadd.f32 %v6101_v9, %v1649_v55  ;;  %v6103_v24 = vld [vmem:[#allocation9_spill] sm:$0xff] }
 0x4aa   :  { %v1761_v57 = vsel %vm873_vm9, %v1758_v39, %v1760_v37  ;;  %v1764_v33 = vsel %vm873_vm9, %v1760_v37, %v1754_v14  ;;  %v6105_v14 = vld [vmem:[#allocation21_spill] sm:$0xff]  ;;  %v1731_v5 = vmul.f32 %v6104_v23, %v1723_v13  ;;  %v6108_v37 = vld [vmem:[#allocation23_spill] sm:$0xff] }
 0x4ab   :  { %v1651_v46 = vadd.f32 %v6102_v11, %v1639_v0  ;;  %v1652_v1 = vadd.f32 %v6103_v24, %v1640_v3  ;;  %v1765_v41 = vmul.f32 %v1764_v33, %v4411_v56  ;;  %2131 = vrot.lane.b32.xlu1 %v6030_v54, %s3243_s18  ;;  %v1706_v34 = vadd.f32 %v1702_v44, %v1678_v28  ;;  %v6106_v35 = vld [vmem:[#allocation97_spill] sm:$0xff] }
 0x4ac   :  { %v1705_v4 = vadd.f32 %v1701_v32, %v1677_v31  ;;  %v1768_v18 = vmul.f32 %v1761_v57, %v4414_v19  ;;  %v1766_v50 = vmul.f32 %v1763_v22, %v6106_v35  ;;  %v1732_v44 = vmul.f32 %v6104_v23, %v1724_v17  ;;  %v6109_v31 = vld [vmem:[#allocation27_spill] sm:$0xff]  ;;  %v1814_v57 = vpop.permute.xlu0 %1813 }
 0x4ad   :  { %v1679_v21 = vadd.f32 %v1675_v59, %v1651_v46  ;;  %v1680_v2 = vadd.f32 %v5030_v16, %v1652_v1  ;;  %v1773_v15 = vmul.f32 %v6105_v14, %v1765_v41  ;;  %v1782_v51 = vpop.permute.xlu1 %1781  ;;  %v1767_v59 = vmul.f32 %v1762_v6, %v4382_v12  ;;  %v6107_v16 = vld [vmem:[#allocation5_spill] sm:$0xff]  ;;  %v6110_v46 = vld [vmem:[#allocation22_spill] sm:$0xff] }
 0x4ae   :  { %v1733_v27 = vadd.f32 %v1729_v25, %v1705_v4  ;;  %v1734_v55 = vadd.f32 %v1730_v58, %v1706_v34  ;;  %v1776_v30 = vmul.f32 %v6105_v14, %v1768_v18  ;;  %v1774_v62 = vmul.f32 %v6105_v14, %v1766_v50  ;;  %v6111_v6 = vld [vmem:[#allocation98_spill] sm:$0xff] }
 0x4af   :  { %v1707_v60 = vadd.f32 %v1703_v47, %v1679_v21  ;;  %v1708_v32 = vadd.f32 %v1704_v26, %v1680_v2  ;;  %2193 = vrot.lane.b32.xlu1 %v6107_v16, %s3240_s6  ;;  %v1775_v26 = vmul.f32 %v6105_v14, %v1767_v59  ;;  %v6112_v2 = vld [vmem:[#allocation100_spill] sm:$0xff] }
 0x4b0   :  { %v1777_v7 = vadd.f32 %v1773_v15, %v1733_v27  ;;  %v1778_v33 = vadd.f32 %v1774_v62, %v1734_v55  ;;  %v1852_v58 = vpop.permute.xlu0 %1851 }
 0x4b1   :  { %v1735_v39 = vadd.f32 %v1731_v5, %v1707_v60  ;;  %v1736_v0 = vadd.f32 %v1732_v44, %v1708_v32  ;;  %v1784_v13 = vpop.permute.xlu1 %1783  ;;  %v6113_v60 = vld [vmem:[#allocation61_spill] sm:$0xff] }
 0x4b2   :  { %v1790_v3 = vsel %vm925_vm10, %v1784_v13, %v1786_v63  ;;  %v1791_v47 = vsel %vm925_vm10, %v1782_v51, %v1784_v13 }
 0x4b3   :  { %v1780_v28 = vadd.f32 %v1776_v30, %v1736_v0  ;;  %v1794_v17 = vmul.f32 %v1791_v47, %v6108_v37  ;;  %v1795_v9 = vmul.f32 %v1790_v3, %v4400_v10  ;;  %2195 = vrot.lane.b32.xlu1 %v6109_v31, %s3240_s6  ;;  %v1779_v11 = vadd.f32 %v1775_v26, %v1735_v39  ;;  %v6115_v47 = vld [vmem:[#allocation60_spill] sm:$0xff] }
 0x4b4   :  { %v1856_v32 = vpop.permute.xlu0 %1855 }
 0x4b5   :  { %v1802_v22 = vmul.f32 %v6110_v46, %v1794_v17  ;;  %v1803_v24 = vmul.f32 %v6110_v46, %v1795_v9  ;;  %v1788_v1 = vpop.permute.xlu1 %1787 }
 0x4b6   :  { %v1789_v41 = vsel %vm925_vm10, %v1786_v63, %v1788_v1  ;;  %v1792_v23 = vsel %vm925_vm10, %v1788_v1, %v1782_v51 }
 0x4b7   :  { %v1806_v25 = vadd.f32 %v1802_v22, %v1778_v33  ;;  %v1807_v34 = vadd.f32 %v1803_v24, %v1779_v11  ;;  %v1793_v4 = vmul.f32 %v1792_v23, %v6111_v6  ;;  %v1796_v21 = vmul.f32 %v1789_v41, %v4438_v53  ;;  %2199 = vrot.lane.b32.xlu1 %v6112_v2, %s3240_s6  ;;  %v6118_v22 = vld [vmem:[#allocation26_spill] sm:$0xff] }
 0x4b8   :  { %v6119_v24 = vld [vmem:[#allocation58_spill] sm:$0xff] }
 0x4b9   :  { %v1801_v18 = vmul.f32 %v6110_v46, %v1793_v4  ;;  %v1804_v14 = vmul.f32 %v6110_v46, %v1796_v21  ;;  %v1810_v15 = vpop.permute.xlu1 %1809  ;;  %v6117_v46 = vld [vmem:[#allocation55_spill] sm:$0xff]  ;;  %v1844_v1 = vmul.f32 %v6118_v22, %v6119_v24 }
 0x4ba   :  { %v6120_v21 = vld [vmem:[#allocation63_spill] sm:$0xff] }
 0x4bb   :  { %v1805_v5 = vadd.f32 %v1801_v18, %v1777_v7  ;;  %v1808_v50 = vadd.f32 %v1804_v14, %v1780_v28  ;;  %2221 = vrot.lane.b32.xlu1 %v6107_v16, %s3241_s7  ;;  %v6114_v7 = vld [vmem:[#allocation24_spill] sm:$0xff]  ;;  %v6116_v28 = vld [vmem:[#allocation62_spill] sm:$0xff] }
 0x4bc   :  { %v6121_v14 = vld [vmem:[#allocation66_spill] sm:$0xff] }
 0x4bd   :  { %v1812_v51 = vpop.permute.xlu1 %1811 }
 0x4be   :  { %v1818_v27 = vsel %vm510_vm4, %v1812_v51, %v1814_v57  ;;  %v1819_v44 = vsel %vm510_vm4, %v1810_v15, %v1812_v51 }
 0x4bf   :  { %v1822_v63 = vmul.f32 %v1819_v44, %v3774_v48  ;;  %v1823_v59 = vmul.f32 %v1818_v27, %v6113_v60  ;;  %2223 = vrot.lane.b32.xlu1 %v6109_v31, %s3241_s7  ;;  %v6122_v44 = vld [vmem:[#allocation40_spill] sm:$0xff] }
 0x4c1   :  { %v1830_v55 = vmul.f32 %v6114_v7, %v1822_v63  ;;  %v1831_v39 = vmul.f32 %v6114_v7, %v1823_v59  ;;  %v1816_v0 = vpop.permute.xlu1 %1815 }
 0x4c2   :  { %v1817_v30 = vsel %vm510_vm4, %v1814_v57, %v1816_v0  ;;  %v1820_v13 = vsel %vm510_vm4, %v1816_v0, %v1810_v15  ;;  %v1841_v57 = vmul.f32 %v6118_v22, %v6117_v46  ;;  %v6124_v0 = vld [vmem:[#allocation57_spill] sm:$0xff] }
 0x4c3   :  { %v1834_v62 = vadd.f32 %v1830_v55, %v1806_v25  ;;  %v1835_v3 = vadd.f32 %v1831_v39, %v1807_v34  ;;  %v1821_v26 = vmul.f32 %v1820_v13, %v6115_v47  ;;  %v1824_v17 = vmul.f32 %v1817_v30, %v6116_v28  ;;  %2227 = vrot.lane.b32.xlu1 %v6112_v2, %s3241_s7  ;;  %v1878_v25 = vpop.permute.xlu0 %1877  ;;  %v6123_v55 = vld [vmem:[#allocation56_spill] sm:$0xff] }
 0x4c4   :  { %v1842_v39 = vmul.f32 %v6118_v22, %v6123_v55 }
 0x4c5   :  { %v1829_v9 = vmul.f32 %v6114_v7, %v1821_v26  ;;  %v1832_v33 = vmul.f32 %v6114_v7, %v1824_v17  ;;  %v1850_v11 = vpop.permute.xlu1 %1849  ;;  %v6125_v17 = vld [vmem:[#allocation64_spill] sm:$0xff] }
 0x4c6   :  { %v1859_v41 = vsel %vm575_vm5, %v1850_v11, %v1852_v58  ;;  %v1860_v23 = vsel %vm575_vm5, %v1856_v32, %v1850_v11  ;;  %v1846_v46 = vadd.f32 %v1842_v39, %v1834_v62  ;;  %v6126_v62 = vld [vmem:[#allocation42_spill] sm:$0xff] }
 0x4c7   :  { %v1833_v34 = vadd.f32 %v1829_v9, %v1805_v5  ;;  %v1836_v4 = vadd.f32 %v1832_v33, %v1808_v50  ;;  %v1861_v18 = vmul.f32 %v1859_v41, %v6120_v21  ;;  %v1864_v15 = vmul.f32 %v1860_v23, %v6121_v14  ;;  %2249 = vrot.lane.b32.xlu1 %v6107_v16, %s3233_s9  ;;  %v1882_v11 = vpop.permute.xlu0 %1881 }
 0x4c8   :  { %v1843_v5 = vmul.f32 %v6118_v22, %v6124_v0 }
 0x4c9   :  { %v1848_v51 = vadd.f32 %v1844_v1, %v1836_v4  ;;  %v1845_v27 = vadd.f32 %v1841_v57, %v1833_v34  ;;  %v1869_v63 = vmul.f32 %v6122_v44, %v1861_v18  ;;  %v1872_v59 = vmul.f32 %v6122_v44, %v1864_v15  ;;  %v1854_v7 = vpop.permute.xlu1 %1853 }
 0x4ca   :  { %v1857_v50 = vsel %vm575_vm5, %v1854_v7, %v1856_v32  ;;  %v1858_v30 = vsel %vm575_vm5, %v1852_v58, %v1854_v7  ;;  %v1847_v57 = vadd.f32 %v1843_v5, %v1835_v3 }
 0x4cb   :  { %v1873_v13 = vadd.f32 %v1869_v63, %v1845_v27  ;;  %v1876_v26 = vadd.f32 %v1872_v59, %v1848_v51  ;;  %v1862_v9 = vmul.f32 %v1858_v30, %v6125_v17  ;;  %v1863_v33 = vmul.f32 %v1857_v50, %v6074_v52  ;;  %2251 = vrot.lane.b32.xlu1 %v6109_v31, %s3233_s9  ;;  %v6127_v30 = vld [vmem:[#allocation2_spill] sm:$0xff] }
 0x4cd   :  { %v1870_v22 = vmul.f32 %v6122_v44, %v1862_v9  ;;  %v1871_v24 = vmul.f32 %v6122_v44, %v1863_v33  ;;  %v1880_v32 = vpop.permute.xlu1 %1879 }
 0x4ce   :  { %v1886_v58 = vsel %vm1045_vm12, %v1880_v32, %v1882_v11  ;;  %v1887_v1 = vsel %vm1045_vm12, %v1878_v25, %v1880_v32 }
 0x4cf   :  { %v1874_v41 = vadd.f32 %v1870_v22, %v1846_v46  ;;  %v1875_v23 = vadd.f32 %v1871_v24, %v1847_v57  ;;  %v1889_v34 = vmul.f32 %v1887_v1, %v6072_v42  ;;  %v1890_v4 = vmul.f32 %v1886_v58, %v6073_v61  ;;  %2255 = vrot.lane.b32.xlu1 %v6112_v2, %s3233_s9  ;;  %v6128_v57 = vld [vmem:[#allocation28_spill] sm:$0xff] }
 0x4d1   :  { %v1897_v3 = vmul.f32 %v6126_v62, %v1889_v34  ;;  %v1898_v18 = vmul.f32 %v6126_v62, %v1890_v4  ;;  %v1884_v15 = vpop.permute.xlu1 %1883 }
 0x4d2   :  { %v1885_v51 = vsel %vm1045_vm12, %v1882_v11, %v1884_v15  ;;  %v1888_v27 = vsel %vm1045_vm12, %v1884_v15, %v1878_v25  ;;  %v1910_v25 = vpop.permute.xlu0 %1909 }
 0x4d3   :  { %v1901_v44 = vadd.f32 %v1897_v3, %v1873_v13  ;;  %v1902_v63 = vadd.f32 %v1898_v18, %v1874_v41  ;;  %v1891_v59 = vmul.f32 %v1885_v51, %v6081_v29  ;;  %v1892_v7 = vmul.f32 %v1888_v27, %v6082_v20  ;;  %2289 = vrot.lane.b32.xlu1 %v6107_v16, %s3235_s20 }
 0x4d5   :  { %v1899_v55 = vmul.f32 %v6126_v62, %v1891_v59  ;;  %v1900_v39 = vmul.f32 %v6126_v62, %v1892_v7  ;;  %v1906_v0 = vpop.permute.xlu1 %1905 }
 0x4d6   :  { %v1978_v51 = vpop.permute.xlu0 %1977 }
 0x4d7   :  { %v1903_v5 = vadd.f32 %v1899_v55, %v1875_v23  ;;  %v1904_v50 = vadd.f32 %v1900_v39, %v1876_v26  ;;  %2293 = vrot.lane.b32.xlu1 %v6127_v30, %s3235_s20  ;;  %v6129_v55 = vld [vmem:[#allocation31_spill] sm:$0xff] }
 0x4d9   :  { %v1908_v13 = vpop.permute.xlu1 %1907 }
 0x4da   :  { %v1914_v9 = vsel %vm1097_vm13, %v1908_v13, %v1910_v25  ;;  %v1915_v33 = vsel %vm1097_vm13, %v1906_v0, %v1908_v13 }
 0x4db   :  { %v1917_v11 = vmul.f32 %v1915_v33, %v4696_v38  ;;  %v1918_v46 = vmul.f32 %v1914_v9, %v4614_v45  ;;  %2319 = vrot.lane.b32.xlu1 %v6109_v31, %s3242_s5 }
 0x4dd   :  { %v1925_v26 = vmul.f32 %v6128_v57, %v1917_v11  ;;  %v1926_v22 = vmul.f32 %v6128_v57, %v1918_v46  ;;  %v1912_v24 = vpop.permute.xlu1 %1911 }
 0x4de   :  { %v1913_v32 = vsel %vm1097_vm13, %v1910_v25, %v1912_v24  ;;  %v1916_v58 = vsel %vm1097_vm13, %v1912_v24, %v1906_v0 }
 0x4df   :  { %v1929_v1 = vadd.f32 %v1925_v26, %v1901_v44  ;;  %v1930_v41 = vadd.f32 %v1926_v22, %v1902_v63  ;;  %v1919_v23 = vmul.f32 %v1913_v32, %v4633_v36  ;;  %v1920_v34 = vmul.f32 %v1916_v58, %v4653_v49  ;;  %2323 = vrot.lane.b32.xlu1 %v6112_v2, %s3242_s5  ;;  %v2006_v32 = vpop.permute.xlu0 %2005 }
 0x4e1   :  { %v1927_v4 = vmul.f32 %v6128_v57, %v1919_v23  ;;  %v1928_v62 = vmul.f32 %v6128_v57, %v1920_v34  ;;  %v1974_v3 = vpop.permute.xlu1 %1973 }
 0x4e3   :  { %v1931_v18 = vadd.f32 %v1927_v4, %v1903_v5  ;;  %v1932_v15 = vadd.f32 %v1928_v62, %v1904_v50  ;;  %2345 = vrot.lane.b32.xlu1 %v6107_v16, %s3243_s18  ;;  %v6130_v62 = vld [vmem:[#allocation32_spill] sm:$0xff] }
 0x4e5   :  { %v1976_v27 = vpop.permute.xlu1 %1975 }
 0x4e6   :  { %v1982_v44 = vsel %vm873_vm9, %v1976_v27, %v1978_v51  ;;  %v1983_v63 = vsel %vm873_vm9, %v1974_v3, %v1976_v27 }
 0x4e7   :  { %v1986_v59 = vmul.f32 %v1983_v63, %v6106_v35  ;;  %v1987_v7 = vmul.f32 %v1982_v44, %v4382_v12  ;;  %2347 = vrot.lane.b32.xlu1 %v6109_v31, %s3243_s18 }
 0x4e9   :  { %v1994_v39 = vmul.f32 %v6129_v55, %v1986_v59  ;;  %v1995_v0 = vmul.f32 %v6129_v55, %v1987_v7  ;;  %v1980_v5 = vpop.permute.xlu1 %1979  ;;  %v2034_v7 = vpop.permute.xlu0 %2033 }
 0x4ea   :  { %v1981_v50 = vsel %vm873_vm9, %v1978_v51, %v1980_v5  ;;  %v1984_v25 = vsel %vm873_vm9, %v1980_v5, %v1974_v3 }
 0x4eb   :  { %v1998_v13 = vadd.f32 %v1994_v39, %v1930_v41  ;;  %v1999_v9 = vadd.f32 %v1995_v0, %v1931_v18  ;;  %v1985_v33 = vmul.f32 %v1984_v25, %v4411_v56  ;;  %v1988_v11 = vmul.f32 %v1981_v50, %v4414_v19  ;;  %2351 = vrot.lane.b32.xlu1 %v6112_v2, %s3243_s18 }
 0x4ed   :  { %v1993_v46 = vmul.f32 %v6129_v55, %v1985_v33  ;;  %v1996_v57 = vmul.f32 %v6129_v55, %v1988_v11  ;;  %v2002_v26 = vpop.permute.xlu1 %2001 }
 0x4ef   :  { %v1997_v22 = vadd.f32 %v1993_v46, %v1929_v1  ;;  %v2000_v24 = vadd.f32 %v1996_v57, %v1932_v15  ;;  %v6131_v57 = vld [vmem:[#allocation34_spill] sm:$0xff] }
 0x4f1   :  { %v2004_v58 = vpop.permute.xlu1 %2003 }
 0x4f2   :  { %v2010_v41 = vsel %vm925_vm10, %v2004_v58, %v2006_v32  ;;  %v2011_v23 = vsel %vm925_vm10, %v2002_v26, %v2004_v58 }
 0x4f3   :  { %v2014_v34 = vmul.f32 %v2011_v23, %v6108_v37  ;;  %v2015_v4 = vmul.f32 %v2010_v41, %v4400_v10 }
 0x4f5   :  { %v2022_v3 = vmul.f32 %v6130_v62, %v2014_v34  ;;  %v2023_v18 = vmul.f32 %v6130_v62, %v2015_v4  ;;  %v2008_v51 = vpop.permute.xlu1 %2007 }
 0x4f6   :  { %v2009_v1 = vsel %vm925_vm10, %v2006_v32, %v2008_v51  ;;  %v2012_v15 = vsel %vm925_vm10, %v2008_v51, %v2002_v26 }
 0x4f7   :  { %v2026_v27 = vadd.f32 %v2022_v3, %v1998_v13  ;;  %v2027_v44 = vadd.f32 %v2023_v18, %v1999_v9  ;;  %v2013_v63 = vmul.f32 %v2012_v15, %v6111_v6  ;;  %v2016_v59 = vmul.f32 %v2009_v1, %v4438_v53  ;;  %v2072_v9 = vpop.permute.xlu0 %2071  ;;  %v6132_v1 = vld [vmem:[#allocation36_spill] sm:$0xff] }
 0x4f8   :  { %v2061_v15 = vmul.f32 %v6132_v1, %v4455_v8  ;;  %v2062_v30 = vmul.f32 %v6132_v1, %v6025_v43 }
 0x4f9   :  { %v2021_v55 = vmul.f32 %v6130_v62, %v2013_v63  ;;  %v2024_v39 = vmul.f32 %v6130_v62, %v2016_v59  ;;  %v2030_v0 = vpop.permute.xlu1 %2029  ;;  %v2064_v63 = vmul.f32 %v6132_v1, %v6030_v54 }
 0x4fb   :  { %v2025_v5 = vadd.f32 %v2021_v55, %v1997_v22  ;;  %v2028_v50 = vadd.f32 %v2024_v39, %v2000_v24  ;;  %v2076_v62 = vpop.permute.xlu0 %2075 }
 0x4fd   :  { %v2032_v25 = vpop.permute.xlu1 %2031 }
 0x4fe   :  { %v2038_v33 = vsel %vm510_vm4, %v2032_v25, %v2034_v7  ;;  %v2039_v13 = vsel %vm510_vm4, %v2030_v0, %v2032_v25 }
 0x4ff   :  { %v2042_v11 = vmul.f32 %v2039_v13, %v3774_v48  ;;  %v2043_v46 = vmul.f32 %v2038_v33, %v6113_v60  ;;  %v6133_v33 = vld [vmem:[#allocation44_spill] sm:$0xff] }
 0x501   :  { %v2050_v26 = vmul.f32 %v6131_v57, %v2042_v11  ;;  %v2051_v32 = vmul.f32 %v6131_v57, %v2043_v46  ;;  %v2036_v58 = vpop.permute.xlu1 %2035 }
 0x502   :  { %v2037_v22 = vsel %vm510_vm4, %v2034_v7, %v2036_v58  ;;  %v2040_v24 = vsel %vm510_vm4, %v2036_v58, %v2030_v0 }
 0x503   :  { %v5441_v41 = vadd.f32 %v2050_v26, %v2026_v27  ;;  %v2055_v23 = vadd.f32 %v2051_v32, %v2027_v44  ;;  %v2041_v34 = vmul.f32 %v2040_v24, %v6115_v47  ;;  %v2044_v4 = vmul.f32 %v2037_v22, %v6116_v28  ;;  %v6134_v26 = vld [vmem:[#allocation95_spill] sm:$0xff] }
 0x505   :  { %v2049_v3 = vmul.f32 %v6131_v57, %v2041_v34  ;;  %v2052_v18 = vmul.f32 %v6131_v57, %v2044_v4  ;;  %v2070_v51 = vpop.permute.xlu1 %2069 }
 0x506   :  { %v2079_v27 = vsel %vm575_vm5, %v2070_v51, %v2072_v9  ;;  %v2080_v44 = vsel %vm575_vm5, %v2076_v62, %v2070_v51 }
 0x507   :  { %v2053_v59 = vadd.f32 %v2049_v3, %v2025_v5  ;;  %v2056_v7 = vadd.f32 %v2052_v18, %v2028_v50  ;;  %v2081_v55 = vmul.f32 %v2079_v27, %v6120_v21  ;;  %v2084_v39 = vmul.f32 %v2080_v44, %v6121_v14  ;;  %v2098_v18 = vpop.permute.xlu0 %2097 }
 0x508   :  { %v2063_v5 = vmul.f32 %v6132_v1, %v6134_v26 }
 0x509   :  { %v2068_v0 = vadd.f32 %v2064_v63, %v2056_v7  ;;  %v2065_v25 = vadd.f32 %v2061_v15, %v2053_v59  ;;  %v2089_v13 = vmul.f32 %v6133_v33, %v2081_v55  ;;  %v2092_v8 = vmul.f32 %v6133_v33, %v2084_v39  ;;  %v2074_v11 = vpop.permute.xlu1 %2073 }
 0x50a   :  { %v2077_v54 = vsel %vm575_vm5, %v2074_v11, %v2076_v62  ;;  %v2067_v32 = vadd.f32 %v2063_v5, %v2055_v23 }
 0x50b   :  { %v2093_v46 = vadd.f32 %v2089_v13, %v2065_v25  ;;  %v2096_v57 = vadd.f32 %v2092_v8, %v2068_v0  ;;  %v2083_v50 = vmul.f32 %v2077_v54, %v6074_v52  ;;  %v2102_v15 = vpop.permute.xlu0 %2101  ;;  %v2078_v0 = vsel %vm575_vm5, %v2072_v9, %v2074_v11 }
 0x50c   :  { %v2082_v5 = vmul.f32 %v2078_v0, %v6125_v17  ;;  %v6135_v0 = vld [vmem:[#allocation46_spill] sm:$0xff] }
 0x50d   :  { %v2091_v58 = vmul.f32 %v6133_v33, %v2083_v50  ;;  %v2100_v22 = vpop.permute.xlu1 %2099 }
 0x50e   :  { %v2107_v25 = vsel %vm1045_vm12, %v2098_v18, %v2100_v22  ;;  %v2106_v54 = vsel %vm1045_vm12, %v2100_v22, %v2102_v15 }
 0x50f   :  { %v5465_v24 = vadd.f32 %v2091_v58, %v2067_v32  ;;  %v2130_v27 = vpop.permute.xlu0 %2129  ;;  %v2109_v50 = vmul.f32 %v2107_v25, %v6072_v42  ;;  %v2110_v32 = vmul.f32 %v2106_v54, %v6073_v61 }
 0x511   :  { %v2104_v34 = vpop.permute.xlu1 %2103  ;;  %v2117_v25 = vmul.f32 %v6135_v0, %v2109_v50  ;;  %v2118_v52 = vmul.f32 %v6135_v0, %v2110_v32  ;;  %v6137_v32 = vld [vmem:[#allocation38_spill] sm:$0xff] }
 0x512   :  { %v2108_v26 = vsel %vm1045_vm12, %v2104_v34, %v2098_v18  ;;  %v2105_v22 = vsel %vm1045_vm12, %v2102_v15, %v2104_v34  ;;  %v2090_v18 = vmul.f32 %v6133_v33, %v2082_v5 }
 0x513   :  { %v2198_v59 = vpop.permute.xlu0 %2197  ;;  %v2112_v9 = vmul.f32 %v2108_v26, %v6082_v20  ;;  %v2066_v26 = vadd.f32 %v2062_v30, %v5441_v41  ;;  %v2111_v43 = vmul.f32 %v2105_v22, %v6081_v29  ;;  %v2121_v50 = vadd.f32 %v2117_v25, %v2093_v46  ;;  %v6136_v30 = vld [vmem:[#allocation47_spill] sm:$0xff] }
 0x514   :  { %v5507_v41 = vmul.f32 %v6136_v30, %v6107_v16 }
 0x515   :  { %v2126_v4 = vpop.permute.xlu1 %2125  ;;  %v2120_v1 = vmul.f32 %v6135_v0, %v2112_v9  ;;  %v2094_v5 = vadd.f32 %v2090_v18, %v2066_v26  ;;  %v2119_v18 = vmul.f32 %v6135_v0, %v2111_v43 }
 0x517   :  { %v2226_v23 = vpop.permute.xlu0 %2225  ;;  %v2122_v46 = vadd.f32 %v2118_v52, %v2094_v5  ;;  %v2124_v25 = vadd.f32 %v2120_v1, %v2096_v57 }
 0x519   :  { %v2128_v3 = vpop.permute.xlu1 %2127 }
 0x51a   :  { %v2135_v11 = vsel %vm1097_vm13, %v2126_v4, %v2128_v3  ;;  %v2134_v54 = vsel %vm1097_vm13, %v2128_v3, %v2130_v27 }
 0x51b   :  { %v5473_v13 = vpop.permute.xlu0 %2253  ;;  %v2137_v20 = vmul.f32 %v2135_v11, %v4696_v38  ;;  %v2138_v33 = vmul.f32 %v2134_v54, %v4614_v45 }
 0x51d   :  { %v2132_v51 = vpop.permute.xlu1 %2131  ;;  %v2145_v11 = vmul.f32 %v6137_v32, %v2137_v20  ;;  %v2146_v20 = vmul.f32 %v6137_v32, %v2138_v33 }
 0x51e   :  { %v2136_v34 = vsel %vm1097_vm13, %v2132_v51, %v2126_v4  ;;  %v2133_v16 = vsel %vm1097_vm13, %v2130_v27, %v2132_v51 }
 0x51f   :  { %v5489_v31 = vpop.permute.xlu0 %2291  ;;  %v2140_v22 = vmul.f32 %v2136_v34, %v4653_v49  ;;  %v2149_v27 = vadd.f32 %v2145_v11, %v2121_v50 }
 0x521   :  { %v2194_v62 = vpop.permute.xlu1 %2193  ;;  %v2148_v0 = vmul.f32 %v6137_v32, %v2140_v22  ;;  %v6139_v22 = vld [vmem:[#allocation43_spill] sm:$0xff] }
 0x523   :  { %v5515_v54 = vpop.permute.xlu0 %2295 }
 0x525   :  { %v2196_v63 = vpop.permute.xlu1 %2195 }
 0x526   :  { %v2203_v3 = vsel %vm873_vm9, %v2194_v62, %v2196_v63  ;;  %v2202_v52 = vsel %vm873_vm9, %v2196_v63, %v2198_v59 }
 0x527   :  { %v2206_v34 = vmul.f32 %v2203_v3, %v6106_v35  ;;  %v2139_v35 = vmul.f32 %v2133_v16, %v4633_v36 }
 0x529   :  { %v2200_v44 = vpop.permute.xlu1 %2199 }
 0x52a   :  { %v2201_v9 = vsel %vm873_vm9, %v2198_v59, %v2200_v44  ;;  %v2204_v4 = vsel %vm873_vm9, %v2200_v44, %v2194_v62  ;;  %v2207_v59 = vmul.f32 %v2202_v52, %v4382_v12 }
 0x52b   :  { %v2205_v57 = vmul.f32 %v2204_v4, %v4411_v56  ;;  %v2208_v44 = vmul.f32 %v2201_v9, %v4414_v19 }
 0x52d   :  { %v2222_v7 = vpop.permute.xlu1 %2221 }
 0x531   :  { %v5467_v55 = vpop.permute.xlu1 %2223 }
 0x532   :  { %v2231_v49 = vsel %vm925_vm10, %v2222_v7, %v5467_v55  ;;  %v2230_v5 = vsel %vm925_vm10, %v5467_v55, %v2226_v23 }
 0x535   :  { %v2228_v39 = vpop.permute.xlu1 %2227 }
 0x536   :  { %v2232_v62 = vsel %vm925_vm10, %v2228_v39, %v2222_v7  ;;  %v2229_v51 = vsel %vm925_vm10, %v2226_v23, %v2228_v39  ;;  %v2234_v7 = vmul.f32 %v2231_v49, %v6108_v37  ;;  %v6138_v39 = vld [vmem:[#allocation41_spill] sm:$0xff]  ;;  %v2318_v37 = vpop.permute.xlu0 %2317  ;;  %v2152_v23 = vadd.f32 %v2148_v0, %v2124_v25 }
 0x537   :  { %v2233_v1 = vmul.f32 %v2232_v62, %v6111_v6  ;;  %v2214_v33 = vmul.f32 %v6138_v39, %v2206_v34  ;;  %v2236_v49 = vmul.f32 %v2229_v51, %v4438_v53  ;;  %v2150_v6 = vadd.f32 %v2146_v20, %v2122_v46 }
 0x538   :  { %v2213_v50 = vmul.f32 %v6138_v39, %v2205_v57  ;;  %v2235_v53 = vmul.f32 %v2230_v5, %v4400_v10  ;;  %v2242_v9 = vmul.f32 %v6139_v22, %v2234_v7 }
 0x539   :  { %v2250_v8 = vpop.permute.xlu1 %2249  ;;  %v2241_v4 = vmul.f32 %v6139_v22, %v2233_v1  ;;  %v2218_v16 = vadd.f32 %v2214_v33, %v2150_v6  ;;  %v2244_v20 = vmul.f32 %v6139_v22, %v2236_v49 }
 0x53a   :  { %v2243_v57 = vmul.f32 %v6139_v22, %v2235_v53 }
 0x53d   :  { %v2252_v58 = vpop.permute.xlu1 %2251 }
 0x53e   :  { %v2259_v56 = vsel %vm510_vm4, %v2250_v8, %v2252_v58  ;;  %v2258_v12 = vsel %vm510_vm4, %v2252_v58, %v5473_v13 }
 0x53f   :  { %v2262_v11 = vmul.f32 %v2259_v56, %v3774_v48  ;;  %v2263_v48 = vmul.f32 %v2258_v12, %v6113_v60 }
 0x541   :  { %v2256_v15 = vpop.permute.xlu1 %2255 }
 0x542   :  { %v2260_v43 = vsel %vm510_vm4, %v2256_v15, %v2250_v8  ;;  %v2257_v19 = vsel %vm510_vm4, %v5473_v13, %v2256_v15  ;;  %v2216_v8 = vmul.f32 %v6138_v39, %v2208_v44  ;;  %v2147_v15 = vmul.f32 %v6137_v32, %v2139_v35 }
 0x543   :  { %v2261_v3 = vmul.f32 %v2260_v43, %v6115_v47  ;;  %v2264_v55 = vmul.f32 %v2257_v19, %v6116_v28  ;;  %v2123_v47 = vadd.f32 %v2119_v18, %v5465_v24  ;;  %v2215_v32 = vmul.f32 %v6138_v39, %v2207_v59  ;;  %v6140_v28 = vld [vmem:[#allocation45_spill] sm:$0xff]  ;;  %v2322_v18 = vpop.permute.xlu0 %2321 }
 0x544   :  { %v2217_v13 = vadd.f32 %v2213_v50, %v2149_v27  ;;  %v2220_v58 = vadd.f32 %v2216_v8, %v2152_v23  ;;  %v2270_v10 = vmul.f32 %v6140_v28, %v2262_v11  ;;  %v2246_v44 = vadd.f32 %v2242_v9, %v2218_v16 }
 0x545   :  { %v2290_v26 = vpop.permute.xlu1 %2289  ;;  %v2269_v25 = vmul.f32 %v6140_v28, %v2261_v3  ;;  %v2272_v34 = vmul.f32 %v6140_v28, %v2264_v55  ;;  %v2151_v52 = vadd.f32 %v2147_v15, %v2123_v47  ;;  %v2271_v59 = vmul.f32 %v6140_v28, %v2263_v48 }
 0x546   :  { %v2299_v62 = vsel %vm575_vm5, %v2290_v26, %v5489_v31  ;;  %v2245_v60 = vadd.f32 %v2241_v4, %v2217_v13  ;;  %v2248_v27 = vadd.f32 %v2244_v20, %v2220_v58  ;;  %v2300_v35 = vsel %vm575_vm5, %v5515_v54, %v2290_v26 }
 0x547   :  { %v2219_v19 = vadd.f32 %v2215_v32, %v2151_v52  ;;  %v2274_v39 = vadd.f32 %v2270_v10, %v2246_v44 }
 0x548   :  { %v2273_v7 = vadd.f32 %v2269_v25, %v2245_v60  ;;  %v2276_v26 = vadd.f32 %v2272_v34, %v2248_v27 }
 0x549   :  { %v2294_v63 = vpop.permute.xlu1 %2293  ;;  %v2247_v50 = vadd.f32 %v2243_v57, %v2219_v19 }
 0x54a   :  { %v2298_v24 = vsel %vm575_vm5, %v5489_v31, %v2294_v63  ;;  %v2301_v31 = vmul.f32 %v2299_v62, %v6120_v21  ;;  %v2297_v1 = vsel %vm575_vm5, %v2294_v63, %v5515_v54  ;;  %v2304_v54 = vmul.f32 %v2300_v35, %v6121_v14  ;;  %v6141_v63 = vld [vmem:[#allocation65_spill] sm:$0xff]  ;;  %v2350_v14 = vpop.permute.xlu0 %2349 }
 0x54b   :  { %v2302_v56 = vmul.f32 %v2298_v24, %v6125_v17  ;;  %v2284_v17 = vmul.f32 %v6136_v30, %v6112_v2  ;;  %v2303_v8 = vmul.f32 %v2297_v1, %v6141_v63  ;;  %v2285_v3 = vadd.f32 %v5507_v41, %v2273_v7  ;;  %v6145_v2 = vld [vmem:[#allocation25_spill] sm:$0xff] }
 0x54c   :  { %v2275_v55 = vadd.f32 %v2271_v59, %v2247_v50 }
 0x54d   :  { %v2320_v46 = vpop.permute.xlu1 %2319  ;;  %v2288_v9 = vadd.f32 %v2284_v17, %v2276_v26  ;;  %v6150_v26 = vld [vmem:[#allocation68_spill] sm:$0xff] }
 0x54e   :  { %v2326_v0 = vsel %vm1045_vm12, %v2320_v46, %v2322_v18  ;;  %v2327_v43 = vsel %vm1045_vm12, %v2318_v37, %v2320_v46  ;;  %v6146_v46 = vld [vmem:[#allocation50_spill] sm:$0xff] }
 0x54f   :  { %v2329_v33 = vmul.f32 %v2327_v43, %v6072_v42  ;;  %v2330_v5 = vmul.f32 %v2326_v0, %v6073_v61  ;;  %v6142_v42 = vld [vmem:[#allocation48_spill] sm:$0xff]  ;;  %v6143_v61 = vld [vmem:[#allocation27_spill] sm:$0xff]  ;;  %v6148_v43 = vld [vmem:[#allocation101_spill] sm:$0xff] }
 0x550   :  { %v2309_v15 = vmul.f32 %v6142_v42, %v2301_v31  ;;  %v2282_v12 = vmul.f32 %v6136_v30, %v6143_v61  ;;  %v2310_v11 = vmul.f32 %v6142_v42, %v2302_v56  ;;  %v2312_v16 = vmul.f32 %v6142_v42, %v2304_v54  ;;  %v6149_v56 = vld [vmem:[#allocation67_spill] sm:$0xff] }
 0x551   :  { %v2324_v51 = vpop.permute.xlu1 %2323  ;;  %v2337_v41 = vmul.f32 %v6146_v46, %v2329_v33  ;;  %v2338_v47 = vmul.f32 %v6146_v46, %v2330_v5  ;;  %v2311_v20 = vmul.f32 %v6142_v42, %v2303_v8 }
 0x552   :  { %v2325_v49 = vsel %vm1045_vm12, %v2322_v18, %v2324_v51  ;;  %v2328_v21 = vsel %vm1045_vm12, %v2324_v51, %v2318_v37  ;;  %v6144_v37 = vld [vmem:[#allocation2_spill] sm:$0xff]  ;;  %v2286_v4 = vadd.f32 %v2282_v12, %v2274_v39  ;;  %v6147_v18 = vld [vmem:[#allocation49_spill] sm:$0xff]  ;;  %v2316_v60 = vadd.f32 %v2312_v16, %v2288_v9  ;;  %v2790_v16 = vld [vmem:[%s5712_s16 + $0x8] sm:$0xff] }
 0x553   :  { %v2283_v23 = vmul.f32 %v6136_v30, %v6144_v37  ;;  %v2331_v53 = vmul.f32 %v2325_v49, %v6081_v29  ;;  %v2332_v22 = vmul.f32 %v2328_v21, %v6145_v2  ;;  %v2313_v30 = vadd.f32 %v2309_v15, %v2285_v3 }
 0x554   :  { %v2314_v58 = vadd.f32 %v2310_v11, %v2286_v4 }
 0x555   :  { %v2346_v6 = vpop.permute.xlu1 %2345  ;;  %v2287_v25 = vadd.f32 %v2283_v23, %v2275_v55  ;;  %v2339_v10 = vmul.f32 %v6146_v46, %v2331_v53  ;;  %v2340_v34 = vmul.f32 %v6146_v46, %v2332_v22  ;;  %v2341_v62 = vadd.f32 %v2337_v41, %v2313_v30  ;;  %v2397_v53 = vld [vmem:[%s5713_s11] sm:$0xff] }
 0x556   :  { %v2342_v24 = vadd.f32 %v2338_v47, %v2314_v58  ;;  %v6153_v41 = vmov 0.0   ;;  %v2576_v47 = vld [vmem:[%s5714_s14 + $0x8] sm:$0xff] }
 0x557   :  { %v2315_v51 = vadd.f32 %v2311_v20, %v2287_v25  ;;  %v2344_v1 = vadd.f32 %v2340_v34, %v2316_v60  ;;  %2584 = vperm.xlu1 %3117, %v2576_v47   ;;  %v2402_v20 = vpop.permute.xlu0 %2401 }
 0x559   :  { %v2348_v32 = vpop.permute.xlu1 %2347  ;;  %v2343_v31 = vadd.f32 %v2339_v10, %v2315_v51 }
 0x55a   :  { %v2354_v13 = vsel %vm1097_vm13, %v2348_v32, %v2350_v14  ;;  %v2355_v29 = vsel %vm1097_vm13, %v2346_v6, %v2348_v32  ;;  %v2575_v32 = vld [vmem:[%s5714_s14] sm:$0xff] }
 0x55b   :  { %v2357_v48 = vmul.f32 %v2355_v29, %v4696_v38  ;;  %v2358_v28 = vmul.f32 %v2354_v13, %v4614_v45  ;;  %2579 = vperm.xlu1 %3117, %v2575_v32  }
 0x55d   :  { %v2365_v52 = vmul.f32 %v6147_v18, %v2357_v48  ;;  %v2366_v57 = vmul.f32 %v6147_v18, %v2358_v28  ;;  %v2352_v44 = vpop.permute.xlu1 %2351 }
 0x55e   :  { %v2353_v27 = vsel %vm1097_vm13, %v2350_v14, %v2352_v44  ;;  %v2356_v45 = vsel %vm1097_vm13, %v2352_v44, %v2346_v6  ;;  %v6151_v6 = vld [vmem:[#allocation69_spill] sm:$0xff] }
 0x55f   :  { %v2369_v38 = vadd.f32 %v2365_v52, %v2341_v62  ;;  %v2370_v35 = vadd.f32 %v2366_v57, %v2342_v24  ;;  %v2359_v0 = vmul.f32 %v2353_v27, %v4633_v36  ;;  %v2360_v7 = vmul.f32 %v2356_v45, %v6148_v43  ;;  %v6152_v36 = vld [vmem:[#allocation70_spill] sm:$0xff]  ;;  %2798 = vperm.xlu1 %3117, %v2790_v16  }
 0x561   :  { %v2373_v19 = vadd.f32 %v2369_v38, %v6149_v56  ;;  %v2367_v59 = vmul.f32 %v6147_v18, %v2359_v0  ;;  %v2368_v39 = vmul.f32 %v6147_v18, %v2360_v7  ;;  %v2374_v33 = vadd.f32 %v2370_v35, %v6150_v26 }
 0x563   :  { %v2381_v5 = vmul.f32 0.70710677, %v2373_v19  ;;  %v2371_v49 = vadd.f32 %v2367_v59, %v2343_v31  ;;  %v2372_v40 = vadd.f32 %v2368_v39, %v2344_v1  ;;  %v2382_v21 = vmul.f32 0.70710677, %v2374_v33  ;;  %v2573_v1 = vld [vmem:[%s5715_s13] sm:$0xff] }
 0x564   :  { %v2377_v42 = vmul.f32 0.5, %v2373_v19  ;;  %v2378_v61 = vmul.f32 0.5, %v2374_v33 }
 0x565   :  { %3150 = verf.f32 %v2381_v5  ;;  %v2375_v50 = vadd.f32 %v2371_v49, %v6151_v6  ;;  %v2376_v17 = vadd.f32 %v2372_v40, %v6152_v36  ;;  %v2574_v5 = vld [vmem:[%s5715_s13 + $0x8] sm:$0xff] }
 0x566   :  { %3152 = verf.f32 %v2382_v21 }
 0x567   :  { %v2383_v54 = vmul.f32 0.70710677, %v2375_v50  ;;  %v2384_v63 = vmul.f32 0.70710677, %v2376_v17  ;;  %v2379_v2 = vmul.f32 0.5, %v2375_v50  ;;  %v2380_v14 = vmul.f32 0.5, %v2376_v17 }
 0x569   :  { %3154 = verf.f32 %v2383_v54 }
 0x56a   :  { %3156 = verf.f32 %v2384_v63 }
 0x572   :  { %v3151_v8 = vpop.eup %3150 }
 0x573   :  { %v3153_v3 = vpop.eup %3152  ;;  %v2389_v15 = vadd.f32 1.0, %v3151_v8 }
 0x574   :  { %v2390_v12 = vadd.f32 1.0, %v3153_v3 }
 0x575   :  { %v2393_v11 = vmul.f32 %v2389_v15, %v2377_v42 }
 0x576   :  { %v3155_v55 = vpop.eup %3154  ;;  %v2394_v37 = vmul.f32 %v2390_v12, %v2378_v61 }
 0x577   :  { %v3157_v23 = vpop.eup %3156  ;;  %v2391_v22 = vadd.f32 1.0, %v3155_v55 }
 0x578   :  { %2437 = vmatprep.subr.mxu0 %v2394_v37  ;;  %v2392_v9 = vadd.f32 1.0, %v3157_v23 }
 0x579   :  { %2438 = vmatpush1.msra.mxu0 %v2393_v11  ;;  %v2395_v4 = vmul.f32 %v2391_v22, %v2379_v2 }
 0x57a   :  { %2989 = vmatmul.mubr.msk.f32.vlgmr.msra.gmra.mxu0 %vm74_vm0, %v2397_v53  ;;  %v2396_v46 = vmul.f32 %v2392_v9, %v2380_v14 }
 0x57b   :  { %2657 = vmatprep.mubr.f32.mxu0 %v6153_v41 }
 0x57c   :  { %2508 = vmatprep.subr.mxu1 %v2396_v46 }
 0x57d   :  { %2509 = vmatpush1.msra.mxu1 %v2395_v4 }
 0x57e   :  { %2990 = vmatmul.mubr.msk.f32.vlgmr.msra.gmra.mxu1 %vm74_vm0, %v2397_v53 }
 0x57f   :  { %2734 = vmatprep.mubr.f32.mxu1 %v6153_v41 }
 0x5d2   :  { %v2585_v40 = vpop.permute.xlu1 %2584 }
 0x5d6   :  { %v2580_v21 = vpop.permute.xlu1 %2579 }
 0x63a   :  { %v2473_v13 = vpop.f32.mrf.mxu0 }
 0x63b   :  { %v2474_v29 = vadd.f32 %v2473_v13, %v2402_v20 }
 0x63c   :  { %v2475_v30 = vpop.f32.mrf.mxu0 }
 0x63d   :  { %v2549_v58 = vadd.f32 %v2474_v29, %v2393_v11  ;;  %v2476_v48 = vadd.f32 %v2475_v30, %v2402_v20 }
 0x63e   :  { %v2544_v28 = vpop.f32.mrf.mxu1 }
 0x63f   :  { %v2557_v25 = vmul.f32 0.70710677, %v2549_v58  ;;  %v2550_v10 = vadd.f32 %v2476_v48, %v2394_v37  ;;  %v2545_v34 = vadd.f32 %v2544_v28, %v2402_v20  ;;  %v2553_v43 = vmul.f32 0.5, %v2549_v58 }
 0x640   :  { %v2546_v62 = vpop.f32.mrf.mxu1 }
 0x641   :  { %3158 = verf.f32 %v2557_v25  ;;  %v2558_v24 = vmul.f32 0.70710677, %v2550_v10  ;;  %v2551_v18 = vadd.f32 %v2545_v34, %v2395_v4  ;;  %v2547_v52 = vadd.f32 %v2546_v62, %v2402_v20 }
 0x642   :  { %v2554_v38 = vmul.f32 0.5, %v2550_v10 }
 0x643   :  { %3160 = verf.f32 %v2558_v24  ;;  %v2559_v57 = vmul.f32 0.70710677, %v2551_v18  ;;  %v2552_v44 = vadd.f32 %v2547_v52, %v2396_v46  ;;  %v2555_v26 = vmul.f32 0.5, %v2551_v18 }
 0x645   :  { %3162 = verf.f32 %v2559_v57  ;;  %v2560_v60 = vmul.f32 0.70710677, %v2552_v44  ;;  %v2556_v59 = vmul.f32 0.5, %v2552_v44 }
 0x647   :  { %3164 = verf.f32 %v2560_v60 }
 0x64e   :  { %v3159_v51 = vpop.eup %3158 }
 0x64f   :  { %v2565_v45 = vadd.f32 1.0, %v3159_v51 }
 0x650   :  { %v3161_v27 = vpop.eup %3160 }
 0x651   :  { %v2566_v35 = vadd.f32 1.0, %v3161_v27  ;;  %v2569_v31 = vmul.f32 %v2565_v45, %v2553_v43 }
 0x652   :  { %v3163_v0 = vpop.eup %3162 }
 0x653   :  { %v2570_v7 = vmul.f32 %v2566_v35, %v2554_v38  ;;  %v2567_v19 = vadd.f32 1.0, %v3163_v0  ;;  %v2787_v38 = vld [vmem:[%s5716_s15] sm:$0xff] }
 0x654   :  { %v3165_v56 = vpop.eup %3164 }
 0x655   :  { %2623 = vmatprep.subr.mxu0 %v2570_v7  ;;  %v2568_v39 = vadd.f32 1.0, %v3165_v56  ;;  %v2571_v49 = vmul.f32 %v2567_v19, %v2555_v26 }
 0x656   :  { %2624 = vmatpush1.msra.mxu0 %v2569_v31 }
 0x657   :  { %2991 = vmatmul.mubr.msk.f32.vlgmr.msra.gmra.mxu0 %vm74_vm0, %v2573_v1  ;;  %v2572_v33 = vmul.f32 %v2568_v39, %v2556_v59  ;;  %v2788_v39 = vld [vmem:[%s5716_s15 + $0x8] sm:$0xff] }
 0x658   :  { %2663 = vmatprep.mubr.f32.mxu0 %v6153_v41 }
 0x659   :  { %2700 = vmatprep.subr.mxu1 %v2572_v33  ;;  %v2794_v33 = vpop.permute.xlu0 %2793 }
 0x65a   :  { %2701 = vmatpush1.msra.mxu1 %v2571_v49 }
 0x65b   :  { %2992 = vmatmul.mubr.msk.f32.gmra.mxu0 %vm74_vm0, %v2574_v5  ;;  %2993 = vmatmul.mubr.msk.f32.vlgmr.msra.gmra.mxu1 %vm74_vm0, %v2573_v1 }
 0x65c   :  { %2871 = vmatprep.mubr.f32.mxu0 %v6153_v41  ;;  %2740 = vmatprep.mubr.f32.mxu1 %v6153_v41 }
 0x65f   :  { %2994 = vmatmul.mubr.msk.f32.gmra.mxu1 %vm74_vm0, %v2574_v5 }
 0x660   :  { %2948 = vmatprep.mubr.f32.mxu1 %v6153_v41 }
 0x717   :  { %v2659_v6 = vpop.f32.mrf.mxu0 }
 0x718   :  { %v2660_v50 = vadd.f32 %v2659_v6, %v2580_v21  ;;  %v2799_v6 = vpop.permute.xlu1 %2798 }
 0x719   :  { %v2661_v36 = vpop.f32.mrf.mxu0 }
 0x71a   :  { %v2662_v17 = vadd.f32 %v2661_v36, %v2580_v21  ;;  %v2755_v42 = vmul.f32 0.70710677, %v2660_v50  ;;  %v2747_v52 = vmul.f32 0.5, %v2660_v50 }
 0x71b   :  { %v2665_v54 = vpop.f32.mrf.mxu0  ;;  %v2736_v3 = vpop.f32.mrf.mxu1 }
 0x71c   :  { %v2756_v63 = vmul.f32 0.70710677, %v2662_v17  ;;  %v2666_v8 = vadd.f32 %v2665_v54, %v2585_v40  ;;  %v2737_v12 = vadd.f32 %v2736_v3, %v2580_v21  ;;  %v2748_v62 = vmul.f32 0.5, %v2662_v17 }
 0x71d   :  { %v2667_v15 = vpop.f32.mrf.mxu0  ;;  %v2738_v55 = vpop.f32.mrf.mxu1 }
 0x71e   :  { %v2759_v61 = vmul.f32 0.70710677, %v2666_v8  ;;  %v2668_v11 = vadd.f32 %v2667_v15, %v2585_v40  ;;  %3166 = verf.f32 %v2756_v63  ;;  %v2739_v37 = vadd.f32 %v2738_v55, %v2580_v21 }
 0x71f   :  { %v2742_v53 = vpop.f32.mrf.mxu1  ;;  %v2757_v14 = vmul.f32 0.70710677, %v2737_v12  ;;  %v2751_v10 = vmul.f32 0.5, %v2666_v8  ;;  %v2749_v56 = vmul.f32 0.5, %v2737_v12 }
 0x720   :  { %3168 = verf.f32 %v2759_v61  ;;  %v2760_v23 = vmul.f32 0.70710677, %v2668_v11  ;;  %v2758_v2 = vmul.f32 0.70710677, %v2739_v37  ;;  %v2743_v22 = vadd.f32 %v2742_v53, %v2585_v40 }
 0x721   :  { %3170 = verf.f32 %v2755_v42  ;;  %v2744_v9 = vpop.f32.mrf.mxu1  ;;  %v2752_v30 = vmul.f32 0.5, %v2668_v11  ;;  %v2750_v31 = vmul.f32 0.5, %v2739_v37 }
 0x722   :  { %3172 = verf.f32 %v2760_v23  ;;  %v2761_v4 = vmul.f32 0.70710677, %v2743_v22  ;;  %v2745_v46 = vadd.f32 %v2744_v9, %v2585_v40  ;;  %v2753_v7 = vmul.f32 0.5, %v2743_v22 }
 0x723   :  { %3174 = verf.f32 %v2758_v2 }
 0x724   :  { %3176 = verf.f32 %v2761_v4  ;;  %v2762_v47 = vmul.f32 0.70710677, %v2745_v46  ;;  %v2754_v45 = vmul.f32 0.5, %v2745_v46 }
 0x725   :  { %3178 = verf.f32 %v2757_v14 }
 0x726   :  { %3180 = verf.f32 %v2762_v47 }
 0x72b   :  { %v3167_v32 = vpop.eup %3166 }
 0x72c   :  { %v2772_v48 = vadd.f32 1.0, %v3167_v32 }
 0x72d   :  { %v3169_v16 = vpop.eup %3168 }
 0x72e   :  { %v3171_v20 = vpop.eup %3170  ;;  %v2775_v29 = vadd.f32 1.0, %v3169_v16  ;;  %v2780_v51 = vmul.f32 %v2772_v48, %v2748_v62 }
 0x72f   :  { %v3173_v13 = vpop.eup %3172  ;;  %v2771_v25 = vadd.f32 1.0, %v3171_v20 }
 0x730   :  { %v2776_v58 = vadd.f32 1.0, %v3173_v13  ;;  %v3175_v28 = vpop.eup %3174  ;;  %v2783_v57 = vmul.f32 %v2775_v29, %v2751_v10 }
 0x731   :  { %v3177_v34 = vpop.eup %3176  ;;  %v2779_v27 = vmul.f32 %v2771_v25, %v2747_v52  ;;  %v2774_v0 = vadd.f32 1.0, %v3175_v28 }
 0x732   :  { %v2784_v24 = vmul.f32 %v2776_v58, %v2752_v30  ;;  %v3179_v18 = vpop.eup %3178  ;;  %v2777_v60 = vadd.f32 1.0, %v3177_v34 }
 0x733   :  { %v3181_v44 = vpop.eup %3180  ;;  %v2773_v43 = vadd.f32 1.0, %v3179_v18  ;;  %v2782_v59 = vmul.f32 %v2774_v0, %v2750_v31 }
 0x734   :  { %2835 = vmatprep.subr.mxu0 %v2784_v24  ;;  %v2778_v35 = vadd.f32 1.0, %v3181_v44  ;;  %v2785_v19 = vmul.f32 %v2777_v60, %v2753_v7 }
 0x735   :  { %2836 = vmatpush1.msra.mxu0 %v2783_v57  ;;  %v2781_v26 = vmul.f32 %v2773_v43, %v2749_v56 }
 0x736   :  { %2837 = vmatprep.subr.mxu0 %v2780_v51  ;;  %v2786_v1 = vmul.f32 %v2778_v35, %v2754_v45 }
 0x737   :  { %2838 = vmatpush1.msra.mxu0 %v2779_v27 }
 0x738   :  { %2995 = vmatmul.mubr.msk.f32.vlgmr.msra.gmra.mxu0 %vm283_vm1, %v2787_v38  ;;  %2912 = vmatprep.subr.mxu1 %v2786_v1 }
 0x739   :  { %2877 = vmatprep.mubr.f32.mxu0 %v6153_v41  ;;  %2913 = vmatpush1.msra.mxu1 %v2785_v19 }
 0x73a   :  { %2914 = vmatprep.subr.mxu1 %v2782_v59 }
 0x73b   :  { %2915 = vmatpush1.msra.mxu1 %v2781_v26 }
 0x73c   :  { %2996 = vmatmul.mubr.msk.f32.gmra.mxu0 %vm283_vm1, %v2788_v39  ;;  %2997 = vmatmul.mubr.msk.f32.vlgmr.msra.gmra.mxu1 %vm283_vm1, %v2787_v38 }
 0x73d   :  { %2954 = vmatprep.mubr.f32.mxu1 %v6153_v41 }
 0x740   :  { %2998 = vmatmul.mubr.msk.f32.gmra.mxu1 %vm283_vm1, %v2788_v39 }
 0x7f8   :  { %v2873_v5 = vpop.f32.mrf.mxu0 }
 0x7f9   :  { %v2874_v49 = vadd.f32 %v2873_v5, %v2794_v33 }
 0x7fa   :  { %v2875_v40 = vpop.f32.mrf.mxu0 }
 0x7fb   :  { %2961 = vst [vmem:[%s5717_s17] sm:$0xff] %v2874_v49  ;;  %v2876_v21 = vadd.f32 %v2875_v40, %v2794_v33 }
 0x7fc   :  { %v2879_v50 = vpop.f32.mrf.mxu0  ;;  %v2950_v17 = vpop.f32.mrf.mxu1 }
 0x7fd   :  { %2962 = vst [vmem:[%s5717_s17 + $0x8] sm:$0xff] %v2876_v21  ;;  %v2880_v36 = vadd.f32 %v2879_v50, %v2799_v6  ;;  %v2951_v41 = vadd.f32 %v2950_v17, %v2794_v33 }
 0x7fe   :  { %v2881_v54 = vpop.f32.mrf.mxu0  ;;  %v2952_v8 = vpop.f32.mrf.mxu1 }
 0x7ff   :  { %2965 = vst [vmem:[%s5717_s17 + $0x20] sm:$0xff] %v2880_v36  ;;  %v2882_v63 = vadd.f32 %v2881_v54, %v2799_v6  ;;  %2963 = vst [vmem:[%s5717_s17 + $0x10] sm:$0xff] %v2951_v41  ;;  %v2953_v3 = vadd.f32 %v2952_v8, %v2794_v33 }
 0x800   :  { %v2956_v42 = vpop.f32.mrf.mxu1 }
 0x801   :  { %2966 = vst [vmem:[%s5717_s17 + $0x28] sm:$0xff] %v2882_v63  ;;  %2964 = vst [vmem:[%s5717_s17 + $0x18] sm:$0xff] %v2953_v3  ;;  %v2957_v15 = vadd.f32 %v2956_v42, %v2799_v6 }
 0x802   :  { %v2958_v61 = vpop.f32.mrf.mxu1 }
 0x803   :  { %2967 = vst [vmem:[%s5717_s17 + $0x30] sm:$0xff] %v2957_v15  ;;  %v2959_v12 = vadd.f32 %v2958_v61, %v2799_v6 }
 0x805   :  { %2968 = vst [vmem:[%s5717_s17 + $0x38] sm:$0xff] %v2959_v12 }

</bundles_post_ra>
